<compile_context>
chip_gen: v6e
topology: v6e:2x2x1
jax: 0.10.0
libtpu: 0.0.40
codegen_flags: <defaults>
</compile_context>

<pallas_src>
import jax
import jax.numpy as jnp
from jax.experimental import pallas as pl
from jax.experimental.pallas import tpu as pltpu


def _sigmoid(x):
    # explicit formula: exp lowers to the EUP, avoids relying on logistic lowering
    return 1.0 / (1.0 + jnp.exp(-x))


def _dien_kernel(tgt_ref, hist_ref,
                 ww_ref, bw_ref,
                 wxu_ref, whu_ref, bu_ref,
                 wxr_ref, whr_ref, br_ref,
                 wxg_ref, bgx_ref, whg_ref, bgh_ref,
                 w2h_ref, w2t_ref, b2_ref,
                 out_ref):
    # tgt_ref : (T, tb, I)   time-major targets tile
    # hist_ref: (T, tb, H)   time-major history tile
    # out_ref : (tb, H)
    T = tgt_ref.shape[0]
    tb = tgt_ref.shape[1]
    H = hist_ref.shape[2]
    f32 = jnp.float32

    ww = ww_ref[...]
    bw = bw_ref[...]

    # ---- Phase 1: attention logits per timestep, softmax over time -------------
    logit_cols = []
    for t in range(T):                      # T is a trace-time constant
        x_t = tgt_ref[t]                    # (tb, I)
        s_t = hist_ref[t]                   # (tb, H)
        aw = jnp.dot(x_t, ww, preferred_element_type=f32) + bw
        logit_cols.append(jnp.sum(aw * s_t, axis=-1, keepdims=True))   # (tb, 1)
    logits = jnp.concatenate(logit_cols, axis=-1)                      # (tb, T)
    m = jnp.max(logits, axis=-1, keepdims=True)
    e = jnp.exp(logits - m)
    att = e / jnp.sum(e, axis=-1, keepdims=True)                       # (tb, T)

    # ---- Phase 2: AUGRU recurrence over time ------------------------------------
    wxu = wxu_ref[...]; whu = whu_ref[...]; bu = bu_ref[...]
    wxr = wxr_ref[...]; whr = whr_ref[...]; br = br_ref[...]
    wxg = wxg_ref[...]; bgx = bgx_ref[...]
    whg = whg_ref[...]; bgh = bgh_ref[...]

    h = jnp.zeros((tb, H), dtype=f32)
    for t in range(T):
        x_t = hist_ref[t]                   # (tb, H) -- cell input is the history state
        a_t = att[:, t:t + 1]               # (tb, 1) -- attention scalar per row
        u = _sigmoid(jnp.dot(x_t, wxu, preferred_element_type=f32)
                     + jnp.dot(h, whu, preferred_element_type=f32) + bu)
        u = u * a_t
        r = _sigmoid(jnp.dot(x_t, wxr, preferred_element_type=f32)
                     + jnp.dot(h, whr, preferred_element_type=f32) + br)
        g = jnp.tanh(jnp.dot(x_t, wxg, preferred_element_type=f32) + bgx
                     + r * (jnp.dot(h, whg, preferred_element_type=f32) + bgh))
        h = (1.0 - u) * h + u * g

    # ---- Phase 3: ln2(concat([h, targets[:,0]])) as two matmuls -----------------
    tgt0 = tgt_ref[0]                       # (tb, I)
    out = (jnp.dot(h, w2h_ref[...], preferred_element_type=f32)
           + jnp.dot(tgt0, w2t_ref[...], preferred_element_type=f32)
           + b2_ref[...])
    out_ref[...] = out.astype(out_ref.dtype)


def _round_up(x, m):
    return ((x + m - 1) // m) * m


def dien_forward(targets, history, params, *, tb=None,
                 vmem_limit_bytes=64 * 1024 * 1024):
    """targets: (B, T, I) f32, history: (B, T, H) f32 -> (B, H) f32."""
    B, T, I = targets.shape
    Bh, Th, H = history.shape
    assert (Bh, Th) == (B, T), "targets/history batch & seq dims must match"

    # Fold biases of paired linears once, outside the kernel.
    bw = params["bw"].reshape(1, H)
    bu = (params["bxu"] + params["bhu"]).reshape(1, H)
    br = (params["bxr"] + params["bhr"]).reshape(1, H)
    bgx = params["bxg"].reshape(1, H)
    bgh = params["bhg"].reshape(1, H)
    b2 = params["b2"].reshape(1, H)
    w2h = params["w2"][:H]     # rows multiplying h
    w2t = params["w2"][H:]     # rows multiplying targets[:, 0]

    # Batch tile: multiple of 8 sublanes, sized so the double-buffered input
    # tiles stay within a ~8 MiB budget (safe on v5e/v6e/v7x scoped VMEM).
    if tb is None:
        budget = 8 * 1024 * 1024
        per_row = 2 * T * (I + H) * 4          # tgt + hist, double-buffered, f32
        cap = max(8, min(512, (budget // max(per_row, 1)) // 8 * 8))
        tb = min(cap, _round_up(B, 8))
    tb = max(8, _round_up(tb, 8))
    Bp = _round_up(B, tb)
    if Bp != B:
        pad = Bp - B
        targets = jnp.pad(targets, ((0, pad), (0, 0), (0, 0)))
        history = jnp.pad(history, ((0, pad), (0, 0), (0, 0)))

    # Time-major so each kernel step is a contiguous (tb, feat) tile.
    tgt_tm = jnp.transpose(targets, (1, 0, 2))    # (T, Bp, I)
    hist_tm = jnp.transpose(history, (1, 0, 2))   # (T, Bp, H)

    grid = (Bp // tb,)
    full = lambda i: (0, 0)

    weight_elems = sum(int(params[k].size) for k in
                       ("ww", "wxu", "whu", "wxr", "whr", "wxg", "whg", "w2"))
    cost = pl.CostEstimate(
        flops=int(2 * Bp * T * I * H + 12 * Bp * T * H * H + 2 * Bp * (H + I) * H),
        transcendentals=int(Bp * T * (3 * H + 1)),
        bytes_accessed=int(4 * (Bp * T * (I + H) + Bp * H + weight_elems)),
    )

    out = pl.pallas_call(
        _dien_kernel,
        out_shape=jax.ShapeDtypeStruct((Bp, H), jnp.float32),
        grid_spec=pltpu.PrefetchScalarGridSpec(
            num_scalar_prefetch=0,
            grid=grid,
            in_specs=[
                pl.BlockSpec((T, tb, I), lambda i: (0, i, 0)),   # targets (time-major)
                pl.BlockSpec((T, tb, H), lambda i: (0, i, 0)),   # history (time-major)
                pl.BlockSpec((I, H), full),                      # ww
                pl.BlockSpec((1, H), full),                      # bw
                pl.BlockSpec((H, H), full),                      # wxu
                pl.BlockSpec((H, H), full),                      # whu
                pl.BlockSpec((1, H), full),                      # bu
                pl.BlockSpec((H, H), full),                      # wxr
                pl.BlockSpec((H, H), full),                      # whr
                pl.BlockSpec((1, H), full),                      # br
                pl.BlockSpec((H, H), full),                      # wxg
                pl.BlockSpec((1, H), full),                      # bgx
                pl.BlockSpec((H, H), full),                      # whg
                pl.BlockSpec((1, H), full),                      # bgh
                pl.BlockSpec((H, H), full),                      # w2h
                pl.BlockSpec((I, H), full),                      # w2t
                pl.BlockSpec((1, H), full),                      # b2
            ],
            out_specs=pl.BlockSpec((tb, H), lambda i: (i, 0)),
        ),
        compiler_params=pltpu.CompilerParams(
            dimension_semantics=("parallel",),
            vmem_limit_bytes=vmem_limit_bytes,
        ),
        cost_estimate=cost,
    )(tgt_tm, hist_tm,
      params["ww"], bw,
      params["wxu"], params["whu"], bu,
      params["wxr"], params["whr"], br,
      params["wxg"], bgx, params["whg"], bgh,
      w2h, w2t, b2)

    return out[:B]


def _dien_reference(targets, history, params):
    """Pure-JAX reference matching the PyTorch module math."""
    B, T, I = targets.shape
    H = history.shape[-1]
    aw = jnp.einsum("bti,ih->bth", targets, params["ww"]) + params["bw"]
    logits = jnp.sum(aw * history, axis=-1, keepdims=True)          # (B, T, 1)
    att = jax.nn.softmax(logits, axis=1)                            # (B, T, 1)
    h = jnp.zeros((B, H), dtype=jnp.float32)
    for t in range(T):
        x = history[:, t]
        a = att[:, t]
        u = jax.nn.sigmoid(x @ params["wxu"] + params["bxu"]
                           + h @ params["whu"] + params["bhu"]) * a
        r = jax.nn.sigmoid(x @ params["wxr"] + params["bxr"]
                           + h @ params["whr"] + params["bhr"])
        g = jnp.tanh(x @ params["wxg"] + params["bxg"]
                     + r * (h @ params["whg"] + params["bhg"]))
        h = (1.0 - u) * h + u * g
    z = jnp.concatenate([h, targets[:, 0]], axis=-1)
    return z @ params["w2"] + params["b2"]


if __name__ == "__main__":
    # Small shapes consistent with the module: batch=2, seq=8, input=hidden=32
    batch, seq, input_size, hidden_size = 2, 8, 32, 32

    key = jax.random.PRNGKey(0)
    ks = jax.random.split(key, 18)

    def nrm(k, shape, scale=0.1):
        return scale * jax.random.normal(k, shape, dtype=jnp.float32)

    params = {
        "ww": nrm(ks[0], (input_size, hidden_size)),
        "bw": nrm(ks[1], (hidden_size,)),
        "wxu": nrm(ks[2], (hidden_size, hidden_size)),
        "bxu": nrm(ks[3], (hidden_size,)),
        "whu": nrm(ks[4], (hidden_size, hidden_size)),
        "bhu": nrm(ks[5], (hidden_size,)),
        "wxr": nrm(ks[6], (hidden_size, hidden_size)),
        "bxr": nrm(ks[7], (hidden_size,)),
        "whr": nrm(ks[8], (hidden_size, hidden_size)),
        "bhr": nrm(ks[9], (hidden_size,)),
        "wxg": nrm(ks[10], (hidden_size, hidden_size)),
        "bxg": nrm(ks[11], (hidden_size,)),
        "whg": nrm(ks[12], (hidden_size, hidden_size)),
        "bhg": nrm(ks[13], (hidden_size,)),
        "w2": nrm(ks[14], (hidden_size + input_size, hidden_size)),
        "b2": nrm(ks[15], (hidden_size,)),
    }
    targets = jax.random.normal(ks[16], (batch, seq, input_size), dtype=jnp.float32)
    history = jax.random.normal(ks[17], (batch, seq, hidden_size), dtype=jnp.float32)

    out = dien_forward(targets, history, params)
    out = jax.block_until_ready(out)

    ref = _dien_reference(targets, history, params)
    assert out.shape == (batch, hidden_size)
    assert jnp.allclose(out, ref, atol=2e-3, rtol=2e-3), \
        float(jnp.max(jnp.abs(out - ref)))

    print("KERNEL_OK")
</pallas_src>

<mosaic_0001>
module attributes {stable_mosaic.version = 11 : i64} {
  func.func @_dien_kernel(%arg0: i32, %arg1: memref<8x8x32xf32, #tpu.memory_space<vmem>>, %arg2: memref<8x8x32xf32, #tpu.memory_space<vmem>>, %arg3: memref<32x32xf32, #tpu.memory_space<vmem>>, %arg4: memref<1x32xf32, #tpu.memory_space<vmem>>, %arg5: memref<32x32xf32, #tpu.memory_space<vmem>>, %arg6: memref<32x32xf32, #tpu.memory_space<vmem>>, %arg7: memref<1x32xf32, #tpu.memory_space<vmem>>, %arg8: memref<32x32xf32, #tpu.memory_space<vmem>>, %arg9: memref<32x32xf32, #tpu.memory_space<vmem>>, %arg10: memref<1x32xf32, #tpu.memory_space<vmem>>, %arg11: memref<32x32xf32, #tpu.memory_space<vmem>>, %arg12: memref<1x32xf32, #tpu.memory_space<vmem>>, %arg13: memref<32x32xf32, #tpu.memory_space<vmem>>, %arg14: memref<1x32xf32, #tpu.memory_space<vmem>>, %arg15: memref<32x32xf32, #tpu.memory_space<vmem>>, %arg16: memref<32x32xf32, #tpu.memory_space<vmem>>, %arg17: memref<1x32xf32, #tpu.memory_space<vmem>>, %arg18: memref<8x32xf32, #tpu.memory_space<vmem>>) attributes {dimension_semantics = [#tpu.dimension_semantics<parallel>], iteration_bounds = array<i64: 1>, scalar_prefetch = 0 : i64, scratch_operands = 0 : i64, tpu.core_type = #tpu.core_type<tc>, window_params = [{transform_indices = @transform_0, window_bounds = array<i64: 8, 8, 32>}, {transform_indices = @transform_1, window_bounds = array<i64: 8, 8, 32>}, {pipeline_mode = #tpu.pipeline_mode<synchronous>, transform_indices = @transform_2, window_bounds = array<i64: 32, 32>}, {pipeline_mode = #tpu.pipeline_mode<synchronous>, transform_indices = @transform_3, window_bounds = array<i64: 1, 32>}, {pipeline_mode = #tpu.pipeline_mode<synchronous>, transform_indices = @transform_4, window_bounds = array<i64: 32, 32>}, {pipeline_mode = #tpu.pipeline_mode<synchronous>, transform_indices = @transform_5, window_bounds = array<i64: 32, 32>}, {pipeline_mode = #tpu.pipeline_mode<synchronous>, transform_indices = @transform_6, window_bounds = array<i64: 1, 32>}, {pipeline_mode = #tpu.pipeline_mode<synchronous>, transform_indices = @transform_7, window_bounds = array<i64: 32, 32>}, {pipeline_mode = #tpu.pipeline_mode<synchronous>, transform_indices = @transform_8, window_bounds = array<i64: 32, 32>}, {pipeline_mode = #tpu.pipeline_mode<synchronous>, transform_indices = @transform_9, window_bounds = array<i64: 1, 32>}, {pipeline_mode = #tpu.pipeline_mode<synchronous>, transform_indices = @transform_10, window_bounds = array<i64: 32, 32>}, {pipeline_mode = #tpu.pipeline_mode<synchronous>, transform_indices = @transform_11, window_bounds = array<i64: 1, 32>}, {pipeline_mode = #tpu.pipeline_mode<synchronous>, transform_indices = @transform_12, window_bounds = array<i64: 32, 32>}, {pipeline_mode = #tpu.pipeline_mode<synchronous>, transform_indices = @transform_13, window_bounds = array<i64: 1, 32>}, {pipeline_mode = #tpu.pipeline_mode<synchronous>, transform_indices = @transform_14, window_bounds = array<i64: 32, 32>}, {pipeline_mode = #tpu.pipeline_mode<synchronous>, transform_indices = @transform_15, window_bounds = array<i64: 32, 32>}, {pipeline_mode = #tpu.pipeline_mode<synchronous>, transform_indices = @transform_16, window_bounds = array<i64: 1, 32>}, {transform_indices = @transform_17, window_bounds = array<i64: 8, 32>}]} {
    %c0 = arith.constant 0 : index
    %c0_0 = arith.constant 0 : index
    %0 = vector.load %arg3[%c0, %c0_0] : memref<32x32xf32, #tpu.memory_space<vmem>>, vector<32x32xf32>
    %c0_1 = arith.constant 0 : index
    %c0_2 = arith.constant 0 : index
    %1 = vector.load %arg4[%c0_1, %c0_2] : memref<1x32xf32, #tpu.memory_space<vmem>>, vector<1x32xf32>
    %c0_3 = arith.constant 0 : index
    %c0_4 = arith.constant 0 : index
    %c0_5 = arith.constant 0 : index
    %2 = vector.load %arg1[%c0_3, %c0_4, %c0_5] : memref<8x8x32xf32, #tpu.memory_space<vmem>>, vector<1x8x32xf32>
    %3 = vector.shape_cast %2 : vector<1x8x32xf32> to vector<8x32xf32>
    %c0_6 = arith.constant 0 : index
    %c0_7 = arith.constant 0 : index
    %c0_8 = arith.constant 0 : index
    %4 = vector.load %arg2[%c0_6, %c0_7, %c0_8] : memref<8x8x32xf32, #tpu.memory_space<vmem>>, vector<1x8x32xf32>
    %5 = vector.shape_cast %4 : vector<1x8x32xf32> to vector<8x32xf32>
    %cst = arith.constant dense<0.000000e+00> : vector<8x32xf32>
    %6 = tpu.matmul %3, %0, %cst {dimension_numbers = #tpu.dot_dimension_numbers<[1], [0], [0], [1], [0, 0, 1, 1], [], []>} : vector<8x32xf32>, vector<32x32xf32>, vector<8x32xf32> -> vector<8x32xf32>
    %7 = vector.broadcast %1 : vector<1x32xf32> to vector<8x32xf32>
    %8 = arith.addf %6, %7 : vector<8x32xf32>
    %9 = arith.mulf %8, %5 : vector<8x32xf32>
    %cst_9 = arith.constant dense<0.000000e+00> : vector<8xf32>
    %10 = vector.multi_reduction <add>, %9, %cst_9 [1] : vector<8x32xf32> to vector<8xf32>
    %11 = vector.shape_cast %10 : vector<8xf32> to vector<8x1xf32>
    %c1 = arith.constant 1 : index
    %c0_10 = arith.constant 0 : index
    %c0_11 = arith.constant 0 : index
    %12 = vector.load %arg1[%c1, %c0_10, %c0_11] : memref<8x8x32xf32, #tpu.memory_space<vmem>>, vector<1x8x32xf32>
    %13 = vector.shape_cast %12 : vector<1x8x32xf32> to vector<8x32xf32>
    %c1_12 = arith.constant 1 : index
    %c0_13 = arith.constant 0 : index
    %c0_14 = arith.constant 0 : index
    %14 = vector.load %arg2[%c1_12, %c0_13, %c0_14] : memref<8x8x32xf32, #tpu.memory_space<vmem>>, vector<1x8x32xf32>
    %15 = vector.shape_cast %14 : vector<1x8x32xf32> to vector<8x32xf32>
    %cst_15 = arith.constant dense<0.000000e+00> : vector<8x32xf32>
    %16 = tpu.matmul %13, %0, %cst_15 {dimension_numbers = #tpu.dot_dimension_numbers<[1], [0], [0], [1], [0, 0, 1, 1], [], []>} : vector<8x32xf32>, vector<32x32xf32>, vector<8x32xf32> -> vector<8x32xf32>
    %17 = vector.broadcast %1 : vector<1x32xf32> to vector<8x32xf32>
    %18 = arith.addf %16, %17 : vector<8x32xf32>
    %19 = arith.mulf %18, %15 : vector<8x32xf32>
    %cst_16 = arith.constant dense<0.000000e+00> : vector<8xf32>
    %20 = vector.multi_reduction <add>, %19, %cst_16 [1] : vector<8x32xf32> to vector<8xf32>
    %21 = vector.shape_cast %20 : vector<8xf32> to vector<8x1xf32>
    %c2 = arith.constant 2 : index
    %c0_17 = arith.constant 0 : index
    %c0_18 = arith.constant 0 : index
    %22 = vector.load %arg1[%c2, %c0_17, %c0_18] : memref<8x8x32xf32, #tpu.memory_space<vmem>>, vector<1x8x32xf32>
    %23 = vector.shape_cast %22 : vector<1x8x32xf32> to vector<8x32xf32>
    %c2_19 = arith.constant 2 : index
    %c0_20 = arith.constant 0 : index
    %c0_21 = arith.constant 0 : index
    %24 = vector.load %arg2[%c2_19, %c0_20, %c0_21] : memref<8x8x32xf32, #tpu.memory_space<vmem>>, vector<1x8x32xf32>
    %25 = vector.shape_cast %24 : vector<1x8x32xf32> to vector<8x32xf32>
    %cst_22 = arith.constant dense<0.000000e+00> : vector<8x32xf32>
    %26 = tpu.matmul %23, %0, %cst_22 {dimension_numbers = #tpu.dot_dimension_numbers<[1], [0], [0], [1], [0, 0, 1, 1], [], []>} : vector<8x32xf32>, vector<32x32xf32>, vector<8x32xf32> -> vector<8x32xf32>
    %27 = vector.broadcast %1 : vector<1x32xf32> to vector<8x32xf32>
    %28 = arith.addf %26, %27 : vector<8x32xf32>
    %29 = arith.mulf %28, %25 : vector<8x32xf32>
    %cst_23 = arith.constant dense<0.000000e+00> : vector<8xf32>
    %30 = vector.multi_reduction <add>, %29, %cst_23 [1] : vector<8x32xf32> to vector<8xf32>
    %31 = vector.shape_cast %30 : vector<8xf32> to vector<8x1xf32>
    %c3 = arith.constant 3 : index
    %c0_24 = arith.constant 0 : index
    %c0_25 = arith.constant 0 : index
    %32 = vector.load %arg1[%c3, %c0_24, %c0_25] : memref<8x8x32xf32, #tpu.memory_space<vmem>>, vector<1x8x32xf32>
    %33 = vector.shape_cast %32 : vector<1x8x32xf32> to vector<8x32xf32>
    %c3_26 = arith.constant 3 : index
    %c0_27 = arith.constant 0 : index
    %c0_28 = arith.constant 0 : index
    %34 = vector.load %arg2[%c3_26, %c0_27, %c0_28] : memref<8x8x32xf32, #tpu.memory_space<vmem>>, vector<1x8x32xf32>
    %35 = vector.shape_cast %34 : vector<1x8x32xf32> to vector<8x32xf32>
    %cst_29 = arith.constant dense<0.000000e+00> : vector<8x32xf32>
    %36 = tpu.matmul %33, %0, %cst_29 {dimension_numbers = #tpu.dot_dimension_numbers<[1], [0], [0], [1], [0, 0, 1, 1], [], []>} : vector<8x32xf32>, vector<32x32xf32>, vector<8x32xf32> -> vector<8x32xf32>
    %37 = vector.broadcast %1 : vector<1x32xf32> to vector<8x32xf32>
    %38 = arith.addf %36, %37 : vector<8x32xf32>
    %39 = arith.mulf %38, %35 : vector<8x32xf32>
    %cst_30 = arith.constant dense<0.000000e+00> : vector<8xf32>
    %40 = vector.multi_reduction <add>, %39, %cst_30 [1] : vector<8x32xf32> to vector<8xf32>
    %41 = vector.shape_cast %40 : vector<8xf32> to vector<8x1xf32>
    %c4 = arith.constant 4 : index
    %c0_31 = arith.constant 0 : index
    %c0_32 = arith.constant 0 : index
    %42 = vector.load %arg1[%c4, %c0_31, %c0_32] : memref<8x8x32xf32, #tpu.memory_space<vmem>>, vector<1x8x32xf32>
    %43 = vector.shape_cast %42 : vector<1x8x32xf32> to vector<8x32xf32>
    %c4_33 = arith.constant 4 : index
    %c0_34 = arith.constant 0 : index
    %c0_35 = arith.constant 0 : index
    %44 = vector.load %arg2[%c4_33, %c0_34, %c0_35] : memref<8x8x32xf32, #tpu.memory_space<vmem>>, vector<1x8x32xf32>
    %45 = vector.shape_cast %44 : vector<1x8x32xf32> to vector<8x32xf32>
    %cst_36 = arith.constant dense<0.000000e+00> : vector<8x32xf32>
    %46 = tpu.matmul %43, %0, %cst_36 {dimension_numbers = #tpu.dot_dimension_numbers<[1], [0], [0], [1], [0, 0, 1, 1], [], []>} : vector<8x32xf32>, vector<32x32xf32>, vector<8x32xf32> -> vector<8x32xf32>
    %47 = vector.broadcast %1 : vector<1x32xf32> to vector<8x32xf32>
    %48 = arith.addf %46, %47 : vector<8x32xf32>
    %49 = arith.mulf %48, %45 : vector<8x32xf32>
    %cst_37 = arith.constant dense<0.000000e+00> : vector<8xf32>
    %50 = vector.multi_reduction <add>, %49, %cst_37 [1] : vector<8x32xf32> to vector<8xf32>
    %51 = vector.shape_cast %50 : vector<8xf32> to vector<8x1xf32>
    %c5 = arith.constant 5 : index
    %c0_38 = arith.constant 0 : index
    %c0_39 = arith.constant 0 : index
    %52 = vector.load %arg1[%c5, %c0_38, %c0_39] : memref<8x8x32xf32, #tpu.memory_space<vmem>>, vector<1x8x32xf32>
    %53 = vector.shape_cast %52 : vector<1x8x32xf32> to vector<8x32xf32>
    %c5_40 = arith.constant 5 : index
    %c0_41 = arith.constant 0 : index
    %c0_42 = arith.constant 0 : index
    %54 = vector.load %arg2[%c5_40, %c0_41, %c0_42] : memref<8x8x32xf32, #tpu.memory_space<vmem>>, vector<1x8x32xf32>
    %55 = vector.shape_cast %54 : vector<1x8x32xf32> to vector<8x32xf32>
    %cst_43 = arith.constant dense<0.000000e+00> : vector<8x32xf32>
    %56 = tpu.matmul %53, %0, %cst_43 {dimension_numbers = #tpu.dot_dimension_numbers<[1], [0], [0], [1], [0, 0, 1, 1], [], []>} : vector<8x32xf32>, vector<32x32xf32>, vector<8x32xf32> -> vector<8x32xf32>
    %57 = vector.broadcast %1 : vector<1x32xf32> to vector<8x32xf32>
    %58 = arith.addf %56, %57 : vector<8x32xf32>
    %59 = arith.mulf %58, %55 : vector<8x32xf32>
    %cst_44 = arith.constant dense<0.000000e+00> : vector<8xf32>
    %60 = vector.multi_reduction <add>, %59, %cst_44 [1] : vector<8x32xf32> to vector<8xf32>
    %61 = vector.shape_cast %60 : vector<8xf32> to vector<8x1xf32>
    %c6 = arith.constant 6 : index
    %c0_45 = arith.constant 0 : index
    %c0_46 = arith.constant 0 : index
    %62 = vector.load %arg1[%c6, %c0_45, %c0_46] : memref<8x8x32xf32, #tpu.memory_space<vmem>>, vector<1x8x32xf32>
    %63 = vector.shape_cast %62 : vector<1x8x32xf32> to vector<8x32xf32>
    %c6_47 = arith.constant 6 : index
    %c0_48 = arith.constant 0 : index
    %c0_49 = arith.constant 0 : index
    %64 = vector.load %arg2[%c6_47, %c0_48, %c0_49] : memref<8x8x32xf32, #tpu.memory_space<vmem>>, vector<1x8x32xf32>
    %65 = vector.shape_cast %64 : vector<1x8x32xf32> to vector<8x32xf32>
    %cst_50 = arith.constant dense<0.000000e+00> : vector<8x32xf32>
    %66 = tpu.matmul %63, %0, %cst_50 {dimension_numbers = #tpu.dot_dimension_numbers<[1], [0], [0], [1], [0, 0, 1, 1], [], []>} : vector<8x32xf32>, vector<32x32xf32>, vector<8x32xf32> -> vector<8x32xf32>
    %67 = vector.broadcast %1 : vector<1x32xf32> to vector<8x32xf32>
    %68 = arith.addf %66, %67 : vector<8x32xf32>
    %69 = arith.mulf %68, %65 : vector<8x32xf32>
    %cst_51 = arith.constant dense<0.000000e+00> : vector<8xf32>
    %70 = vector.multi_reduction <add>, %69, %cst_51 [1] : vector<8x32xf32> to vector<8xf32>
    %71 = vector.shape_cast %70 : vector<8xf32> to vector<8x1xf32>
    %c7 = arith.constant 7 : index
    %c0_52 = arith.constant 0 : index
    %c0_53 = arith.constant 0 : index
    %72 = vector.load %arg1[%c7, %c0_52, %c0_53] : memref<8x8x32xf32, #tpu.memory_space<vmem>>, vector<1x8x32xf32>
    %73 = vector.shape_cast %72 : vector<1x8x32xf32> to vector<8x32xf32>
    %c7_54 = arith.constant 7 : index
    %c0_55 = arith.constant 0 : index
    %c0_56 = arith.constant 0 : index
    %74 = vector.load %arg2[%c7_54, %c0_55, %c0_56] : memref<8x8x32xf32, #tpu.memory_space<vmem>>, vector<1x8x32xf32>
    %75 = vector.shape_cast %74 : vector<1x8x32xf32> to vector<8x32xf32>
    %cst_57 = arith.constant dense<0.000000e+00> : vector<8x32xf32>
    %76 = tpu.matmul %73, %0, %cst_57 {dimension_numbers = #tpu.dot_dimension_numbers<[1], [0], [0], [1], [0, 0, 1, 1], [], []>} : vector<8x32xf32>, vector<32x32xf32>, vector<8x32xf32> -> vector<8x32xf32>
    %77 = vector.broadcast %1 : vector<1x32xf32> to vector<8x32xf32>
    %78 = arith.addf %76, %77 : vector<8x32xf32>
    %79 = arith.mulf %78, %75 : vector<8x32xf32>
    %cst_58 = arith.constant dense<0.000000e+00> : vector<8xf32>
    %80 = vector.multi_reduction <add>, %79, %cst_58 [1] : vector<8x32xf32> to vector<8xf32>
    %81 = vector.shape_cast %80 : vector<8xf32> to vector<8x1xf32>
    %82 = tpu.concatenate %11, %21, %31, %41, %51, %61, %71, %81 in 1 : vector<8x1xf32>, vector<8x1xf32>, vector<8x1xf32>, vector<8x1xf32>, vector<8x1xf32>, vector<8x1xf32>, vector<8x1xf32>, vector<8x1xf32> -> vector<8x8xf32>
    %cst_59 = arith.constant dense<0xFF800000> : vector<8xf32>
    %83 = vector.multi_reduction <maximumf>, %82, %cst_59 [1] : vector<8x8xf32> to vector<8xf32>
    %84 = vector.shape_cast %83 : vector<8xf32> to vector<8x1xf32>
    %85 = vector.broadcast %84 : vector<8x1xf32> to vector<8x8xf32>
    %86 = arith.subf %82, %85 : vector<8x8xf32>
    %87 = math.exp %86 : vector<8x8xf32>
    %cst_60 = arith.constant dense<0.000000e+00> : vector<8xf32>
    %88 = vector.multi_reduction <add>, %87, %cst_60 [1] : vector<8x8xf32> to vector<8xf32>
    %89 = vector.shape_cast %88 : vector<8xf32> to vector<8x1xf32>
    %90 = vector.broadcast %89 : vector<8x1xf32> to vector<8x8xf32>
    %91 = arith.divf %87, %90 : vector<8x8xf32>
    %c0_61 = arith.constant 0 : index
    %c0_62 = arith.constant 0 : index
    %92 = vector.load %arg5[%c0_61, %c0_62] : memref<32x32xf32, #tpu.memory_space<vmem>>, vector<32x32xf32>
    %c0_63 = arith.constant 0 : index
    %c0_64 = arith.constant 0 : index
    %93 = vector.load %arg6[%c0_63, %c0_64] : memref<32x32xf32, #tpu.memory_space<vmem>>, vector<32x32xf32>
    %c0_65 = arith.constant 0 : index
    %c0_66 = arith.constant 0 : index
    %94 = vector.load %arg7[%c0_65, %c0_66] : memref<1x32xf32, #tpu.memory_space<vmem>>, vector<1x32xf32>
    %c0_67 = arith.constant 0 : index
    %c0_68 = arith.constant 0 : index
    %95 = vector.load %arg8[%c0_67, %c0_68] : memref<32x32xf32, #tpu.memory_space<vmem>>, vector<32x32xf32>
    %c0_69 = arith.constant 0 : index
    %c0_70 = arith.constant 0 : index
    %96 = vector.load %arg9[%c0_69, %c0_70] : memref<32x32xf32, #tpu.memory_space<vmem>>, vector<32x32xf32>
    %c0_71 = arith.constant 0 : index
    %c0_72 = arith.constant 0 : index
    %97 = vector.load %arg10[%c0_71, %c0_72] : memref<1x32xf32, #tpu.memory_space<vmem>>, vector<1x32xf32>
    %c0_73 = arith.constant 0 : index
    %c0_74 = arith.constant 0 : index
    %98 = vector.load %arg11[%c0_73, %c0_74] : memref<32x32xf32, #tpu.memory_space<vmem>>, vector<32x32xf32>
    %c0_75 = arith.constant 0 : index
    %c0_76 = arith.constant 0 : index
    %99 = vector.load %arg12[%c0_75, %c0_76] : memref<1x32xf32, #tpu.memory_space<vmem>>, vector<1x32xf32>
    %c0_77 = arith.constant 0 : index
    %c0_78 = arith.constant 0 : index
    %100 = vector.load %arg13[%c0_77, %c0_78] : memref<32x32xf32, #tpu.memory_space<vmem>>, vector<32x32xf32>
    %c0_79 = arith.constant 0 : index
    %c0_80 = arith.constant 0 : index
    %101 = vector.load %arg14[%c0_79, %c0_80] : memref<1x32xf32, #tpu.memory_space<vmem>>, vector<1x32xf32>
    %cst_81 = arith.constant 0.000000e+00 : f32
    %102 = vector.broadcast %cst_81 : f32 to vector<8x32xf32>
    %c0_82 = arith.constant 0 : index
    %c0_83 = arith.constant 0 : index
    %c0_84 = arith.constant 0 : index
    %103 = vector.load %arg2[%c0_82, %c0_83, %c0_84] : memref<8x8x32xf32, #tpu.memory_space<vmem>>, vector<1x8x32xf32>
    %104 = vector.shape_cast %103 : vector<1x8x32xf32> to vector<8x32xf32>
    %105 = vector.extract_strided_slice %91 {offsets = [0, 0], sizes = [8, 1], strides = [1, 1]} : vector<8x8xf32> to vector<8x1xf32>
    %cst_85 = arith.constant dense<0.000000e+00> : vector<8x32xf32>
    %106 = tpu.matmul %104, %92, %cst_85 {dimension_numbers = #tpu.dot_dimension_numbers<[1], [0], [0], [1], [0, 0, 1, 1], [], []>} : vector<8x32xf32>, vector<32x32xf32>, vector<8x32xf32> -> vector<8x32xf32>
    %cst_86 = arith.constant dense<0.000000e+00> : vector<8x32xf32>
    %107 = tpu.matmul %102, %93, %cst_86 {dimension_numbers = #tpu.dot_dimension_numbers<[1], [0], [0], [1], [0, 0, 1, 1], [], []>} : vector<8x32xf32>, vector<32x32xf32>, vector<8x32xf32> -> vector<8x32xf32>
    %108 = arith.addf %106, %107 : vector<8x32xf32>
    %109 = vector.broadcast %94 : vector<1x32xf32> to vector<8x32xf32>
    %110 = arith.addf %108, %109 : vector<8x32xf32>
    %cst_87 = arith.constant 0.000000e+00 : f32
    %111 = vector.broadcast %cst_87 : f32 to vector<8x32xf32>
    %112 = arith.subf %111, %110 : vector<8x32xf32>
    %113 = math.exp %112 : vector<8x32xf32>
    %cst_88 = arith.constant 1.000000e+00 : f32
    %114 = vector.broadcast %cst_88 : f32 to vector<8x32xf32>
    %115 = arith.addf %114, %113 : vector<8x32xf32>
    %cst_89 = arith.constant 1.000000e+00 : f32
    %116 = vector.broadcast %cst_89 : f32 to vector<8x32xf32>
    %117 = arith.divf %116, %115 : vector<8x32xf32>
    %118 = vector.broadcast %105 : vector<8x1xf32> to vector<8x32xf32>
    %119 = arith.mulf %117, %118 : vector<8x32xf32>
    %cst_90 = arith.constant dense<0.000000e+00> : vector<8x32xf32>
    %120 = tpu.matmul %104, %95, %cst_90 {dimension_numbers = #tpu.dot_dimension_numbers<[1], [0], [0], [1], [0, 0, 1, 1], [], []>} : vector<8x32xf32>, vector<32x32xf32>, vector<8x32xf32> -> vector<8x32xf32>
    %cst_91 = arith.constant dense<0.000000e+00> : vector<8x32xf32>
    %121 = tpu.matmul %102, %96, %cst_91 {dimension_numbers = #tpu.dot_dimension_numbers<[1], [0], [0], [1], [0, 0, 1, 1], [], []>} : vector<8x32xf32>, vector<32x32xf32>, vector<8x32xf32> -> vector<8x32xf32>
    %122 = arith.addf %120, %121 : vector<8x32xf32>
    %123 = vector.broadcast %97 : vector<1x32xf32> to vector<8x32xf32>
    %124 = arith.addf %122, %123 : vector<8x32xf32>
    %cst_92 = arith.constant 0.000000e+00 : f32
    %125 = vector.broadcast %cst_92 : f32 to vector<8x32xf32>
    %126 = arith.subf %125, %124 : vector<8x32xf32>
    %127 = math.exp %126 : vector<8x32xf32>
    %cst_93 = arith.constant 1.000000e+00 : f32
    %128 = vector.broadcast %cst_93 : f32 to vector<8x32xf32>
    %129 = arith.addf %128, %127 : vector<8x32xf32>
    %cst_94 = arith.constant 1.000000e+00 : f32
    %130 = vector.broadcast %cst_94 : f32 to vector<8x32xf32>
    %131 = arith.divf %130, %129 : vector<8x32xf32>
    %cst_95 = arith.constant dense<0.000000e+00> : vector<8x32xf32>
    %132 = tpu.matmul %104, %98, %cst_95 {dimension_numbers = #tpu.dot_dimension_numbers<[1], [0], [0], [1], [0, 0, 1, 1], [], []>} : vector<8x32xf32>, vector<32x32xf32>, vector<8x32xf32> -> vector<8x32xf32>
    %133 = vector.broadcast %99 : vector<1x32xf32> to vector<8x32xf32>
    %134 = arith.addf %132, %133 : vector<8x32xf32>
    %cst_96 = arith.constant dense<0.000000e+00> : vector<8x32xf32>
    %135 = tpu.matmul %102, %100, %cst_96 {dimension_numbers = #tpu.dot_dimension_numbers<[1], [0], [0], [1], [0, 0, 1, 1], [], []>} : vector<8x32xf32>, vector<32x32xf32>, vector<8x32xf32> -> vector<8x32xf32>
    %136 = vector.broadcast %101 : vector<1x32xf32> to vector<8x32xf32>
    %137 = arith.addf %135, %136 : vector<8x32xf32>
    %138 = arith.mulf %131, %137 : vector<8x32xf32>
    %139 = arith.addf %134, %138 : vector<8x32xf32>
    %140 = math.tanh %139 : vector<8x32xf32>
    %cst_97 = arith.constant 1.000000e+00 : f32
    %141 = vector.broadcast %cst_97 : f32 to vector<8x32xf32>
    %142 = arith.subf %141, %119 : vector<8x32xf32>
    %143 = arith.mulf %142, %102 : vector<8x32xf32>
    %144 = arith.mulf %119, %140 : vector<8x32xf32>
    %145 = arith.addf %143, %144 : vector<8x32xf32>
    %c1_98 = arith.constant 1 : index
    %c0_99 = arith.constant 0 : index
    %c0_100 = arith.constant 0 : index
    %146 = vector.load %arg2[%c1_98, %c0_99, %c0_100] : memref<8x8x32xf32, #tpu.memory_space<vmem>>, vector<1x8x32xf32>
    %147 = vector.shape_cast %146 : vector<1x8x32xf32> to vector<8x32xf32>
    %148 = vector.extract_strided_slice %91 {offsets = [0, 1], sizes = [8, 1], strides = [1, 1]} : vector<8x8xf32> to vector<8x1xf32>
    %cst_101 = arith.constant dense<0.000000e+00> : vector<8x32xf32>
    %149 = tpu.matmul %147, %92, %cst_101 {dimension_numbers = #tpu.dot_dimension_numbers<[1], [0], [0], [1], [0, 0, 1, 1], [], []>} : vector<8x32xf32>, vector<32x32xf32>, vector<8x32xf32> -> vector<8x32xf32>
    %cst_102 = arith.constant dense<0.000000e+00> : vector<8x32xf32>
    %150 = tpu.matmul %145, %93, %cst_102 {dimension_numbers = #tpu.dot_dimension_numbers<[1], [0], [0], [1], [0, 0, 1, 1], [], []>} : vector<8x32xf32>, vector<32x32xf32>, vector<8x32xf32> -> vector<8x32xf32>
    %151 = arith.addf %149, %150 : vector<8x32xf32>
    %152 = vector.broadcast %94 : vector<1x32xf32> to vector<8x32xf32>
    %153 = arith.addf %151, %152 : vector<8x32xf32>
    %cst_103 = arith.constant 0.000000e+00 : f32
    %154 = vector.broadcast %cst_103 : f32 to vector<8x32xf32>
    %155 = arith.subf %154, %153 : vector<8x32xf32>
    %156 = math.exp %155 : vector<8x32xf32>
    %cst_104 = arith.constant 1.000000e+00 : f32
    %157 = vector.broadcast %cst_104 : f32 to vector<8x32xf32>
    %158 = arith.addf %157, %156 : vector<8x32xf32>
    %cst_105 = arith.constant 1.000000e+00 : f32
    %159 = vector.broadcast %cst_105 : f32 to vector<8x32xf32>
    %160 = arith.divf %159, %158 : vector<8x32xf32>
    %161 = vector.broadcast %148 : vector<8x1xf32> to vector<8x32xf32>
    %162 = arith.mulf %160, %161 : vector<8x32xf32>
    %cst_106 = arith.constant dense<0.000000e+00> : vector<8x32xf32>
    %163 = tpu.matmul %147, %95, %cst_106 {dimension_numbers = #tpu.dot_dimension_numbers<[1], [0], [0], [1], [0, 0, 1, 1], [], []>} : vector<8x32xf32>, vector<32x32xf32>, vector<8x32xf32> -> vector<8x32xf32>
    %cst_107 = arith.constant dense<0.000000e+00> : vector<8x32xf32>
    %164 = tpu.matmul %145, %96, %cst_107 {dimension_numbers = #tpu.dot_dimension_numbers<[1], [0], [0], [1], [0, 0, 1, 1], [], []>} : vector<8x32xf32>, vector<32x32xf32>, vector<8x32xf32> -> vector<8x32xf32>
    %165 = arith.addf %163, %164 : vector<8x32xf32>
    %166 = vector.broadcast %97 : vector<1x32xf32> to vector<8x32xf32>
    %167 = arith.addf %165, %166 : vector<8x32xf32>
    %cst_108 = arith.constant 0.000000e+00 : f32
    %168 = vector.broadcast %cst_108 : f32 to vector<8x32xf32>
    %169 = arith.subf %168, %167 : vector<8x32xf32>
    %170 = math.exp %169 : vector<8x32xf32>
    %cst_109 = arith.constant 1.000000e+00 : f32
    %171 = vector.broadcast %cst_109 : f32 to vector<8x32xf32>
    %172 = arith.addf %171, %170 : vector<8x32xf32>
    %cst_110 = arith.constant 1.000000e+00 : f32
    %173 = vector.broadcast %cst_110 : f32 to vector<8x32xf32>
    %174 = arith.divf %173, %172 : vector<8x32xf32>
    %cst_111 = arith.constant dense<0.000000e+00> : vector<8x32xf32>
    %175 = tpu.matmul %147, %98, %cst_111 {dimension_numbers = #tpu.dot_dimension_numbers<[1], [0], [0], [1], [0, 0, 1, 1], [], []>} : vector<8x32xf32>, vector<32x32xf32>, vector<8x32xf32> -> vector<8x32xf32>
    %176 = vector.broadcast %99 : vector<1x32xf32> to vector<8x32xf32>
    %177 = arith.addf %175, %176 : vector<8x32xf32>
    %cst_112 = arith.constant dense<0.000000e+00> : vector<8x32xf32>
    %178 = tpu.matmul %145, %100, %cst_112 {dimension_numbers = #tpu.dot_dimension_numbers<[1], [0], [0], [1], [0, 0, 1, 1], [], []>} : vector<8x32xf32>, vector<32x32xf32>, vector<8x32xf32> -> vector<8x32xf32>
    %179 = vector.broadcast %101 : vector<1x32xf32> to vector<8x32xf32>
    %180 = arith.addf %178, %179 : vector<8x32xf32>
    %181 = arith.mulf %174, %180 : vector<8x32xf32>
    %182 = arith.addf %177, %181 : vector<8x32xf32>
    %183 = math.tanh %182 : vector<8x32xf32>
    %cst_113 = arith.constant 1.000000e+00 : f32
    %184 = vector.broadcast %cst_113 : f32 to vector<8x32xf32>
    %185 = arith.subf %184, %162 : vector<8x32xf32>
    %186 = arith.mulf %185, %145 : vector<8x32xf32>
    %187 = arith.mulf %162, %183 : vector<8x32xf32>
    %188 = arith.addf %186, %187 : vector<8x32xf32>
    %c2_114 = arith.constant 2 : index
    %c0_115 = arith.constant 0 : index
    %c0_116 = arith.constant 0 : index
    %189 = vector.load %arg2[%c2_114, %c0_115, %c0_116] : memref<8x8x32xf32, #tpu.memory_space<vmem>>, vector<1x8x32xf32>
    %190 = vector.shape_cast %189 : vector<1x8x32xf32> to vector<8x32xf32>
    %191 = vector.extract_strided_slice %91 {offsets = [0, 2], sizes = [8, 1], strides = [1, 1]} : vector<8x8xf32> to vector<8x1xf32>
    %cst_117 = arith.constant dense<0.000000e+00> : vector<8x32xf32>
    %192 = tpu.matmul %190, %92, %cst_117 {dimension_numbers = #tpu.dot_dimension_numbers<[1], [0], [0], [1], [0, 0, 1, 1], [], []>} : vector<8x32xf32>, vector<32x32xf32>, vector<8x32xf32> -> vector<8x32xf32>
    %cst_118 = arith.constant dense<0.000000e+00> : vector<8x32xf32>
    %193 = tpu.matmul %188, %93, %cst_118 {dimension_numbers = #tpu.dot_dimension_numbers<[1], [0], [0], [1], [0, 0, 1, 1], [], []>} : vector<8x32xf32>, vector<32x32xf32>, vector<8x32xf32> -> vector<8x32xf32>
    %194 = arith.addf %192, %193 : vector<8x32xf32>
    %195 = vector.broadcast %94 : vector<1x32xf32> to vector<8x32xf32>
    %196 = arith.addf %194, %195 : vector<8x32xf32>
    %cst_119 = arith.constant 0.000000e+00 : f32
    %197 = vector.broadcast %cst_119 : f32 to vector<8x32xf32>
    %198 = arith.subf %197, %196 : vector<8x32xf32>
    %199 = math.exp %198 : vector<8x32xf32>
    %cst_120 = arith.constant 1.000000e+00 : f32
    %200 = vector.broadcast %cst_120 : f32 to vector<8x32xf32>
    %201 = arith.addf %200, %199 : vector<8x32xf32>
    %cst_121 = arith.constant 1.000000e+00 : f32
    %202 = vector.broadcast %cst_121 : f32 to vector<8x32xf32>
    %203 = arith.divf %202, %201 : vector<8x32xf32>
    %204 = vector.broadcast %191 : vector<8x1xf32> to vector<8x32xf32>
    %205 = arith.mulf %203, %204 : vector<8x32xf32>
    %cst_122 = arith.constant dense<0.000000e+00> : vector<8x32xf32>
    %206 = tpu.matmul %190, %95, %cst_122 {dimension_numbers = #tpu.dot_dimension_numbers<[1], [0], [0], [1], [0, 0, 1, 1], [], []>} : vector<8x32xf32>, vector<32x32xf32>, vector<8x32xf32> -> vector<8x32xf32>
    %cst_123 = arith.constant dense<0.000000e+00> : vector<8x32xf32>
    %207 = tpu.matmul %188, %96, %cst_123 {dimension_numbers = #tpu.dot_dimension_numbers<[1], [0], [0], [1], [0, 0, 1, 1], [], []>} : vector<8x32xf32>, vector<32x32xf32>, vector<8x32xf32> -> vector<8x32xf32>
    %208 = arith.addf %206, %207 : vector<8x32xf32>
    %209 = vector.broadcast %97 : vector<1x32xf32> to vector<8x32xf32>
    %210 = arith.addf %208, %209 : vector<8x32xf32>
    %cst_124 = arith.constant 0.000000e+00 : f32
    %211 = vector.broadcast %cst_124 : f32 to vector<8x32xf32>
    %212 = arith.subf %211, %210 : vector<8x32xf32>
    %213 = math.exp %212 : vector<8x32xf32>
    %cst_125 = arith.constant 1.000000e+00 : f32
    %214 = vector.broadcast %cst_125 : f32 to vector<8x32xf32>
    %215 = arith.addf %214, %213 : vector<8x32xf32>
    %cst_126 = arith.constant 1.000000e+00 : f32
    %216 = vector.broadcast %cst_126 : f32 to vector<8x32xf32>
    %217 = arith.divf %216, %215 : vector<8x32xf32>
    %cst_127 = arith.constant dense<0.000000e+00> : vector<8x32xf32>
    %218 = tpu.matmul %190, %98, %cst_127 {dimension_numbers = #tpu.dot_dimension_numbers<[1], [0], [0], [1], [0, 0, 1, 1], [], []>} : vector<8x32xf32>, vector<32x32xf32>, vector<8x32xf32> -> vector<8x32xf32>
    %219 = vector.broadcast %99 : vector<1x32xf32> to vector<8x32xf32>
    %220 = arith.addf %218, %219 : vector<8x32xf32>
    %cst_128 = arith.constant dense<0.000000e+00> : vector<8x32xf32>
    %221 = tpu.matmul %188, %100, %cst_128 {dimension_numbers = #tpu.dot_dimension_numbers<[1], [0], [0], [1], [0, 0, 1, 1], [], []>} : vector<8x32xf32>, vector<32x32xf32>, vector<8x32xf32> -> vector<8x32xf32>
    %222 = vector.broadcast %101 : vector<1x32xf32> to vector<8x32xf32>
    %223 = arith.addf %221, %222 : vector<8x32xf32>
    %224 = arith.mulf %217, %223 : vector<8x32xf32>
    %225 = arith.addf %220, %224 : vector<8x32xf32>
    %226 = math.tanh %225 : vector<8x32xf32>
    %cst_129 = arith.constant 1.000000e+00 : f32
    %227 = vector.broadcast %cst_129 : f32 to vector<8x32xf32>
    %228 = arith.subf %227, %205 : vector<8x32xf32>
    %229 = arith.mulf %228, %188 : vector<8x32xf32>
    %230 = arith.mulf %205, %226 : vector<8x32xf32>
    %231 = arith.addf %229, %230 : vector<8x32xf32>
    %c3_130 = arith.constant 3 : index
    %c0_131 = arith.constant 0 : index
    %c0_132 = arith.constant 0 : index
    %232 = vector.load %arg2[%c3_130, %c0_131, %c0_132] : memref<8x8x32xf32, #tpu.memory_space<vmem>>, vector<1x8x32xf32>
    %233 = vector.shape_cast %232 : vector<1x8x32xf32> to vector<8x32xf32>
    %234 = vector.extract_strided_slice %91 {offsets = [0, 3], sizes = [8, 1], strides = [1, 1]} : vector<8x8xf32> to vector<8x1xf32>
    %cst_133 = arith.constant dense<0.000000e+00> : vector<8x32xf32>
    %235 = tpu.matmul %233, %92, %cst_133 {dimension_numbers = #tpu.dot_dimension_numbers<[1], [0], [0], [1], [0, 0, 1, 1], [], []>} : vector<8x32xf32>, vector<32x32xf32>, vector<8x32xf32> -> vector<8x32xf32>
    %cst_134 = arith.constant dense<0.000000e+00> : vector<8x32xf32>
    %236 = tpu.matmul %231, %93, %cst_134 {dimension_numbers = #tpu.dot_dimension_numbers<[1], [0], [0], [1], [0, 0, 1, 1], [], []>} : vector<8x32xf32>, vector<32x32xf32>, vector<8x32xf32> -> vector<8x32xf32>
    %237 = arith.addf %235, %236 : vector<8x32xf32>
    %238 = vector.broadcast %94 : vector<1x32xf32> to vector<8x32xf32>
    %239 = arith.addf %237, %238 : vector<8x32xf32>
    %cst_135 = arith.constant 0.000000e+00 : f32
    %240 = vector.broadcast %cst_135 : f32 to vector<8x32xf32>
    %241 = arith.subf %240, %239 : vector<8x32xf32>
    %242 = math.exp %241 : vector<8x32xf32>
    %cst_136 = arith.constant 1.000000e+00 : f32
    %243 = vector.broadcast %cst_136 : f32 to vector<8x32xf32>
    %244 = arith.addf %243, %242 : vector<8x32xf32>
    %cst_137 = arith.constant 1.000000e+00 : f32
    %245 = vector.broadcast %cst_137 : f32 to vector<8x32xf32>
    %246 = arith.divf %245, %244 : vector<8x32xf32>
    %247 = vector.broadcast %234 : vector<8x1xf32> to vector<8x32xf32>
    %248 = arith.mulf %246, %247 : vector<8x32xf32>
    %cst_138 = arith.constant dense<0.000000e+00> : vector<8x32xf32>
    %249 = tpu.matmul %233, %95, %cst_138 {dimension_numbers = #tpu.dot_dimension_numbers<[1], [0], [0], [1], [0, 0, 1, 1], [], []>} : vector<8x32xf32>, vector<32x32xf32>, vector<8x32xf32> -> vector<8x32xf32>
    %cst_139 = arith.constant dense<0.000000e+00> : vector<8x32xf32>
    %250 = tpu.matmul %231, %96, %cst_139 {dimension_numbers = #tpu.dot_dimension_numbers<[1], [0], [0], [1], [0, 0, 1, 1], [], []>} : vector<8x32xf32>, vector<32x32xf32>, vector<8x32xf32> -> vector<8x32xf32>
    %251 = arith.addf %249, %250 : vector<8x32xf32>
    %252 = vector.broadcast %97 : vector<1x32xf32> to vector<8x32xf32>
    %253 = arith.addf %251, %252 : vector<8x32xf32>
    %cst_140 = arith.constant 0.000000e+00 : f32
    %254 = vector.broadcast %cst_140 : f32 to vector<8x32xf32>
    %255 = arith.subf %254, %253 : vector<8x32xf32>
    %256 = math.exp %255 : vector<8x32xf32>
    %cst_141 = arith.constant 1.000000e+00 : f32
    %257 = vector.broadcast %cst_141 : f32 to vector<8x32xf32>
    %258 = arith.addf %257, %256 : vector<8x32xf32>
    %cst_142 = arith.constant 1.000000e+00 : f32
    %259 = vector.broadcast %cst_142 : f32 to vector<8x32xf32>
    %260 = arith.divf %259, %258 : vector<8x32xf32>
    %cst_143 = arith.constant dense<0.000000e+00> : vector<8x32xf32>
    %261 = tpu.matmul %233, %98, %cst_143 {dimension_numbers = #tpu.dot_dimension_numbers<[1], [0], [0], [1], [0, 0, 1, 1], [], []>} : vector<8x32xf32>, vector<32x32xf32>, vector<8x32xf32> -> vector<8x32xf32>
    %262 = vector.broadcast %99 : vector<1x32xf32> to vector<8x32xf32>
    %263 = arith.addf %261, %262 : vector<8x32xf32>
    %cst_144 = arith.constant dense<0.000000e+00> : vector<8x32xf32>
    %264 = tpu.matmul %231, %100, %cst_144 {dimension_numbers = #tpu.dot_dimension_numbers<[1], [0], [0], [1], [0, 0, 1, 1], [], []>} : vector<8x32xf32>, vector<32x32xf32>, vector<8x32xf32> -> vector<8x32xf32>
    %265 = vector.broadcast %101 : vector<1x32xf32> to vector<8x32xf32>
    %266 = arith.addf %264, %265 : vector<8x32xf32>
    %267 = arith.mulf %260, %266 : vector<8x32xf32>
    %268 = arith.addf %263, %267 : vector<8x32xf32>
    %269 = math.tanh %268 : vector<8x32xf32>
    %cst_145 = arith.constant 1.000000e+00 : f32
    %270 = vector.broadcast %cst_145 : f32 to vector<8x32xf32>
    %271 = arith.subf %270, %248 : vector<8x32xf32>
    %272 = arith.mulf %271, %231 : vector<8x32xf32>
    %273 = arith.mulf %248, %269 : vector<8x32xf32>
    %274 = arith.addf %272, %273 : vector<8x32xf32>
    %c4_146 = arith.constant 4 : index
    %c0_147 = arith.constant 0 : index
    %c0_148 = arith.constant 0 : index
    %275 = vector.load %arg2[%c4_146, %c0_147, %c0_148] : memref<8x8x32xf32, #tpu.memory_space<vmem>>, vector<1x8x32xf32>
    %276 = vector.shape_cast %275 : vector<1x8x32xf32> to vector<8x32xf32>
    %277 = vector.extract_strided_slice %91 {offsets = [0, 4], sizes = [8, 1], strides = [1, 1]} : vector<8x8xf32> to vector<8x1xf32>
    %cst_149 = arith.constant dense<0.000000e+00> : vector<8x32xf32>
    %278 = tpu.matmul %276, %92, %cst_149 {dimension_numbers = #tpu.dot_dimension_numbers<[1], [0], [0], [1], [0, 0, 1, 1], [], []>} : vector<8x32xf32>, vector<32x32xf32>, vector<8x32xf32> -> vector<8x32xf32>
    %cst_150 = arith.constant dense<0.000000e+00> : vector<8x32xf32>
    %279 = tpu.matmul %274, %93, %cst_150 {dimension_numbers = #tpu.dot_dimension_numbers<[1], [0], [0], [1], [0, 0, 1, 1], [], []>} : vector<8x32xf32>, vector<32x32xf32>, vector<8x32xf32> -> vector<8x32xf32>
    %280 = arith.addf %278, %279 : vector<8x32xf32>
    %281 = vector.broadcast %94 : vector<1x32xf32> to vector<8x32xf32>
    %282 = arith.addf %280, %281 : vector<8x32xf32>
    %cst_151 = arith.constant 0.000000e+00 : f32
    %283 = vector.broadcast %cst_151 : f32 to vector<8x32xf32>
    %284 = arith.subf %283, %282 : vector<8x32xf32>
    %285 = math.exp %284 : vector<8x32xf32>
    %cst_152 = arith.constant 1.000000e+00 : f32
    %286 = vector.broadcast %cst_152 : f32 to vector<8x32xf32>
    %287 = arith.addf %286, %285 : vector<8x32xf32>
    %cst_153 = arith.constant 1.000000e+00 : f32
    %288 = vector.broadcast %cst_153 : f32 to vector<8x32xf32>
    %289 = arith.divf %288, %287 : vector<8x32xf32>
    %290 = vector.broadcast %277 : vector<8x1xf32> to vector<8x32xf32>
    %291 = arith.mulf %289, %290 : vector<8x32xf32>
    %cst_154 = arith.constant dense<0.000000e+00> : vector<8x32xf32>
    %292 = tpu.matmul %276, %95, %cst_154 {dimension_numbers = #tpu.dot_dimension_numbers<[1], [0], [0], [1], [0, 0, 1, 1], [], []>} : vector<8x32xf32>, vector<32x32xf32>, vector<8x32xf32> -> vector<8x32xf32>
    %cst_155 = arith.constant dense<0.000000e+00> : vector<8x32xf32>
    %293 = tpu.matmul %274, %96, %cst_155 {dimension_numbers = #tpu.dot_dimension_numbers<[1], [0], [0], [1], [0, 0, 1, 1], [], []>} : vector<8x32xf32>, vector<32x32xf32>, vector<8x32xf32> -> vector<8x32xf32>
    %294 = arith.addf %292, %293 : vector<8x32xf32>
    %295 = vector.broadcast %97 : vector<1x32xf32> to vector<8x32xf32>
    %296 = arith.addf %294, %295 : vector<8x32xf32>
    %cst_156 = arith.constant 0.000000e+00 : f32
    %297 = vector.broadcast %cst_156 : f32 to vector<8x32xf32>
    %298 = arith.subf %297, %296 : vector<8x32xf32>
    %299 = math.exp %298 : vector<8x32xf32>
    %cst_157 = arith.constant 1.000000e+00 : f32
    %300 = vector.broadcast %cst_157 : f32 to vector<8x32xf32>
    %301 = arith.addf %300, %299 : vector<8x32xf32>
    %cst_158 = arith.constant 1.000000e+00 : f32
    %302 = vector.broadcast %cst_158 : f32 to vector<8x32xf32>
    %303 = arith.divf %302, %301 : vector<8x32xf32>
    %cst_159 = arith.constant dense<0.000000e+00> : vector<8x32xf32>
    %304 = tpu.matmul %276, %98, %cst_159 {dimension_numbers = #tpu.dot_dimension_numbers<[1], [0], [0], [1], [0, 0, 1, 1], [], []>} : vector<8x32xf32>, vector<32x32xf32>, vector<8x32xf32> -> vector<8x32xf32>
    %305 = vector.broadcast %99 : vector<1x32xf32> to vector<8x32xf32>
    %306 = arith.addf %304, %305 : vector<8x32xf32>
    %cst_160 = arith.constant dense<0.000000e+00> : vector<8x32xf32>
    %307 = tpu.matmul %274, %100, %cst_160 {dimension_numbers = #tpu.dot_dimension_numbers<[1], [0], [0], [1], [0, 0, 1, 1], [], []>} : vector<8x32xf32>, vector<32x32xf32>, vector<8x32xf32> -> vector<8x32xf32>
    %308 = vector.broadcast %101 : vector<1x32xf32> to vector<8x32xf32>
    %309 = arith.addf %307, %308 : vector<8x32xf32>
    %310 = arith.mulf %303, %309 : vector<8x32xf32>
    %311 = arith.addf %306, %310 : vector<8x32xf32>
    %312 = math.tanh %311 : vector<8x32xf32>
    %cst_161 = arith.constant 1.000000e+00 : f32
    %313 = vector.broadcast %cst_161 : f32 to vector<8x32xf32>
    %314 = arith.subf %313, %291 : vector<8x32xf32>
    %315 = arith.mulf %314, %274 : vector<8x32xf32>
    %316 = arith.mulf %291, %312 : vector<8x32xf32>
    %317 = arith.addf %315, %316 : vector<8x32xf32>
    %c5_162 = arith.constant 5 : index
    %c0_163 = arith.constant 0 : index
    %c0_164 = arith.constant 0 : index
    %318 = vector.load %arg2[%c5_162, %c0_163, %c0_164] : memref<8x8x32xf32, #tpu.memory_space<vmem>>, vector<1x8x32xf32>
    %319 = vector.shape_cast %318 : vector<1x8x32xf32> to vector<8x32xf32>
    %320 = vector.extract_strided_slice %91 {offsets = [0, 5], sizes = [8, 1], strides = [1, 1]} : vector<8x8xf32> to vector<8x1xf32>
    %cst_165 = arith.constant dense<0.000000e+00> : vector<8x32xf32>
    %321 = tpu.matmul %319, %92, %cst_165 {dimension_numbers = #tpu.dot_dimension_numbers<[1], [0], [0], [1], [0, 0, 1, 1], [], []>} : vector<8x32xf32>, vector<32x32xf32>, vector<8x32xf32> -> vector<8x32xf32>
    %cst_166 = arith.constant dense<0.000000e+00> : vector<8x32xf32>
    %322 = tpu.matmul %317, %93, %cst_166 {dimension_numbers = #tpu.dot_dimension_numbers<[1], [0], [0], [1], [0, 0, 1, 1], [], []>} : vector<8x32xf32>, vector<32x32xf32>, vector<8x32xf32> -> vector<8x32xf32>
    %323 = arith.addf %321, %322 : vector<8x32xf32>
    %324 = vector.broadcast %94 : vector<1x32xf32> to vector<8x32xf32>
    %325 = arith.addf %323, %324 : vector<8x32xf32>
    %cst_167 = arith.constant 0.000000e+00 : f32
    %326 = vector.broadcast %cst_167 : f32 to vector<8x32xf32>
    %327 = arith.subf %326, %325 : vector<8x32xf32>
    %328 = math.exp %327 : vector<8x32xf32>
    %cst_168 = arith.constant 1.000000e+00 : f32
    %329 = vector.broadcast %cst_168 : f32 to vector<8x32xf32>
    %330 = arith.addf %329, %328 : vector<8x32xf32>
    %cst_169 = arith.constant 1.000000e+00 : f32
    %331 = vector.broadcast %cst_169 : f32 to vector<8x32xf32>
    %332 = arith.divf %331, %330 : vector<8x32xf32>
    %333 = vector.broadcast %320 : vector<8x1xf32> to vector<8x32xf32>
    %334 = arith.mulf %332, %333 : vector<8x32xf32>
    %cst_170 = arith.constant dense<0.000000e+00> : vector<8x32xf32>
    %335 = tpu.matmul %319, %95, %cst_170 {dimension_numbers = #tpu.dot_dimension_numbers<[1], [0], [0], [1], [0, 0, 1, 1], [], []>} : vector<8x32xf32>, vector<32x32xf32>, vector<8x32xf32> -> vector<8x32xf32>
    %cst_171 = arith.constant dense<0.000000e+00> : vector<8x32xf32>
    %336 = tpu.matmul %317, %96, %cst_171 {dimension_numbers = #tpu.dot_dimension_numbers<[1], [0], [0], [1], [0, 0, 1, 1], [], []>} : vector<8x32xf32>, vector<32x32xf32>, vector<8x32xf32> -> vector<8x32xf32>
    %337 = arith.addf %335, %336 : vector<8x32xf32>
    %338 = vector.broadcast %97 : vector<1x32xf32> to vector<8x32xf32>
    %339 = arith.addf %337, %338 : vector<8x32xf32>
    %cst_172 = arith.constant 0.000000e+00 : f32
    %340 = vector.broadcast %cst_172 : f32 to vector<8x32xf32>
    %341 = arith.subf %340, %339 : vector<8x32xf32>
    %342 = math.exp %341 : vector<8x32xf32>
    %cst_173 = arith.constant 1.000000e+00 : f32
    %343 = vector.broadcast %cst_173 : f32 to vector<8x32xf32>
    %344 = arith.addf %343, %342 : vector<8x32xf32>
    %cst_174 = arith.constant 1.000000e+00 : f32
    %345 = vector.broadcast %cst_174 : f32 to vector<8x32xf32>
    %346 = arith.divf %345, %344 : vector<8x32xf32>
    %cst_175 = arith.constant dense<0.000000e+00> : vector<8x32xf32>
    %347 = tpu.matmul %319, %98, %cst_175 {dimension_numbers = #tpu.dot_dimension_numbers<[1], [0], [0], [1], [0, 0, 1, 1], [], []>} : vector<8x32xf32>, vector<32x32xf32>, vector<8x32xf32> -> vector<8x32xf32>
    %348 = vector.broadcast %99 : vector<1x32xf32> to vector<8x32xf32>
    %349 = arith.addf %347, %348 : vector<8x32xf32>
    %cst_176 = arith.constant dense<0.000000e+00> : vector<8x32xf32>
    %350 = tpu.matmul %317, %100, %cst_176 {dimension_numbers = #tpu.dot_dimension_numbers<[1], [0], [0], [1], [0, 0, 1, 1], [], []>} : vector<8x32xf32>, vector<32x32xf32>, vector<8x32xf32> -> vector<8x32xf32>
    %351 = vector.broadcast %101 : vector<1x32xf32> to vector<8x32xf32>
    %352 = arith.addf %350, %351 : vector<8x32xf32>
    %353 = arith.mulf %346, %352 : vector<8x32xf32>
    %354 = arith.addf %349, %353 : vector<8x32xf32>
    %355 = math.tanh %354 : vector<8x32xf32>
    %cst_177 = arith.constant 1.000000e+00 : f32
    %356 = vector.broadcast %cst_177 : f32 to vector<8x32xf32>
    %357 = arith.subf %356, %334 : vector<8x32xf32>
    %358 = arith.mulf %357, %317 : vector<8x32xf32>
    %359 = arith.mulf %334, %355 : vector<8x32xf32>
    %360 = arith.addf %358, %359 : vector<8x32xf32>
    %c6_178 = arith.constant 6 : index
    %c0_179 = arith.constant 0 : index
    %c0_180 = arith.constant 0 : index
    %361 = vector.load %arg2[%c6_178, %c0_179, %c0_180] : memref<8x8x32xf32, #tpu.memory_space<vmem>>, vector<1x8x32xf32>
    %362 = vector.shape_cast %361 : vector<1x8x32xf32> to vector<8x32xf32>
    %363 = vector.extract_strided_slice %91 {offsets = [0, 6], sizes = [8, 1], strides = [1, 1]} : vector<8x8xf32> to vector<8x1xf32>
    %cst_181 = arith.constant dense<0.000000e+00> : vector<8x32xf32>
    %364 = tpu.matmul %362, %92, %cst_181 {dimension_numbers = #tpu.dot_dimension_numbers<[1], [0], [0], [1], [0, 0, 1, 1], [], []>} : vector<8x32xf32>, vector<32x32xf32>, vector<8x32xf32> -> vector<8x32xf32>
    %cst_182 = arith.constant dense<0.000000e+00> : vector<8x32xf32>
    %365 = tpu.matmul %360, %93, %cst_182 {dimension_numbers = #tpu.dot_dimension_numbers<[1], [0], [0], [1], [0, 0, 1, 1], [], []>} : vector<8x32xf32>, vector<32x32xf32>, vector<8x32xf32> -> vector<8x32xf32>
    %366 = arith.addf %364, %365 : vector<8x32xf32>
    %367 = vector.broadcast %94 : vector<1x32xf32> to vector<8x32xf32>
    %368 = arith.addf %366, %367 : vector<8x32xf32>
    %cst_183 = arith.constant 0.000000e+00 : f32
    %369 = vector.broadcast %cst_183 : f32 to vector<8x32xf32>
    %370 = arith.subf %369, %368 : vector<8x32xf32>
    %371 = math.exp %370 : vector<8x32xf32>
    %cst_184 = arith.constant 1.000000e+00 : f32
    %372 = vector.broadcast %cst_184 : f32 to vector<8x32xf32>
    %373 = arith.addf %372, %371 : vector<8x32xf32>
    %cst_185 = arith.constant 1.000000e+00 : f32
    %374 = vector.broadcast %cst_185 : f32 to vector<8x32xf32>
    %375 = arith.divf %374, %373 : vector<8x32xf32>
    %376 = vector.broadcast %363 : vector<8x1xf32> to vector<8x32xf32>
    %377 = arith.mulf %375, %376 : vector<8x32xf32>
    %cst_186 = arith.constant dense<0.000000e+00> : vector<8x32xf32>
    %378 = tpu.matmul %362, %95, %cst_186 {dimension_numbers = #tpu.dot_dimension_numbers<[1], [0], [0], [1], [0, 0, 1, 1], [], []>} : vector<8x32xf32>, vector<32x32xf32>, vector<8x32xf32> -> vector<8x32xf32>
    %cst_187 = arith.constant dense<0.000000e+00> : vector<8x32xf32>
    %379 = tpu.matmul %360, %96, %cst_187 {dimension_numbers = #tpu.dot_dimension_numbers<[1], [0], [0], [1], [0, 0, 1, 1], [], []>} : vector<8x32xf32>, vector<32x32xf32>, vector<8x32xf32> -> vector<8x32xf32>
    %380 = arith.addf %378, %379 : vector<8x32xf32>
    %381 = vector.broadcast %97 : vector<1x32xf32> to vector<8x32xf32>
    %382 = arith.addf %380, %381 : vector<8x32xf32>
    %cst_188 = arith.constant 0.000000e+00 : f32
    %383 = vector.broadcast %cst_188 : f32 to vector<8x32xf32>
    %384 = arith.subf %383, %382 : vector<8x32xf32>
    %385 = math.exp %384 : vector<8x32xf32>
    %cst_189 = arith.constant 1.000000e+00 : f32
    %386 = vector.broadcast %cst_189 : f32 to vector<8x32xf32>
    %387 = arith.addf %386, %385 : vector<8x32xf32>
    %cst_190 = arith.constant 1.000000e+00 : f32
    %388 = vector.broadcast %cst_190 : f32 to vector<8x32xf32>
    %389 = arith.divf %388, %387 : vector<8x32xf32>
    %cst_191 = arith.constant dense<0.000000e+00> : vector<8x32xf32>
    %390 = tpu.matmul %362, %98, %cst_191 {dimension_numbers = #tpu.dot_dimension_numbers<[1], [0], [0], [1], [0, 0, 1, 1], [], []>} : vector<8x32xf32>, vector<32x32xf32>, vector<8x32xf32> -> vector<8x32xf32>
    %391 = vector.broadcast %99 : vector<1x32xf32> to vector<8x32xf32>
    %392 = arith.addf %390, %391 : vector<8x32xf32>
    %cst_192 = arith.constant dense<0.000000e+00> : vector<8x32xf32>
    %393 = tpu.matmul %360, %100, %cst_192 {dimension_numbers = #tpu.dot_dimension_numbers<[1], [0], [0], [1], [0, 0, 1, 1], [], []>} : vector<8x32xf32>, vector<32x32xf32>, vector<8x32xf32> -> vector<8x32xf32>
    %394 = vector.broadcast %101 : vector<1x32xf32> to vector<8x32xf32>
    %395 = arith.addf %393, %394 : vector<8x32xf32>
    %396 = arith.mulf %389, %395 : vector<8x32xf32>
    %397 = arith.addf %392, %396 : vector<8x32xf32>
    %398 = math.tanh %397 : vector<8x32xf32>
    %cst_193 = arith.constant 1.000000e+00 : f32
    %399 = vector.broadcast %cst_193 : f32 to vector<8x32xf32>
    %400 = arith.subf %399, %377 : vector<8x32xf32>
    %401 = arith.mulf %400, %360 : vector<8x32xf32>
    %402 = arith.mulf %377, %398 : vector<8x32xf32>
    %403 = arith.addf %401, %402 : vector<8x32xf32>
    %c7_194 = arith.constant 7 : index
    %c0_195 = arith.constant 0 : index
    %c0_196 = arith.constant 0 : index
    %404 = vector.load %arg2[%c7_194, %c0_195, %c0_196] : memref<8x8x32xf32, #tpu.memory_space<vmem>>, vector<1x8x32xf32>
    %405 = vector.shape_cast %404 : vector<1x8x32xf32> to vector<8x32xf32>
    %406 = vector.extract_strided_slice %91 {offsets = [0, 7], sizes = [8, 1], strides = [1, 1]} : vector<8x8xf32> to vector<8x1xf32>
    %cst_197 = arith.constant dense<0.000000e+00> : vector<8x32xf32>
    %407 = tpu.matmul %405, %92, %cst_197 {dimension_numbers = #tpu.dot_dimension_numbers<[1], [0], [0], [1], [0, 0, 1, 1], [], []>} : vector<8x32xf32>, vector<32x32xf32>, vector<8x32xf32> -> vector<8x32xf32>
    %cst_198 = arith.constant dense<0.000000e+00> : vector<8x32xf32>
    %408 = tpu.matmul %403, %93, %cst_198 {dimension_numbers = #tpu.dot_dimension_numbers<[1], [0], [0], [1], [0, 0, 1, 1], [], []>} : vector<8x32xf32>, vector<32x32xf32>, vector<8x32xf32> -> vector<8x32xf32>
    %409 = arith.addf %407, %408 : vector<8x32xf32>
    %410 = vector.broadcast %94 : vector<1x32xf32> to vector<8x32xf32>
    %411 = arith.addf %409, %410 : vector<8x32xf32>
    %cst_199 = arith.constant 0.000000e+00 : f32
    %412 = vector.broadcast %cst_199 : f32 to vector<8x32xf32>
    %413 = arith.subf %412, %411 : vector<8x32xf32>
    %414 = math.exp %413 : vector<8x32xf32>
    %cst_200 = arith.constant 1.000000e+00 : f32
    %415 = vector.broadcast %cst_200 : f32 to vector<8x32xf32>
    %416 = arith.addf %415, %414 : vector<8x32xf32>
    %cst_201 = arith.constant 1.000000e+00 : f32
    %417 = vector.broadcast %cst_201 : f32 to vector<8x32xf32>
    %418 = arith.divf %417, %416 : vector<8x32xf32>
    %419 = vector.broadcast %406 : vector<8x1xf32> to vector<8x32xf32>
    %420 = arith.mulf %418, %419 : vector<8x32xf32>
    %cst_202 = arith.constant dense<0.000000e+00> : vector<8x32xf32>
    %421 = tpu.matmul %405, %95, %cst_202 {dimension_numbers = #tpu.dot_dimension_numbers<[1], [0], [0], [1], [0, 0, 1, 1], [], []>} : vector<8x32xf32>, vector<32x32xf32>, vector<8x32xf32> -> vector<8x32xf32>
    %cst_203 = arith.constant dense<0.000000e+00> : vector<8x32xf32>
    %422 = tpu.matmul %403, %96, %cst_203 {dimension_numbers = #tpu.dot_dimension_numbers<[1], [0], [0], [1], [0, 0, 1, 1], [], []>} : vector<8x32xf32>, vector<32x32xf32>, vector<8x32xf32> -> vector<8x32xf32>
    %423 = arith.addf %421, %422 : vector<8x32xf32>
    %424 = vector.broadcast %97 : vector<1x32xf32> to vector<8x32xf32>
    %425 = arith.addf %423, %424 : vector<8x32xf32>
    %cst_204 = arith.constant 0.000000e+00 : f32
    %426 = vector.broadcast %cst_204 : f32 to vector<8x32xf32>
    %427 = arith.subf %426, %425 : vector<8x32xf32>
    %428 = math.exp %427 : vector<8x32xf32>
    %cst_205 = arith.constant 1.000000e+00 : f32
    %429 = vector.broadcast %cst_205 : f32 to vector<8x32xf32>
    %430 = arith.addf %429, %428 : vector<8x32xf32>
    %cst_206 = arith.constant 1.000000e+00 : f32
    %431 = vector.broadcast %cst_206 : f32 to vector<8x32xf32>
    %432 = arith.divf %431, %430 : vector<8x32xf32>
    %cst_207 = arith.constant dense<0.000000e+00> : vector<8x32xf32>
    %433 = tpu.matmul %405, %98, %cst_207 {dimension_numbers = #tpu.dot_dimension_numbers<[1], [0], [0], [1], [0, 0, 1, 1], [], []>} : vector<8x32xf32>, vector<32x32xf32>, vector<8x32xf32> -> vector<8x32xf32>
    %434 = vector.broadcast %99 : vector<1x32xf32> to vector<8x32xf32>
    %435 = arith.addf %433, %434 : vector<8x32xf32>
    %cst_208 = arith.constant dense<0.000000e+00> : vector<8x32xf32>
    %436 = tpu.matmul %403, %100, %cst_208 {dimension_numbers = #tpu.dot_dimension_numbers<[1], [0], [0], [1], [0, 0, 1, 1], [], []>} : vector<8x32xf32>, vector<32x32xf32>, vector<8x32xf32> -> vector<8x32xf32>
    %437 = vector.broadcast %101 : vector<1x32xf32> to vector<8x32xf32>
    %438 = arith.addf %436, %437 : vector<8x32xf32>
    %439 = arith.mulf %432, %438 : vector<8x32xf32>
    %440 = arith.addf %435, %439 : vector<8x32xf32>
    %441 = math.tanh %440 : vector<8x32xf32>
    %cst_209 = arith.constant 1.000000e+00 : f32
    %442 = vector.broadcast %cst_209 : f32 to vector<8x32xf32>
    %443 = arith.subf %442, %420 : vector<8x32xf32>
    %444 = arith.mulf %443, %403 : vector<8x32xf32>
    %445 = arith.mulf %420, %441 : vector<8x32xf32>
    %446 = arith.addf %444, %445 : vector<8x32xf32>
    %c0_210 = arith.constant 0 : index
    %c0_211 = arith.constant 0 : index
    %c0_212 = arith.constant 0 : index
    %447 = vector.load %arg1[%c0_210, %c0_211, %c0_212] : memref<8x8x32xf32, #tpu.memory_space<vmem>>, vector<1x8x32xf32>
    %448 = vector.shape_cast %447 : vector<1x8x32xf32> to vector<8x32xf32>
    %c0_213 = arith.constant 0 : index
    %c0_214 = arith.constant 0 : index
    %449 = vector.load %arg15[%c0_213, %c0_214] : memref<32x32xf32, #tpu.memory_space<vmem>>, vector<32x32xf32>
    %cst_215 = arith.constant dense<0.000000e+00> : vector<8x32xf32>
    %450 = tpu.matmul %446, %449, %cst_215 {dimension_numbers = #tpu.dot_dimension_numbers<[1], [0], [0], [1], [0, 0, 1, 1], [], []>} : vector<8x32xf32>, vector<32x32xf32>, vector<8x32xf32> -> vector<8x32xf32>
    %c0_216 = arith.constant 0 : index
    %c0_217 = arith.constant 0 : index
    %451 = vector.load %arg16[%c0_216, %c0_217] : memref<32x32xf32, #tpu.memory_space<vmem>>, vector<32x32xf32>
    %cst_218 = arith.constant dense<0.000000e+00> : vector<8x32xf32>
    %452 = tpu.matmul %448, %451, %cst_218 {dimension_numbers = #tpu.dot_dimension_numbers<[1], [0], [0], [1], [0, 0, 1, 1], [], []>} : vector<8x32xf32>, vector<32x32xf32>, vector<8x32xf32> -> vector<8x32xf32>
    %453 = arith.addf %450, %452 : vector<8x32xf32>
    %c0_219 = arith.constant 0 : index
    %c0_220 = arith.constant 0 : index
    %454 = vector.load %arg17[%c0_219, %c0_220] : memref<1x32xf32, #tpu.memory_space<vmem>>, vector<1x32xf32>
    %455 = vector.broadcast %454 : vector<1x32xf32> to vector<8x32xf32>
    %456 = arith.addf %453, %455 : vector<8x32xf32>
    %c0_221 = arith.constant 0 : index
    %c0_222 = arith.constant 0 : index
    %457 = vector.load %arg18[%c0_221, %c0_222] : memref<8x32xf32, #tpu.memory_space<vmem>>, vector<8x32xf32>
    tpu.vector_store %arg18[%c0_221, %c0_222], %456 {strides = array<i32>} : memref<8x32xf32, #tpu.memory_space<vmem>>, vector<8x32xf32>,
    return
  }
  func.func @transform_0(%arg0: i32) -> (i32, i32, i32) {
    %c0_i32 = arith.constant 0 : i32
    %c0_i32_0 = arith.constant 0 : i32
    %c0_i32_1 = arith.constant 0 : i32
    return %c0_i32, %arg0, %c0_i32_0 : i32, i32, i32
  }
  func.func @transform_1(%arg0: i32) -> (i32, i32, i32) {
    %c0_i32 = arith.constant 0 : i32
    %c0_i32_0 = arith.constant 0 : i32
    %c0_i32_1 = arith.constant 0 : i32
    return %c0_i32, %arg0, %c0_i32_0 : i32, i32, i32
  }
  func.func @transform_2(%arg0: i32) -> (i32, i32) {
    %c0_i32 = arith.constant 0 : i32
    %c0_i32_0 = arith.constant 0 : i32
    %c0_i32_1 = arith.constant 0 : i32
    return %c0_i32, %c0_i32_0 : i32, i32
  }
  func.func @transform_3(%arg0: i32) -> (i32, i32) {
    %c0_i32 = arith.constant 0 : i32
    %c0_i32_0 = arith.constant 0 : i32
    %c0_i32_1 = arith.constant 0 : i32
    return %c0_i32, %c0_i32_0 : i32, i32
  }
  func.func @transform_4(%arg0: i32) -> (i32, i32) {
    %c0_i32 = arith.constant 0 : i32
    %c0_i32_0 = arith.constant 0 : i32
    %c0_i32_1 = arith.constant 0 : i32
    return %c0_i32, %c0_i32_0 : i32, i32
  }
  func.func @transform_5(%arg0: i32) -> (i32, i32) {
    %c0_i32 = arith.constant 0 : i32
    %c0_i32_0 = arith.constant 0 : i32
    %c0_i32_1 = arith.constant 0 : i32
    return %c0_i32, %c0_i32_0 : i32, i32
  }
  func.func @transform_6(%arg0: i32) -> (i32, i32) {
    %c0_i32 = arith.constant 0 : i32
    %c0_i32_0 = arith.constant 0 : i32
    %c0_i32_1 = arith.constant 0 : i32
    return %c0_i32, %c0_i32_0 : i32, i32
  }
  func.func @transform_7(%arg0: i32) -> (i32, i32) {
    %c0_i32 = arith.constant 0 : i32
    %c0_i32_0 = arith.constant 0 : i32
    %c0_i32_1 = arith.constant 0 : i32
    return %c0_i32, %c0_i32_0 : i32, i32
  }
  func.func @transform_8(%arg0: i32) -> (i32, i32) {
    %c0_i32 = arith.constant 0 : i32
    %c0_i32_0 = arith.constant 0 : i32
    %c0_i32_1 = arith.constant 0 : i32
    return %c0_i32, %c0_i32_0 : i32, i32
  }
  func.func @transform_9(%arg0: i32) -> (i32, i32) {
    %c0_i32 = arith.constant 0 : i32
    %c0_i32_0 = arith.constant 0 : i32
    %c0_i32_1 = arith.constant 0 : i32
    return %c0_i32, %c0_i32_0 : i32, i32
  }
  func.func @transform_10(%arg0: i32) -> (i32, i32) {
    %c0_i32 = arith.constant 0 : i32
    %c0_i32_0 = arith.constant 0 : i32
    %c0_i32_1 = arith.constant 0 : i32
    return %c0_i32, %c0_i32_0 : i32, i32
  }
  func.func @transform_11(%arg0: i32) -> (i32, i32) {
    %c0_i32 = arith.constant 0 : i32
    %c0_i32_0 = arith.constant 0 : i32
    %c0_i32_1 = arith.constant 0 : i32
    return %c0_i32, %c0_i32_0 : i32, i32
  }
  func.func @transform_12(%arg0: i32) -> (i32, i32) {
    %c0_i32 = arith.constant 0 : i32
    %c0_i32_0 = arith.constant 0 : i32
    %c0_i32_1 = arith.constant 0 : i32
    return %c0_i32, %c0_i32_0 : i32, i32
  }
  func.func @transform_13(%arg0: i32) -> (i32, i32) {
    %c0_i32 = arith.constant 0 : i32
    %c0_i32_0 = arith.constant 0 : i32
    %c0_i32_1 = arith.constant 0 : i32
    return %c0_i32, %c0_i32_0 : i32, i32
  }
  func.func @transform_14(%arg0: i32) -> (i32, i32) {
    %c0_i32 = arith.constant 0 : i32
    %c0_i32_0 = arith.constant 0 : i32
    %c0_i32_1 = arith.constant 0 : i32
    return %c0_i32, %c0_i32_0 : i32, i32
  }
  func.func @transform_15(%arg0: i32) -> (i32, i32) {
    %c0_i32 = arith.constant 0 : i32
    %c0_i32_0 = arith.constant 0 : i32
    %c0_i32_1 = arith.constant 0 : i32
    return %c0_i32, %c0_i32_0 : i32, i32
  }
  func.func @transform_16(%arg0: i32) -> (i32, i32) {
    %c0_i32 = arith.constant 0 : i32
    %c0_i32_0 = arith.constant 0 : i32
    %c0_i32_1 = arith.constant 0 : i32
    return %c0_i32, %c0_i32_0 : i32, i32
  }
  func.func @transform_17(%arg0: i32) -> (i32, i32) {
    %c0_i32 = arith.constant 0 : i32
    %c0_i32_0 = arith.constant 0 : i32
    return %arg0, %c0_i32 : i32, i32
  }
}

</mosaic_0001>

<bundles_post_ra>
// kernel: tpu_custom_call.1
= control target key start
LH: loop header
LB: loop body
LE: loop exit
PB: predicated region body
PF: predicated region fallthrough
CT: control target
= control target key end

     0   :  { %s7270_s0 = inlined_call_operand.hbm [shape: f32[8,8,32], index: 0, kind: input, shape index: {}]   ;;  %s7271_s1 = inlined_call_operand.hbm [shape: f32[8,8,32], index: 1, kind: input, shape index: {}]   ;;  %s7272_s2 = inlined_call_operand.hbm [shape: f32[32,32], index: 2, kind: input, shape index: {}]   ;;  %s7273_s3 = inlined_call_operand.vmem [shape: f32[1,32], index: 3, kind: input, shape index: {}]   ;;  %s7274_s4 = inlined_call_operand.hbm [shape: f32[32,32], index: 4, kind: input, shape index: {}]   ;;  %s7275_s5 = inlined_call_operand.hbm [shape: f32[32,32], index: 5, kind: input, shape index: {}]   ;;  %s7276_s6 = inlined_call_operand.vmem [shape: f32[1,32], index: 6, kind: input, shape index: {}]   ;;  %s7277_s7 = inlined_call_operand.hbm [shape: f32[32,32], index: 7, kind: input, shape index: {}]   ;;  %s7278_s8 = inlined_call_operand.hbm [shape: f32[32,32], index: 8, kind: input, shape index: {}]   ;;  %s7279_s9 = inlined_call_operand.vmem [shape: f32[1,32], index: 9, kind: input, shape index: {}]   ;;  %s7280_s10 = inlined_call_operand.hbm [shape: f32[32,32], index: 10, kind: input, shape index: {}]   ;;  %s7281_s11 = inlined_call_operand.vmem [shape: f32[1,32], index: 11, kind: input, shape index: {}]   ;;  %s7282_s12 = inlined_call_operand.hbm [shape: f32[32,32], index: 12, kind: input, shape index: {}]   ;;  %s7283_s13 = inlined_call_operand.vmem [shape: f32[1,32], index: 13, kind: input, shape index: {}]   ;;  %s7284_s14 = inlined_call_operand.hbm [shape: f32[32,32], index: 14, kind: input, shape index: {}]   ;;  %s7285_s15 = inlined_call_operand.hbm [shape: f32[32,32], index: 15, kind: input, shape index: {}]   ;;  %s7286_s16 = inlined_call_operand.vmem [shape: f32[1,32], index: 16, kind: input, shape index: {}]   ;;  %s7287_s17 = inlined_call_operand.hbm [shape: f32[8,32], index: 17, kind: output, shape index: {}]  }
   0x1   :  { %7288 = sst [smem:[#allocation28_spill]] %s7270_s0 }
   0x2   :  { %7289 = sst [smem:[#allocation29_spill]] %s7271_s1 }
   0x3   :  { %22 = vsyncpa [#allocation3], 0 }
   0x4   :  { %23 = vsyncpa [#allocation6], 0 }
   0x5   :  { %24 = vsyncpa [#allocation9], 0 }
   0x6   :  { %25 = vsyncpa [#allocation12], 0 }
   0x7   :  { %26 = vsyncpa [#allocation15], 0 }
   0x8   :  { %27 = vsyncpa [#allocation18], 0 }
   0x9   :  { %28 = vsyncpa [#allocation4], 0  ;;  %s6132_s24 = smov [#allocation5]   ;;  %s6133_s26 = smov [#allocation8]  }
   0xa   :  { %s46_s25 = sshll.u32 %s6132_s24, 4  ;;  %s72_s27 = sshll.u32 %s6133_s26, 4  ;;  %s47_s25 = int_to_ptr.vmem [resolvable:$true] %s46_s25  ;;  %s73_s27 = int_to_ptr.vmem [resolvable:$true] %s72_s27 }
   0xb   :  { %s5886_s28 = scalar_lea.vmem %s47_s25, 1024  ;;  %p5891_p1 = scmp.lt.s32.totalorder %s47_s25, %s47_s25 }
   0xc   :  { %p5887_p0 = scmp.ne.s32.totalorder %s47_s25, %s5886_s28  ;;  %p5892_p2 = scmp.lt.s32.totalorder %s5886_s28, %s5886_s28 }
   0xe   :  { %p5893_p3 = por %p5892_p2, %p5891_p1 }
  0x10   :  { %p5894_p4 = pnand %p5893_p3, %p5887_p0 }
  0x12   :  { %5897 = shalt.err (!%p5894_p4)
}
  0x13   :  { %s6134_s29 = smov 128   ;;  %s6135_s0 = smov 8  }
  0x14   :  { %s7290_s19 = sld [smem:[#allocation29_spill]]  ;;  %s5906_s1 = scalar_lea.vmem %s73_s27, 512 }
  0x15   :  { %p5907_p5 = scmp.ne.s32.totalorder %s73_s27, %s5906_s1  ;;  %p5911_p6 = scmp.lt.s32.totalorder %s73_s27, %s73_s27 }
  0x16   :  { %p5912_p7 = scmp.lt.s32.totalorder %s5906_s1, %s5906_s1 }
  0x18   :  { %p5913_p8 = por %p5912_p7, %p5911_p6 }
  0x1a   :  { %52 = dma.hbm_to_vmem [thread:$0]  %s7290_s19, 1024, %s47_s25, [#allocation6], %s6134_s29, %s6134_s29, %s6135_s0  }
  0x1b   :  { %p5914_p9 = pnand %p5913_p8, %p5907_p5 }
  0x1d   :  { %5917 = shalt.err (!%p5914_p9)
}
  0x1e   :  { %78 = dma.hbm_to_vmem [thread:$0]  %s7274_s4, 512, %s73_s27, [#allocation9], %s6134_s29, %s6134_s29, %s6135_s0  }
  0x1f   :  { %s6136_s22 = smov [#allocation11]   ;;  %s6137_s24 = smov [#allocation14]  }
  0x20   :  { %s98_s23 = sshll.u32 %s6136_s22, 4  ;;  %s124_s26 = sshll.u32 %s6137_s24, 4  ;;  %s99_s23 = int_to_ptr.vmem [resolvable:$true] %s98_s23  ;;  %s125_s26 = int_to_ptr.vmem [resolvable:$true] %s124_s26 }
  0x21   :  { %s5926_s25 = scalar_lea.vmem %s99_s23, 512  ;;  %p5931_p11 = scmp.lt.s32.totalorder %s99_s23, %s99_s23 }
  0x22   :  { %p5927_p10 = scmp.ne.s32.totalorder %s99_s23, %s5926_s25  ;;  %p5932_p12 = scmp.lt.s32.totalorder %s5926_s25, %s5926_s25 }
  0x24   :  { %p5933_p13 = por %p5932_p12, %p5931_p11 }
  0x26   :  { %p5934_p0 = pnand %p5933_p13, %p5927_p10 }
  0x28   :  { %5937 = shalt.err (!%p5934_p0)
}
  0x29   :  { %104 = dma.hbm_to_vmem [thread:$0]  %s7277_s7, 512, %s99_s23, [#allocation12], %s6134_s29, %s6134_s29, %s6135_s0  }
  0x2a   :  { %s5946_s4 = scalar_lea.vmem %s125_s26, 512  ;;  %p5951_p2 = scmp.lt.s32.totalorder %s125_s26, %s125_s26 }
  0x2b   :  { %p5947_p1 = scmp.ne.s32.totalorder %s125_s26, %s5946_s4  ;;  %p5952_p3 = scmp.lt.s32.totalorder %s5946_s4, %s5946_s4 }
  0x2d   :  { %p5953_p4 = por %p5952_p3, %p5951_p2 }
  0x2f   :  { %p5954_p5 = pnand %p5953_p4, %p5947_p1 }
  0x31   :  { %5957 = shalt.err (!%p5954_p5)
}
  0x32   :  { %130 = dma.hbm_to_vmem [thread:$0]  %s7280_s10, 512, %s125_s26, [#allocation15], %s6134_s29, %s6134_s29, %s6135_s0  }
  0x33   :  { %s6138_s19 = smov [#allocation17]   ;;  %s6139_s20 = smov [#allocation2]  }
  0x34   :  { %s152_s1 = sshll.u32 %s6138_s19, 4  ;;  %s34_s21 = sshll.u32 %s6139_s20, 4  ;;  %s153_s1 = int_to_ptr.vmem [resolvable:$true] %s152_s1  ;;  %s35_s21 = int_to_ptr.vmem [resolvable:$true] %s34_s21 }
  0x35   :  { %s5966_s7 = scalar_lea.vmem %s153_s1, 512  ;;  %p5971_p7 = scmp.lt.s32.totalorder %s153_s1, %s153_s1 }
  0x36   :  { %p5967_p6 = scmp.ne.s32.totalorder %s153_s1, %s5966_s7  ;;  %p5972_p8 = scmp.lt.s32.totalorder %s5966_s7, %s5966_s7 }
  0x38   :  { %p5973_p9 = por %p5972_p8, %p5971_p7 }
  0x3a   :  { %p5974_p10 = pnand %p5973_p9, %p5967_p6 }
  0x3c   :  { %5977 = shalt.err (!%p5974_p10)
}
  0x3d   :  { %158 = dma.hbm_to_vmem [thread:$0]  %s7284_s14, 512, %s153_s1, [#allocation18], %s6134_s29, %s6134_s29, %s6135_s0  }
  0x3e   :  { %s5986_s10 = scalar_lea.vmem %s35_s21, 1024  ;;  %p5991_p12 = scmp.lt.s32.totalorder %s35_s21, %s35_s21 }
  0x3f   :  { %p5987_p11 = scmp.ne.s32.totalorder %s35_s21, %s5986_s10  ;;  %p5992_p13 = scmp.lt.s32.totalorder %s5986_s10, %s5986_s10 }
  0x41   :  { %p5993_p0 = por %p5992_p13, %p5991_p12 }
  0x43   :  { %p5994_p1 = pnand %p5993_p0, %p5987_p11 }
  0x45   :  { %5997 = shalt.err (!%p5994_p1)
}
  0x46   :  { %s7291_s25 = sld [smem:[#allocation28_spill]]  ;;  %s6140_s28 = smov [#allocation7]  }
  0x47   :  { %s58_s30 = sshll.u32 %s6140_s28, 4  ;;  %s6141_s4 = smov [#allocation10]   ;;  %s59_s30 = int_to_ptr.vmem [resolvable:$true] %s58_s30 }
  0x48   :  { %s84_s27 = sshll.u32 %s6141_s4, 4  ;;  %s6006_s14 = scalar_lea.vmem %s59_s30, 512  ;;  %s85_s27 = int_to_ptr.vmem [resolvable:$true] %s84_s27 }
  0x49   :  { %p6007_p2 = scmp.ne.s32.totalorder %s59_s30, %s6006_s14  ;;  %p6011_p3 = scmp.lt.s32.totalorder %s59_s30, %s59_s30 }
  0x4a   :  { %p6012_p4 = scmp.lt.s32.totalorder %s6006_s14, %s6006_s14 }
  0x4c   :  { %40 = dma.hbm_to_vmem [thread:$0]  %s7291_s25, 1024, %s35_s21, [#allocation3], %s6134_s29, %s6134_s29, %s6135_s0  }
  0x4d   :  { %p6013_p5 = por %p6012_p4, %p6011_p3 }
  0x4f   :  { %p6014_p6 = pnand %p6013_p5, %p6007_p2 }
  0x51   :  { %6017 = shalt.err (!%p6014_p6)
}
  0x52   :  { %64 = dma.hbm_to_vmem [thread:$0]  %s7272_s2, 512, %s59_s30, [#allocation6], %s6134_s29, %s6134_s29, %s6135_s0  }
  0x53   :  { %s6026_s1 = scalar_lea.vmem %s85_s27, 512  ;;  %p6031_p8 = scmp.lt.s32.totalorder %s85_s27, %s85_s27 }
  0x54   :  { %p6027_p7 = scmp.ne.s32.totalorder %s85_s27, %s6026_s1  ;;  %p6032_p9 = scmp.lt.s32.totalorder %s6026_s1, %s6026_s1 }
  0x56   :  { %p6033_p10 = por %p6032_p9, %p6031_p8 }
  0x58   :  { %p6034_p11 = pnand %p6033_p10, %p6027_p7 }
  0x5a   :  { %6037 = shalt.err (!%p6034_p11)
}
  0x5b   :  { %90 = dma.hbm_to_vmem [thread:$0]  %s7275_s5, 512, %s85_s27, [#allocation9], %s6134_s29, %s6134_s29, %s6135_s0  }
  0x5c   :  { %s6142_s7 = smov [#allocation13]   ;;  %s6143_s23 = smov [#allocation16]  }
  0x5d   :  { %s110_s22 = sshll.u32 %s6142_s7, 4  ;;  %s138_s10 = sshll.u32 %s6143_s23, 4  ;;  %s111_s22 = int_to_ptr.vmem [resolvable:$true] %s110_s22  ;;  %s139_s10 = int_to_ptr.vmem [resolvable:$true] %s138_s10 }
  0x5e   :  { %s6046_s2 = scalar_lea.vmem %s111_s22, 512  ;;  %p6051_p13 = scmp.lt.s32.totalorder %s111_s22, %s111_s22 }
  0x5f   :  { %p6047_p12 = scmp.ne.s32.totalorder %s111_s22, %s6046_s2  ;;  %p6052_p0 = scmp.lt.s32.totalorder %s6046_s2, %s6046_s2 }
  0x61   :  { %p6053_p1 = por %p6052_p0, %p6051_p13 }
  0x63   :  { %p6054_p2 = pnand %p6053_p1, %p6047_p12 }
  0x65   :  { %6057 = shalt.err (!%p6054_p2)
}
  0x66   :  { %116 = dma.hbm_to_vmem [thread:$0]  %s7278_s8, 512, %s111_s22, [#allocation12], %s6134_s29, %s6134_s29, %s6135_s0  }
  0x67   :  { %s6066_s5 = scalar_lea.vmem %s139_s10, 512  ;;  %p6071_p4 = scmp.lt.s32.totalorder %s139_s10, %s139_s10 }
  0x68   :  { %p6067_p3 = scmp.ne.s32.totalorder %s139_s10, %s6066_s5  ;;  %p6072_p5 = scmp.lt.s32.totalorder %s6066_s5, %s6066_s5 }
  0x6a   :  { %p6073_p6 = por %p6072_p5, %p6071_p4 }
  0x6c   :  { %p6074_p7 = pnand %p6073_p6, %p6067_p3 }
  0x6e   :  { %6077 = shalt.err (!%p6074_p7)
}
  0x6f   :  { %144 = dma.hbm_to_vmem [thread:$0]  %s7282_s12, 512, %s139_s10, [#allocation15], %s6134_s29, %s6134_s29, %s6135_s0  }
  0x70   :  { %s6144_s30 = smov [#allocation19]  }
  0x71   :  { %s164_s4 = sshll.u32 %s6144_s30, 4  ;;  %s165_s4 = int_to_ptr.vmem [resolvable:$true] %s164_s4 }
  0x72   :  { %s6086_s27 = scalar_lea.vmem %s165_s4, 512  ;;  %p6091_p9 = scmp.lt.s32.totalorder %s165_s4, %s165_s4 }
  0x73   :  { %p6087_p8 = scmp.ne.s32.totalorder %s165_s4, %s6086_s27  ;;  %p6092_p10 = scmp.lt.s32.totalorder %s6086_s27, %s6086_s27 }
  0x75   :  { %p6093_p11 = por %p6092_p10, %p6091_p9 }
  0x77   :  { %p6094_p12 = pnand %p6093_p11, %p6087_p8 }
  0x79   :  { %6097 = shalt.err (!%p6094_p12)
}
  0x7a   :  { %170 = dma.hbm_to_vmem [thread:$0]  %s7285_s15, 512, %s165_s4, [#allocation18], %s6134_s29, %s6134_s29, %s6135_s0  }
  0x7b   :  { %6118 = dma.done.wait [#allocation3], 1024  }
  0x7c   :  { %6119 = vsyncadd [#allocation3], 4294966272 }
  0x7d   :  { %6120 = dma.done.wait [#allocation6], 1536  }
  0x7e   :  { %6121 = vsyncadd [#allocation6], 4294965760 }
  0x7f   :  { %6122 = dma.done.wait [#allocation9], 1024  }
  0x80   :  { %6123 = vsyncadd [#allocation9], 4294966272 }
  0x81   :  { %6124 = dma.done.wait [#allocation12], 1024  }
  0x82   :  { %6125 = vsyncadd [#allocation12], 4294966272 }
  0x83   :  { %6126 = dma.done.wait [#allocation15], 1024  }
  0x84   :  { %6127 = vsyncadd [#allocation15], 4294966272 }
  0x85   :  { %6128 = dma.done.wait [#allocation18], 1024  }
  0x86   :  { %6129 = vsyncadd [#allocation18], 4294966272  ;;  %v6145_v0 = vmov 0.0   ;;  %vm6146_vm0 = vmmov 0   ;;  %v6318_v1 = vld [vmem:[#allocation7 + $0x18] sm:$0xff]  ;;  %v6320_v2 = vld [vmem:[#allocation7 + $0x10] sm:$0xff] }
  0x87   :  { %5090 = vmatprep.subr.mxu0 %v6145_v0  ;;  %5101 = vmatprep.subr.mxu1 %v6145_v0  ;;  %v6326_v3 = vld [vmem:[#allocation7 + $0x8] sm:$0xff]  ;;  %v6332_v4 = vld [vmem:[#allocation7] sm:$0xff]  ;;  %vm219_vm1 = vcmask 261120   ;;  %v379_v7 = vld [vmem:[#allocation2 + $0x10] sm:$0xff]  ;;  %vm864_vm2 = vcmask 7168   ;;  %vm866_vm3 = vcmask 15360  }
  0x88   :  { %5098 = vmatprep.mubr.msk.f32.mxu0 %vm6146_vm0, %v6145_v0  ;;  %5109 = vmatprep.mubr.msk.f32.mxu1 %vm6146_vm0, %v6145_v0  ;;  %v211_v5 = vld [vmem:[#allocation2] sm:$0xff]  ;;  %v298_v6 = vld [vmem:[#allocation2 + $0x8] sm:$0xff]  ;;  %v460_v8 = vld [vmem:[#allocation2 + $0x18] sm:$0xff]  ;;  %vm868_vm4 = vcmask 23552   ;;  %vm870_vm5 = vcmask 31744   ;;  %vm872_vm6 = vcmask 39936  }
  0x89   :  { %5091 = vmatpush3.msra.mxu0 %v6318_v1  ;;  %5102 = vmatpush3.msra.mxu1 %v6318_v1  ;;  %v541_v9 = vld [vmem:[#allocation2 + $0x20] sm:$0xff]  ;;  %v622_v10 = vld [vmem:[#allocation2 + $0x28] sm:$0xff]  ;;  %v703_v11 = vld [vmem:[#allocation2 + $0x30] sm:$0xff]  ;;  %vm874_vm7 = vcmask 48128   ;;  %vm876_vm8 = vcmask 56320   ;;  %vm878_vm9 = vcmask 64512  }
  0x8a   :  { %5092 = vmatprep.subr.mxu0 %v6145_v0  ;;  %5103 = vmatprep.subr.mxu1 %v6145_v0  ;;  %v784_v12 = vld [vmem:[#allocation2 + $0x38] sm:$0xff]  ;;  %v4739_v13 = vld [vmem:[%s7273_s3] ss:$0 sm:$0xff]  ;;  %v6419_v21 = vld [vmem:[#allocation5 + $0x8] sm:$0xff]  ;;  %s6155_s26 = smov [#allocation20]  }
  0x8b   :  { %5093 = vmatpush3.msra.mxu0 %v6320_v2  ;;  %5104 = vmatpush3.msra.mxu1 %v6320_v2  ;;  %v6417_v16 = vld [vmem:[#allocation5] sm:$0xff]  ;;  %v6425_v28 = vld [vmem:[#allocation5 + $0x10] sm:$0xff]  ;;  %v6427_v33 = vld [vmem:[#allocation5 + $0x18] sm:$0xff]  ;;  %s4725_s5 = sshll.u32 %s6155_s26, 4  ;;  %s4726_s5 = int_to_ptr.vmem [resolvable:$true] %s4725_s5 }
  0x8c   :  { %5094 = vmatprep.subr.mxu0 %v6145_v0  ;;  %5105 = vmatprep.subr.mxu1 %v6145_v0  ;;  %v6433_v40 = vld [vmem:[#allocation5 + $0x20] sm:$0xff]  ;;  %v624_v41 = vld [vmem:[#allocation5 + $0x28] sm:$0xff]  ;;  %v705_v52 = vld [vmem:[#allocation5 + $0x30] sm:$0xff]  ;;  %s6098_s25 = scalar_lea.vmem %s4726_s5, 128  ;;  %p6103_p0 = scmp.lt.s32.totalorder %s4726_s5, %s4726_s5 }
  0x8d   :  { %5095 = vmatpush3.msra.mxu0 %v6326_v3  ;;  %5106 = vmatpush3.msra.mxu1 %v6326_v3  ;;  %v786_v53 = vld [vmem:[#allocation5 + $0x38] sm:$0xff]  ;;  %p6099_p13 = scmp.ne.s32.totalorder %s4726_s5, %s6098_s25  ;;  %p6104_p1 = scmp.lt.s32.totalorder %s6098_s25, %s6098_s25 }
  0x8e   :  { %5096 = vmatprep.subr.mxu0 %v6145_v0  ;;  %5107 = vmatprep.subr.mxu1 %v6145_v0 }
  0x8f   :  { %5097 = vmatpush3.msra.mxu0 %v6332_v4  ;;  %5108 = vmatpush3.msra.mxu1 %v6332_v4  ;;  %p6105_p2 = por %p6104_p1, %p6103_p0 }
  0x90   :  { %5099 = vmatmul.mubr.msk.f32.vlgmr.msra.gmra.mxu0 %vm219_vm1, %v211_v5  ;;  %5110 = vmatmul.mubr.msk.f32.vlgmr.msra.gmra.mxu1 %vm219_vm1, %v298_v6 }
  0x91   :  { %5112 = vmatprep.subr.mxu0 %v6145_v0  ;;  %5123 = vmatprep.subr.mxu1 %v6145_v0  ;;  %p6106_p3 = pnand %p6105_p2, %p6099_p13 }
  0x92   :  { %5113 = vmatpush3.msra.mxu0 %v6318_v1  ;;  %5124 = vmatpush3.msra.mxu1 %v6318_v1 }
  0x93   :  { %5114 = vmatprep.subr.mxu0 %v6145_v0  ;;  %5125 = vmatprep.subr.mxu1 %v6145_v0 }
  0x94   :  { %5115 = vmatpush3.msra.mxu0 %v6320_v2  ;;  %5126 = vmatpush3.msra.mxu1 %v6320_v2 }
  0x95   :  { %5116 = vmatprep.subr.mxu0 %v6145_v0  ;;  %5127 = vmatprep.subr.mxu1 %v6145_v0 }
  0x96   :  { %5117 = vmatpush3.msra.mxu0 %v6326_v3  ;;  %5128 = vmatpush3.msra.mxu1 %v6326_v3 }
  0x97   :  { %5118 = vmatprep.subr.mxu0 %v6145_v0  ;;  %5129 = vmatprep.subr.mxu1 %v6145_v0 }
  0x98   :  { %5119 = vmatpush3.msra.mxu0 %v6332_v4  ;;  %5120 = vmatprep.mubr.msk.f32.mxu0 %vm6146_vm0, %v6145_v0 }
  0x99   :  { %5130 = vmatpush3.msra.mxu1 %v6332_v4  ;;  %5131 = vmatprep.mubr.msk.f32.mxu1 %vm6146_vm0, %v6145_v0 }
  0x9a   :  { %5121 = vmatmul.mubr.msk.f32.vlgmr.msra.gmra.mxu0 %vm219_vm1, %v379_v7  ;;  %5132 = vmatmul.mubr.msk.f32.vlgmr.msra.gmra.mxu1 %vm219_vm1, %v460_v8 }
  0x9b   :  { %5134 = vmatprep.subr.mxu0 %v6145_v0  ;;  %5145 = vmatprep.subr.mxu1 %v6145_v0 }
  0x9c   :  { %5135 = vmatpush3.msra.mxu0 %v6318_v1  ;;  %5146 = vmatpush3.msra.mxu1 %v6318_v1 }
  0x9d   :  { %5136 = vmatprep.subr.mxu0 %v6145_v0  ;;  %5147 = vmatprep.subr.mxu1 %v6145_v0 }
  0x9e   :  { %5137 = vmatpush3.msra.mxu0 %v6320_v2  ;;  %5148 = vmatpush3.msra.mxu1 %v6320_v2 }
  0x9f   :  { %5138 = vmatprep.subr.mxu0 %v6145_v0  ;;  %5149 = vmatprep.subr.mxu1 %v6145_v0 }
  0xa0   :  { %5139 = vmatpush3.msra.mxu0 %v6326_v3  ;;  %5150 = vmatpush3.msra.mxu1 %v6326_v3 }
  0xa1   :  { %5140 = vmatprep.subr.mxu0 %v6145_v0  ;;  %5151 = vmatprep.subr.mxu1 %v6145_v0 }
  0xa2   :  { %5141 = vmatpush3.msra.mxu0 %v6332_v4  ;;  %5142 = vmatprep.mubr.msk.f32.mxu0 %vm6146_vm0, %v6145_v0 }
  0xa3   :  { %5152 = vmatpush3.msra.mxu1 %v6332_v4  ;;  %5153 = vmatprep.mubr.msk.f32.mxu1 %vm6146_vm0, %v6145_v0 }
  0xa4   :  { %5143 = vmatmul.mubr.msk.f32.vlgmr.msra.gmra.mxu0 %vm219_vm1, %v541_v9  ;;  %5154 = vmatmul.mubr.msk.f32.vlgmr.msra.gmra.mxu1 %vm219_vm1, %v622_v10 }
  0xa5   :  { %5156 = vmatprep.subr.mxu0 %v6145_v0  ;;  %5167 = vmatprep.subr.mxu1 %v6145_v0 }
  0xa6   :  { %5157 = vmatpush3.msra.mxu0 %v6318_v1  ;;  %5168 = vmatpush3.msra.mxu1 %v6318_v1 }
  0xa7   :  { %5158 = vmatprep.subr.mxu0 %v6145_v0  ;;  %5169 = vmatprep.subr.mxu1 %v6145_v0 }
  0xa8   :  { %5159 = vmatpush3.msra.mxu0 %v6320_v2  ;;  %5170 = vmatpush3.msra.mxu1 %v6320_v2 }
  0xa9   :  { %5160 = vmatprep.subr.mxu0 %v6145_v0  ;;  %5171 = vmatprep.subr.mxu1 %v6145_v0 }
  0xaa   :  { %5161 = vmatpush3.msra.mxu0 %v6326_v3  ;;  %5172 = vmatpush3.msra.mxu1 %v6326_v3 }
  0xab   :  { %5162 = vmatprep.subr.mxu0 %v6145_v0  ;;  %5173 = vmatprep.subr.mxu1 %v6145_v0 }
  0xac   :  { %5163 = vmatpush3.msra.mxu0 %v6332_v4  ;;  %5164 = vmatprep.mubr.msk.f32.mxu0 %vm6146_vm0, %v6145_v0 }
  0xad   :  { %5174 = vmatpush3.msra.mxu1 %v6332_v4  ;;  %5175 = vmatprep.mubr.msk.f32.mxu1 %vm6146_vm0, %v6145_v0 }
  0xae   :  { %5165 = vmatmul.mubr.msk.f32.vlgmr.msra.gmra.mxu0 %vm219_vm1, %v703_v11  ;;  %5176 = vmatmul.mubr.msk.f32.vlgmr.msra.gmra.mxu1 %vm219_vm1, %v784_v12 }
  0xaf   :  { %5178 = vmatprep.subr.mxu0 %v6145_v0  ;;  %5189 = vmatprep.subr.mxu1 %v6145_v0 }
  0xb0   :  { %5186 = vmatprep.mubr.msk.f32.mxu0 %vm6146_vm0, %v6145_v0  ;;  %5197 = vmatprep.mubr.msk.f32.mxu1 %vm6146_vm0, %v6145_v0 }
 0x150   :  { %v289_v14 = vpop.f32.mrf.mxu0  ;;  %v370_v15 = vpop.f32.mrf.mxu1 }
 0x151   :  { %v290_v17 = vadd.f32 %v4739_v13, %v289_v14  ;;  %v371_v18 = vadd.f32 %v4739_v13, %v370_v15  ;;  %v6444_v15 = vld [vmem:[#allocation10 + $0x18] sm:$0xff] }
 0x152   :  { %v5100_v19 = vpop.f32.mrf.mxu0  ;;  %v5111_v20 = vpop.f32.mrf.mxu1  ;;  %5179 = vmatpush3.msra.mxu0 %v6444_v15 }
 0x153   :  { %v293_v22 = vmul.f32 %v290_v17, %v6417_v16  ;;  %v374_v24 = vmul.f32 %v371_v18, %v6419_v21  ;;  %v6446_v17 = vld [vmem:[#allocation8 + $0x18] sm:$0xff]  ;;  %v6448_v18 = vld [vmem:[#allocation10 + $0x10] sm:$0xff]  ;;  %5180 = vmatprep.subr.mxu0 %v6145_v0  ;;  %v6456_v20 = vld [vmem:[#allocation10 + $0x8] sm:$0xff] }
 0x154   :  { %5190 = vmatpush3.msra.mxu1 %v6446_v17  ;;  %v6452_v19 = vld [vmem:[#allocation8 + $0x10] sm:$0xff]  ;;  %5181 = vmatpush3.msra.mxu0 %v6448_v18 }
 0x155   :  { %v294_v23 = vsel %vm219_vm1, %v293_v22, 0.0  ;;  %v375_v25 = vsel %vm219_vm1, %v374_v24, 0.0  ;;  %5191 = vmatprep.subr.mxu1 %v6145_v0  ;;  %v6458_v22 = vld [vmem:[#allocation8 + $0x8] sm:$0xff]  ;;  %5182 = vmatprep.subr.mxu0 %v6145_v0  ;;  %v6466_v24 = vld [vmem:[#allocation8] sm:$0xff] }
 0x156   :  { %295 = vadd.xlane.f32.xlu0 %v294_v23  ;;  %5192 = vmatpush3.msra.mxu1 %v6452_v19  ;;  %v6464_v23 = vld [vmem:[#allocation10] sm:$0xff] }
 0x157   :  { %5193 = vmatprep.subr.mxu1 %v6145_v0  ;;  %5183 = vmatpush3.msra.mxu0 %v6456_v20 }
 0x158   :  { %5194 = vmatpush3.msra.mxu1 %v6458_v22  ;;  %5184 = vmatprep.subr.mxu0 %v6145_v0 }
 0x159   :  { %5195 = vmatprep.subr.mxu1 %v6145_v0  ;;  %5185 = vmatpush3.msra.mxu0 %v6464_v23 }
 0x15a   :  { %v451_v26 = vpop.f32.mrf.mxu0  ;;  %v532_v27 = vpop.f32.mrf.mxu1  ;;  %376 = vadd.xlane.f32.xlu0 %v375_v25  ;;  %5196 = vmatpush3.msra.mxu1 %v6466_v24  ;;  %v6474_v25 = vld [vmem:[#allocation13 + $0x18] sm:$0xff] }
 0x15b   :  { %v452_v29 = vadd.f32 %v4739_v13, %v451_v26  ;;  %v533_v30 = vadd.f32 %v4739_v13, %v532_v27  ;;  %v6476_v26 = vld [vmem:[#allocation11 + $0x18] sm:$0xff]  ;;  %5200 = vmatprep.subr.mxu0 %v6145_v0  ;;  %5211 = vmatprep.subr.mxu1 %v6145_v0  ;;  %v6483_v27 = vld [vmem:[#allocation13 + $0x10] sm:$0xff] }
 0x15c   :  { %v5133_v31 = vpop.f32.mrf.mxu1  ;;  %v5122_v32 = vpop.f32.mrf.mxu0  ;;  %5187 = vmatmul.mubr.f32.vlgmr.msra.gmra.mxu0 %v6145_v0  ;;  %5198 = vmatmul.mubr.msk.f32.vlgmr.msra.gmra.mxu1 %vm219_vm1, %v6417_v16 }
 0x15d   :  { %v455_v34 = vmul.f32 %v452_v29, %v6425_v28  ;;  %v536_v36 = vmul.f32 %v533_v30, %v6427_v33  ;;  %v6485_v29 = vld [vmem:[#allocation11 + $0x10] sm:$0xff]  ;;  %5201 = vmatpush3.msra.mxu0 %v6474_v25  ;;  %5212 = vmatpush3.msra.mxu1 %v6476_v26  ;;  %v6491_v30 = vld [vmem:[#allocation13 + $0x8] sm:$0xff]  ;;  %v6499_v32 = vld [vmem:[#allocation13] sm:$0xff] }
 0x15e   :  { %5202 = vmatprep.subr.mxu0 %v6145_v0  ;;  %5213 = vmatprep.subr.mxu1 %v6145_v0  ;;  %v6493_v31 = vld [vmem:[#allocation11 + $0x8] sm:$0xff] }
 0x15f   :  { %v456_v35 = vsel %vm219_vm1, %v455_v34, 0.0  ;;  %v537_v37 = vsel %vm219_vm1, %v536_v36, 0.0  ;;  %5203 = vmatpush3.msra.mxu0 %v6483_v27  ;;  %5214 = vmatpush3.msra.mxu1 %v6485_v29  ;;  %v6503_v34 = vld [vmem:[#allocation11] sm:$0xff]  ;;  %v6515_v36 = vld [vmem:[#allocation14 + $0x18] sm:$0xff] }
 0x160   :  { %457 = vadd.xlane.f32.xlu1 %v456_v35  ;;  %5204 = vmatprep.subr.mxu0 %v6145_v0  ;;  %v6513_v35 = vld [vmem:[#allocation16 + $0x18] sm:$0xff] }
 0x161   :  { %5215 = vmatprep.subr.mxu1 %v6145_v0  ;;  %5205 = vmatpush3.msra.mxu0 %v6491_v30 }
 0x162   :  { %5216 = vmatpush3.msra.mxu1 %v6493_v31  ;;  %5206 = vmatprep.subr.mxu0 %v6145_v0 }
 0x163   :  { %5217 = vmatprep.subr.mxu1 %v6145_v0  ;;  %5207 = vmatpush3.msra.mxu0 %v6499_v32 }
 0x164   :  { %v613_v38 = vpop.f32.mrf.mxu0  ;;  %v694_v39 = vpop.f32.mrf.mxu1  ;;  %538 = vadd.xlane.f32.xlu1 %v537_v37  ;;  %5208 = vmatprep.mubr.msk.f32.mxu0 %vm6146_vm0, %v6145_v0  ;;  %v6522_v37 = vld [vmem:[#allocation16 + $0x10] sm:$0xff] }
 0x165   :  { %v614_v42 = vadd.f32 %v4739_v13, %v613_v38  ;;  %v695_v43 = vadd.f32 %v4739_v13, %v694_v39  ;;  %5218 = vmatpush3.msra.mxu1 %v6503_v34  ;;  %5219 = vmatprep.mubr.msk.f32.mxu1 %vm6146_vm0, %v6145_v0  ;;  %v6524_v38 = vld [vmem:[#allocation14 + $0x10] sm:$0xff]  ;;  %v6530_v39 = vld [vmem:[#allocation16 + $0x8] sm:$0xff] }
 0x166   :  { %v5155_v44 = vpop.f32.mrf.mxu1  ;;  %v5144_v45 = vpop.f32.mrf.mxu0  ;;  %5209 = vmatmul.mubr.f32.vlgmr.msra.gmra.mxu0 %v6145_v0  ;;  %5220 = vmatmul.mubr.msk.f32.vlgmr.msra.gmra.mxu1 %vm219_vm1, %v6417_v16 }
 0x167   :  { %v617_v46 = vmul.f32 %v614_v42, %v6433_v40  ;;  %v698_v47 = vmul.f32 %v695_v43, %v624_v41  ;;  %5233 = vmatprep.subr.mxu1 %v6145_v0  ;;  %5222 = vmatprep.subr.mxu0 %v6145_v0  ;;  %v6532_v41 = vld [vmem:[#allocation14 + $0x8] sm:$0xff]  ;;  %v6538_v42 = vld [vmem:[#allocation16] sm:$0xff] }
 0x168   :  { %5234 = vmatpush3.msra.mxu1 %v6513_v35  ;;  %5223 = vmatpush3.msra.mxu0 %v6515_v36  ;;  %v6542_v43 = vld [vmem:[#allocation14] sm:$0xff] }
 0x169   :  { %v618_v48 = vsel %vm219_vm1, %v617_v46, 0.0  ;;  %v699_v49 = vsel %vm219_vm1, %v698_v47, 0.0  ;;  %5235 = vmatprep.subr.mxu1 %v6145_v0  ;;  %5224 = vmatprep.subr.mxu0 %v6145_v0 }
 0x16a   :  { %619 = vadd.xlane.f32.xlu0 %v618_v48  ;;  %700 = vadd.xlane.f32.xlu1 %v699_v49  ;;  %v6147_v48 = vmov 1   ;;  %v6148_v49 = vmov 0  }
 0x16b   :  { %5236 = vmatpush3.msra.mxu1 %v6522_v37  ;;  %5225 = vmatpush3.msra.mxu0 %v6524_v38 }
 0x16c   :  { %5237 = vmatprep.subr.mxu1 %v6145_v0  ;;  %5226 = vmatprep.subr.mxu0 %v6145_v0 }
 0x16d   :  { %5238 = vmatpush3.msra.mxu1 %v6530_v39  ;;  %5227 = vmatpush3.msra.mxu0 %v6532_v41 }
 0x16e   :  { %v775_v50 = vpop.f32.mrf.mxu0  ;;  %v856_v51 = vpop.f32.mrf.mxu1  ;;  %5239 = vmatprep.subr.mxu1 %v6145_v0  ;;  %5241 = vmatprep.mubr.msk.f32.mxu1 %vm6146_vm0, %v6145_v0 }
 0x16f   :  { %v776_v54 = vadd.f32 %v4739_v13, %v775_v50  ;;  %v857_v55 = vadd.f32 %v4739_v13, %v856_v51  ;;  %5240 = vmatpush3.msra.mxu1 %v6538_v42  ;;  %5228 = vmatprep.subr.mxu0 %v6145_v0 }
 0x170   :  { %v5166_v56 = vpop.f32.mrf.mxu0  ;;  %v5177_v57 = vpop.f32.mrf.mxu1  ;;  %5242 = vmatmul.mubr.f32.vlgmr.msra.gmra.mxu1 %v6145_v0  ;;  %5229 = vmatpush3.msra.mxu0 %v6542_v43 }
 0x171   :  { %v779_v58 = vmul.f32 %v776_v54, %v705_v52  ;;  %v860_v59 = vmul.f32 %v857_v55, %v786_v53  ;;  %5230 = vmatprep.mubr.msk.f32.mxu0 %vm6146_vm0, %v6145_v0  ;;  %5255 = vmatprep.subr.mxu1 %v6145_v0  ;;  %v6606_v56 = vld [vmem:[%s7279_s9] ss:$0 sm:$0xff] }
 0x172   :  { %5231 = vmatmul.mubr.msk.f32.vlgmr.msra.gmra.mxu0 %vm219_vm1, %v6417_v16  ;;  %5256 = vmatpush3.msra.mxu1 %v6446_v17 }
 0x173   :  { %v780_v60 = vsel %vm219_vm1, %v779_v58, 0.0  ;;  %v861_v61 = vsel %vm219_vm1, %v860_v59, 0.0  ;;  %5257 = vmatprep.subr.mxu1 %v6145_v0  ;;  %5263 = vmatprep.mubr.msk.f32.mxu1 %vm6146_vm0, %v6145_v0 }
 0x174   :  { %781 = vadd.xlane.f32.xlu0 %v780_v60  ;;  %862 = vadd.xlane.f32.xlu1 %v861_v61 }
 0x175   :  { %5258 = vmatpush3.msra.mxu1 %v6452_v19  ;;  %5244 = vmatprep.subr.mxu0 %v6145_v0 }
 0x176   :  { %5259 = vmatprep.subr.mxu1 %v6145_v0  ;;  %5245 = vmatpush3.msra.mxu0 %v6444_v15 }
 0x177   :  { %5260 = vmatpush3.msra.mxu1 %v6458_v22  ;;  %5246 = vmatprep.subr.mxu0 %v6145_v0 }
 0x178   :  { %5261 = vmatprep.subr.mxu1 %v6145_v0  ;;  %5247 = vmatpush3.msra.mxu0 %v6448_v18 }
 0x179   :  { %5262 = vmatpush3.msra.mxu1 %v6466_v24  ;;  %5248 = vmatprep.subr.mxu0 %v6145_v0 }
 0x17a   :  { %5277 = vmatprep.subr.mxu1 %v6145_v0  ;;  %5264 = vmatmul.mubr.msk.f32.vlgmr.msra.gmra.mxu1 %vm219_vm1, %v6419_v21 }
 0x17b   :  { %5278 = vmatpush3.msra.mxu1 %v6476_v26  ;;  %5285 = vmatprep.mubr.msk.f32.mxu1 %vm6146_vm0, %v6145_v0 }
 0x17c   :  { %5279 = vmatprep.subr.mxu1 %v6145_v0  ;;  %5249 = vmatpush3.msra.mxu0 %v6456_v20 }
 0x17d   :  { %5280 = vmatpush3.msra.mxu1 %v6485_v29  ;;  %5250 = vmatprep.subr.mxu0 %v6145_v0 }
 0x17e   :  { %5281 = vmatprep.subr.mxu1 %v6145_v0  ;;  %5251 = vmatpush3.msra.mxu0 %v6464_v23 }
 0x17f   :  { %5282 = vmatpush3.msra.mxu1 %v6493_v31  ;;  %5252 = vmatprep.mubr.msk.f32.mxu0 %vm6146_vm0, %v6145_v0 }
 0x180   :  { %5283 = vmatprep.subr.mxu1 %v6145_v0  ;;  %5266 = vmatprep.subr.mxu0 %v6145_v0 }
 0x181   :  { %5284 = vmatpush3.msra.mxu1 %v6503_v34  ;;  %5753 = vset.pattern.permute.xlu1 %v6147_v48  ;;  %v6151_v48 = vmov 3  }
 0x182   :  { %5299 = vmatprep.subr.mxu1 %v6145_v0  ;;  %5286 = vmatmul.mubr.msk.f32.vlgmr.msra.gmra.mxu1 %vm219_vm1, %v6419_v21 }
 0x183   :  { %5300 = vmatpush3.msra.mxu1 %v6513_v35  ;;  %5307 = vmatprep.mubr.msk.f32.mxu1 %vm6146_vm0, %v6145_v0 }
 0x184   :  { %5301 = vmatprep.subr.mxu1 %v6145_v0  ;;  %5752 = vset.pattern.permute.xlu0 %v6148_v49  ;;  %v6152_v49 = vmov 4  }
 0x185   :  { %5302 = vmatpush3.msra.mxu1 %v6522_v37 }
 0x186   :  { %5303 = vmatprep.subr.mxu1 %v6145_v0 }
 0x187   :  { %5304 = vmatpush3.msra.mxu1 %v6530_v39 }
 0x188   :  { %5305 = vmatprep.subr.mxu1 %v6145_v0 }
 0x189   :  { %5306 = vmatpush3.msra.mxu1 %v6538_v42 }
 0x18a   :  { %5321 = vmatprep.subr.mxu1 %v6145_v0 }
 0x1df   :  { %v296_v62 = vpop.xlane.xlu0 %295 }
 0x1e3   :  { %v377_v1 = vpop.xlane.xlu0 %376 }
 0x1e4   :  { %v865_v3 = vsel %vm864_vm2, %v296_v62, %v377_v1 }
 0x1e9   :  { %v458_v63 = vpop.xlane.xlu1 %457 }
 0x1ea   :  { %v867_v5 = vsel %vm866_vm3, %v865_v3, %v458_v63 }
 0x1ed   :  { %v539_v2 = vpop.xlane.xlu1 %538 }
 0x1ee   :  { %v869_v6 = vsel %vm868_vm4, %v867_v5, %v539_v2 }
 0x1f3   :  { %v620_v4 = vpop.xlane.xlu0 %619  ;;  %v701_v7 = vpop.xlane.xlu1 %700 }
 0x1f4   :  { %v871_v8 = vsel %vm870_vm5, %v869_v6, %v620_v4 }
 0x1f5   :  { %v873_v9 = vsel %vm872_vm6, %v871_v8, %v701_v7  ;;  %v6612_v7 = vld [vmem:[%s7283_s13] ss:$0 sm:$0xff] }
 0x1f6   :  { %v6617_v8 = vld [vmem:[%s7281_s11] ss:$0 sm:$0xff] }
 0x1fd   :  { %v782_v10 = vpop.xlane.xlu0 %781  ;;  %v863_v11 = vpop.xlane.xlu1 %862 }
 0x1fe   :  { %v875_v12 = vsel %vm874_vm7, %v873_v9, %v782_v10 }
 0x1ff   :  { %v6440_v13 = vsel %vm876_vm8, %v875_v12, %v863_v11 }
 0x200   :  { %v879_v14 = vsel %vm878_vm9, %v6440_v13, -inf }
 0x201   :  { %880 = vmax.xlane.f32.xlu0 %v879_v14 }
 0x21c   :  { %v987_v50 = vpop.f32.mrf.mxu0  ;;  %v1060_v51 = vpop.f32.mrf.mxu1 }
 0x21d   :  { %v1061_v52 = vadd.f32 %v1060_v51, %v987_v50  ;;  %v6153_v50 = vmov 5   ;;  %v6154_v51 = vmov 6  }
 0x21e   :  { %v5188_v53 = vpop.f32.mrf.mxu0  ;;  %v5199_v54 = vpop.f32.mrf.mxu1 }
 0x226   :  { %v1149_v55 = vpop.f32.mrf.mxu0  ;;  %v1219_v57 = vpop.f32.mrf.mxu1 }
 0x227   :  { %v1220_v58 = vadd.f32 %v1219_v57, %v1149_v55  ;;  %v6628_v57 = vld [vmem:[%s7276_s6] ss:$0 sm:$0xff] }
 0x228   :  { %v5210_v59 = vpop.f32.mrf.mxu0  ;;  %v5221_v60 = vpop.f32.mrf.mxu1 }
 0x229   :  { %v1229_v61 = vadd.f32 %v6606_v56, %v1220_v58  ;;  %v1070_v58 = vadd.f32 %v6628_v57, %v1061_v52 }
 0x22b   :  { %v1230_v62 = vsub.f32 0.0, %v1229_v61  ;;  %v1071_v59 = vsub.f32 0.0, %v1070_v58 }
 0x22d   :  { %v1231_v63 = vmul.f32 1.442695, %v1230_v62  ;;  %v1072_v60 = vmul.f32 1.442695, %v1071_v59 }
 0x230   :  { %v1384_v1 = vpop.f32.mrf.mxu1 }
 0x231   :  { %v1385_v9 = vadd.f32 %v6612_v7, %v1384_v1 }
 0x232   :  { %v1308_v2 = vpop.f32.mrf.mxu0  ;;  %v5243_v3 = vpop.f32.mrf.mxu1 }
 0x233   :  { %v1309_v10 = vadd.f32 %v6617_v8, %v1308_v2 }
 0x234   :  { %v5232_v4 = vpop.f32.mrf.mxu0 }
 0x28a   :  { %v881_v16 = vpop.xlane.xlu0 %880 }
 0x28b   :  { %v882_v44 = vsub.f32 %v6440_v13, %v881_v16 }
 0x28d   :  { %v883_v45 = vmul.f32 1.442695, %v882_v44 }
 0x28f   :  { %5761 = vpow2.f32 %v883_v45  ;;  %v6149_v45 = vmov 2  }
 0x290   :  { %5763 = vpow2.f32 %v1231_v63 }
 0x29c   :  { %v5762_v46 = vpop.eup %5761 }
 0x29d   :  { %v885_v47 = vsel %vm878_vm9, %v5762_v46, 0.0  ;;  %v5764_v5 = vpop.eup %5763 }
 0x29e   :  { %886 = vadd.xlane.f32.xlu1 %v885_v47  ;;  %v1233_v6 = vadd.f32 1.0, %v5764_v5  ;;  %v6150_v47 = vmov 7  }
 0x2a0   :  { %5765 = vrcp.f32 %v1233_v6 }
 0x2ad   :  { %v5766_v11 = vpop.eup %5765 }
 0x2ae   :  { %v1388_v12 = vmul.f32 %v5766_v11, %v1385_v9 }
 0x2b0   :  { %v1389_v13 = vadd.f32 %v1388_v12, %v1309_v10 }
 0x327   :  { %v887_v14 = vpop.xlane.xlu1 %886 }
 0x328   :  { %5767 = vrcp.f32 %v887_v14 }
 0x329   :  { %5769 = vpow2.f32 %v1072_v60 }
 0x335   :  { %v5768_v16 = vpop.eup %5767 }
 0x336   :  { %v889_v44 = vmul.f32 %v5768_v16, %v5762_v46  ;;  %v6621_v46 = vpop.f32.mrf.mxu1  ;;  %v5770_v61 = vpop.eup %5769 }
 0x337   :  { %v1074_v62 = vadd.f32 1.0, %v5770_v61 }
 0x338   :  { %1549 = vperm.xlu1 %5753, %v889_v44   ;;  %1079 = vperm.xlu0 %5752, %v889_v44   ;;  %v5265_v53 = vpop.f32.mrf.mxu1 }
 0x339   :  { %5771 = vrcp.f32 %v1074_v62 }
 0x33a   :  { %v6623_v54 = vpop.f32.mrf.mxu1  ;;  %5773 = vtanh.f32 %v1389_v13 }
 0x33c   :  { %5754 = vset.pattern.permute.xlu1 %v6149_v45  ;;  %5760 = vset.pattern.permute.xlu0 %v6150_v47  ;;  %v5287_v55 = vpop.f32.mrf.mxu1 }
 0x33d   :  { %2001 = vperm.xlu1 %5754, %v889_v44  }
 0x341   :  { %5755 = vset.pattern.permute.xlu1 %v6151_v48 }
 0x342   :  { %2453 = vperm.xlu1 %5755, %v889_v44  }
 0x346   :  { %5756 = vset.pattern.permute.xlu1 %v6152_v49  ;;  %v5772_v63 = vpop.eup %5771 }
 0x347   :  { %2905 = vperm.xlu1 %5756, %v889_v44   ;;  %v5774_v1 = vpop.eup %5773 }
 0x34b   :  { %5757 = vset.pattern.permute.xlu1 %v6153_v50 }
 0x34c   :  { %3357 = vperm.xlu1 %5757, %v889_v44  }
 0x350   :  { %5758 = vset.pattern.permute.xlu1 %v6154_v51 }
 0x351   :  { %3809 = vperm.xlu1 %5758, %v889_v44  }
 0x355   :  { %5759 = vset.pattern.permute.xlu1 %v6150_v47 }
 0x356   :  { %4261 = vperm.xlu1 %5759, %v889_v44  }
 0x3b3   :  { %v1080_v2 = vpop.permute.xlu0 %1079 }
 0x3b4   :  { %v1082_v3 = vmul.f32 %v5772_v63, %v1080_v2 }
 0x3b6   :  { %v1391_v4 = vsub.f32 1.0, %v1082_v3  ;;  %v1393_v5 = vmul.f32 %v5774_v1, %v1082_v3 }
 0x3b8   :  { %v1392_v6 = vmul.f32 0.0, %v1391_v4 }
 0x3ba   :  { %v6631_v9 = vadd.f32 %v1393_v5, %v1392_v6  ;;  %v1550_v6 = vpop.permute.xlu1 %1549 }
 0x3bc   :  { %5253 = vmatmul.mubr.msk.f32.vlgmr.msra.gmra.mxu0 %vm219_vm1, %v6631_v9  ;;  %5308 = vmatmul.mubr.msk.f32.vlgmr.msra.gmra.mxu1 %vm219_vm1, %v6631_v9 }
 0x3bd   :  { %5267 = vmatpush3.msra.mxu0 %v6474_v25  ;;  %5274 = vmatprep.mubr.msk.f32.mxu0 %vm6146_vm0, %v6145_v0 }
 0x3be   :  { %5268 = vmatprep.subr.mxu0 %v6145_v0  ;;  %5322 = vmatpush3.msra.mxu1 %v6446_v17 }
 0x3bf   :  { %5269 = vmatpush3.msra.mxu0 %v6483_v27  ;;  %5323 = vmatprep.subr.mxu1 %v6145_v0 }
 0x3c0   :  { %5270 = vmatprep.subr.mxu0 %v6145_v0  ;;  %5324 = vmatpush3.msra.mxu1 %v6452_v19 }
 0x3c1   :  { %5271 = vmatpush3.msra.mxu0 %v6491_v30  ;;  %5325 = vmatprep.subr.mxu1 %v6145_v0 }
 0x3c2   :  { %5272 = vmatprep.subr.mxu0 %v6145_v0  ;;  %5326 = vmatpush3.msra.mxu1 %v6458_v22 }
 0x3c3   :  { %5273 = vmatpush3.msra.mxu0 %v6499_v32  ;;  %5327 = vmatprep.subr.mxu1 %v6145_v0 }
 0x3c4   :  { %5275 = vmatmul.mubr.msk.f32.vlgmr.msra.gmra.mxu0 %vm219_vm1, %v6631_v9  ;;  %5288 = vmatprep.subr.mxu0 %v6145_v0 }
 0x3c5   :  { %5289 = vmatpush3.msra.mxu0 %v6515_v36  ;;  %5296 = vmatprep.mubr.msk.f32.mxu0 %vm6146_vm0, %v6145_v0 }
 0x3c6   :  { %5290 = vmatprep.subr.mxu0 %v6145_v0  ;;  %5328 = vmatpush3.msra.mxu1 %v6466_v24 }
 0x3c7   :  { %5291 = vmatpush3.msra.mxu0 %v6524_v38  ;;  %5329 = vmatprep.mubr.msk.f32.mxu1 %vm6146_vm0, %v6145_v0 }
 0x3c8   :  { %5292 = vmatprep.subr.mxu0 %v6145_v0  ;;  %5343 = vmatprep.subr.mxu1 %v6145_v0 }
 0x3c9   :  { %5293 = vmatpush3.msra.mxu0 %v6532_v41  ;;  %5330 = vmatmul.mubr.msk.f32.vlgmr.msra.gmra.mxu1 %vm219_vm1, %v6425_v28 }
 0x3ca   :  { %5294 = vmatprep.subr.mxu0 %v6145_v0  ;;  %5344 = vmatpush3.msra.mxu1 %v6476_v26 }
 0x3cb   :  { %5295 = vmatpush3.msra.mxu0 %v6542_v43  ;;  %5345 = vmatprep.subr.mxu1 %v6145_v0 }
 0x3cc   :  { %5297 = vmatmul.mubr.msk.f32.vlgmr.msra.gmra.mxu0 %vm219_vm1, %v6419_v21  ;;  %5346 = vmatpush3.msra.mxu1 %v6485_v29 }
 0x3cd   :  { %5347 = vmatprep.subr.mxu1 %v6145_v0  ;;  %5310 = vmatprep.subr.mxu0 %v6145_v0 }
 0x3ce   :  { %5348 = vmatpush3.msra.mxu1 %v6493_v31  ;;  %5311 = vmatpush3.msra.mxu0 %v6444_v15 }
 0x3cf   :  { %5349 = vmatprep.subr.mxu1 %v6145_v0  ;;  %5351 = vmatprep.mubr.msk.f32.mxu1 %vm6146_vm0, %v6145_v0 }
 0x3d0   :  { %5350 = vmatpush3.msra.mxu1 %v6503_v34  ;;  %5312 = vmatprep.subr.mxu0 %v6145_v0 }
 0x3d1   :  { %5365 = vmatprep.subr.mxu1 %v6145_v0  ;;  %5352 = vmatmul.mubr.msk.f32.vlgmr.msra.gmra.mxu1 %vm219_vm1, %v6425_v28 }
 0x3d2   :  { %5366 = vmatpush3.msra.mxu1 %v6513_v35  ;;  %5313 = vmatpush3.msra.mxu0 %v6448_v18 }
 0x3d3   :  { %5367 = vmatprep.subr.mxu1 %v6145_v0  ;;  %5314 = vmatprep.subr.mxu0 %v6145_v0 }
 0x3d4   :  { %5368 = vmatpush3.msra.mxu1 %v6522_v37  ;;  %5315 = vmatpush3.msra.mxu0 %v6456_v20 }
 0x3d5   :  { %5369 = vmatprep.subr.mxu1 %v6145_v0  ;;  %5316 = vmatprep.subr.mxu0 %v6145_v0 }
 0x3d6   :  { %5370 = vmatpush3.msra.mxu1 %v6530_v39  ;;  %5317 = vmatpush3.msra.mxu0 %v6464_v23 }
 0x3d7   :  { %5371 = vmatprep.subr.mxu1 %v6145_v0  ;;  %5318 = vmatprep.mubr.msk.f32.mxu0 %vm6146_vm0, %v6145_v0 }
 0x3d8   :  { %5332 = vmatprep.subr.mxu0 %v6145_v0  ;;  %5372 = vmatpush3.msra.mxu1 %v6538_v42 }
 0x3d9   :  { %5373 = vmatprep.mubr.msk.f32.mxu1 %vm6146_vm0, %v6145_v0  ;;  %5387 = vmatprep.subr.mxu1 %v6145_v0 }
 0x47c   :  { %v1464_v21 = vpop.f32.mrf.mxu0  ;;  %v1836_v52 = vpop.f32.mrf.mxu1 }
 0x47d   :  { %v1538_v12 = vadd.f32 %v6621_v46, %v1464_v21  ;;  %v1837_v63 = vadd.f32 %v6612_v7, %v1836_v52 }
 0x47e   :  { %v5254_v10 = vpop.f32.mrf.mxu0  ;;  %v5309_v11 = vpop.f32.mrf.mxu1 }
 0x47f   :  { %v1541_v14 = vadd.f32 %v6628_v57, %v1538_v12 }
 0x481   :  { %v1542_v47 = vsub.f32 0.0, %v1541_v14 }
 0x483   :  { %v1543_v55 = vmul.f32 1.442695, %v1542_v47 }
 0x484   :  { %v1619_v13 = vpop.f32.mrf.mxu0 }
 0x485   :  { %v1690_v16 = vadd.f32 %v6623_v54, %v1619_v13 }
 0x486   :  { %v5276_v44 = vpop.f32.mrf.mxu0 }
 0x487   :  { %v1693_v45 = vadd.f32 %v6606_v56, %v1690_v16 }
 0x489   :  { %v1694_v48 = vsub.f32 0.0, %v1693_v45  ;;  %v6709_v49 = vpop.f32.mrf.mxu1 }
 0x48b   :  { %v1695_v50 = vmul.f32 1.442695, %v1694_v48  ;;  %v5331_v51 = vpop.f32.mrf.mxu1 }
 0x48c   :  { %v1766_v53 = vpop.f32.mrf.mxu0 }
 0x48d   :  { %5775 = vpow2.f32 %v1695_v50  ;;  %v1767_v1 = vadd.f32 %v6617_v8, %v1766_v53 }
 0x48e   :  { %v5298_v58 = vpop.f32.mrf.mxu0  ;;  %5777 = vpow2.f32 %v1543_v55 }
 0x491   :  { %v6711_v46 = vpop.f32.mrf.mxu1 }
 0x493   :  { %v5353_v59 = vpop.f32.mrf.mxu1 }
 0x49a   :  { %v5776_v60 = vpop.eup %5775 }
 0x49b   :  { %v1697_v61 = vadd.f32 1.0, %v5776_v60  ;;  %v5778_v54 = vpop.eup %5777 }
 0x49c   :  { %v1545_v62 = vadd.f32 1.0, %v5778_v54 }
 0x49d   :  { %5779 = vrcp.f32 %v1697_v61 }
 0x49e   :  { %5781 = vrcp.f32 %v1545_v62 }
 0x4aa   :  { %v5780_v2 = vpop.eup %5779 }
 0x4ab   :  { %v1840_v3 = vmul.f32 %v5780_v2, %v1837_v63  ;;  %v5782_v5 = vpop.eup %5781 }
 0x4ac   :  { %v1552_v21 = vmul.f32 %v5782_v5, %v1550_v6 }
 0x4ad   :  { %v1841_v4 = vadd.f32 %v1840_v3, %v1767_v1 }
 0x4ae   :  { %v1843_v10 = vsub.f32 1.0, %v1552_v21 }
 0x4af   :  { %5783 = vtanh.f32 %v1841_v4 }
 0x4b0   :  { %v1844_v12 = vmul.f32 %v1843_v10, %v6631_v9 }
 0x4bc   :  { %v5784_v11 = vpop.eup %5783 }
 0x4bd   :  { %v1845_v13 = vmul.f32 %v5784_v11, %v1552_v21 }
 0x4bf   :  { %v6716_v14 = vadd.f32 %v1845_v13, %v1844_v12  ;;  %v2002_v12 = vpop.permute.xlu1 %2001 }
 0x4c1   :  { %5319 = vmatmul.mubr.msk.f32.vlgmr.msra.gmra.mxu0 %vm219_vm1, %v6716_v14  ;;  %5374 = vmatmul.mubr.msk.f32.vlgmr.msra.gmra.mxu1 %vm219_vm1, %v6716_v14 }
 0x4c2   :  { %5333 = vmatpush3.msra.mxu0 %v6474_v25  ;;  %5340 = vmatprep.mubr.msk.f32.mxu0 %vm6146_vm0, %v6145_v0 }
 0x4c3   :  { %5334 = vmatprep.subr.mxu0 %v6145_v0  ;;  %5388 = vmatpush3.msra.mxu1 %v6446_v17 }
 0x4c4   :  { %5335 = vmatpush3.msra.mxu0 %v6483_v27  ;;  %5389 = vmatprep.subr.mxu1 %v6145_v0 }
 0x4c5   :  { %5336 = vmatprep.subr.mxu0 %v6145_v0  ;;  %5390 = vmatpush3.msra.mxu1 %v6452_v19 }
 0x4c6   :  { %5337 = vmatpush3.msra.mxu0 %v6491_v30  ;;  %5391 = vmatprep.subr.mxu1 %v6145_v0 }
 0x4c7   :  { %5338 = vmatprep.subr.mxu0 %v6145_v0  ;;  %5392 = vmatpush3.msra.mxu1 %v6458_v22 }
 0x4c8   :  { %5339 = vmatpush3.msra.mxu0 %v6499_v32  ;;  %5393 = vmatprep.subr.mxu1 %v6145_v0 }
 0x4c9   :  { %5341 = vmatmul.mubr.msk.f32.vlgmr.msra.gmra.mxu0 %vm219_vm1, %v6716_v14  ;;  %5354 = vmatprep.subr.mxu0 %v6145_v0 }
 0x4ca   :  { %5355 = vmatpush3.msra.mxu0 %v6515_v36  ;;  %5362 = vmatprep.mubr.msk.f32.mxu0 %vm6146_vm0, %v6145_v0 }
 0x4cb   :  { %5356 = vmatprep.subr.mxu0 %v6145_v0  ;;  %5394 = vmatpush3.msra.mxu1 %v6466_v24 }
 0x4cc   :  { %5357 = vmatpush3.msra.mxu0 %v6524_v38  ;;  %5395 = vmatprep.mubr.msk.f32.mxu1 %vm6146_vm0, %v6145_v0 }
 0x4cd   :  { %5358 = vmatprep.subr.mxu0 %v6145_v0  ;;  %5409 = vmatprep.subr.mxu1 %v6145_v0 }
 0x4ce   :  { %5359 = vmatpush3.msra.mxu0 %v6532_v41  ;;  %5396 = vmatmul.mubr.msk.f32.vlgmr.msra.gmra.mxu1 %vm219_vm1, %v6427_v33 }
 0x4cf   :  { %5360 = vmatprep.subr.mxu0 %v6145_v0  ;;  %5410 = vmatpush3.msra.mxu1 %v6476_v26 }
 0x4d0   :  { %5361 = vmatpush3.msra.mxu0 %v6542_v43  ;;  %5411 = vmatprep.subr.mxu1 %v6145_v0 }
 0x4d1   :  { %5363 = vmatmul.mubr.msk.f32.vlgmr.msra.gmra.mxu0 %vm219_vm1, %v6425_v28  ;;  %5412 = vmatpush3.msra.mxu1 %v6485_v29 }
 0x4d2   :  { %5413 = vmatprep.subr.mxu1 %v6145_v0  ;;  %5376 = vmatprep.subr.mxu0 %v6145_v0 }
 0x4d3   :  { %5414 = vmatpush3.msra.mxu1 %v6493_v31  ;;  %5377 = vmatpush3.msra.mxu0 %v6444_v15 }
 0x4d4   :  { %5415 = vmatprep.subr.mxu1 %v6145_v0  ;;  %5417 = vmatprep.mubr.msk.f32.mxu1 %vm6146_vm0, %v6145_v0 }
 0x4d5   :  { %5416 = vmatpush3.msra.mxu1 %v6503_v34  ;;  %5378 = vmatprep.subr.mxu0 %v6145_v0 }
 0x4d6   :  { %5431 = vmatprep.subr.mxu1 %v6145_v0  ;;  %5418 = vmatmul.mubr.msk.f32.vlgmr.msra.gmra.mxu1 %vm219_vm1, %v6427_v33 }
 0x4d7   :  { %5432 = vmatpush3.msra.mxu1 %v6513_v35  ;;  %5379 = vmatpush3.msra.mxu0 %v6448_v18 }
 0x4d8   :  { %5433 = vmatprep.subr.mxu1 %v6145_v0  ;;  %5380 = vmatprep.subr.mxu0 %v6145_v0 }
 0x4d9   :  { %5434 = vmatpush3.msra.mxu1 %v6522_v37  ;;  %5381 = vmatpush3.msra.mxu0 %v6456_v20 }
 0x4da   :  { %5435 = vmatprep.subr.mxu1 %v6145_v0  ;;  %5382 = vmatprep.subr.mxu0 %v6145_v0 }
 0x4db   :  { %5436 = vmatpush3.msra.mxu1 %v6530_v39  ;;  %5383 = vmatpush3.msra.mxu0 %v6464_v23 }
 0x4dc   :  { %5437 = vmatprep.subr.mxu1 %v6145_v0  ;;  %5384 = vmatprep.mubr.msk.f32.mxu0 %vm6146_vm0, %v6145_v0 }
 0x4dd   :  { %5398 = vmatprep.subr.mxu0 %v6145_v0  ;;  %5438 = vmatpush3.msra.mxu1 %v6538_v42 }
 0x4de   :  { %5439 = vmatprep.mubr.msk.f32.mxu1 %vm6146_vm0, %v6145_v0  ;;  %5453 = vmatprep.subr.mxu1 %v6145_v0 }
 0x581   :  { %v1916_v28 = vpop.f32.mrf.mxu0  ;;  %v2288_v9 = vpop.f32.mrf.mxu1 }
 0x582   :  { %v1990_v44 = vadd.f32 %v6709_v49, %v1916_v28  ;;  %v2289_v4 = vadd.f32 %v6612_v7, %v2288_v9 }
 0x583   :  { %v5320_v52 = vpop.f32.mrf.mxu0  ;;  %v5375_v16 = vpop.f32.mrf.mxu1 }
 0x584   :  { %v1993_v47 = vadd.f32 %v6628_v57, %v1990_v44 }
 0x586   :  { %v1994_v53 = vsub.f32 0.0, %v1993_v47 }
 0x588   :  { %v1995_v54 = vmul.f32 1.442695, %v1994_v53 }
 0x589   :  { %v2071_v45 = vpop.f32.mrf.mxu0 }
 0x58a   :  { %v2142_v48 = vadd.f32 %v6711_v46, %v2071_v45 }
 0x58b   :  { %v5342_v50 = vpop.f32.mrf.mxu0 }
 0x58c   :  { %v2145_v51 = vadd.f32 %v6606_v56, %v2142_v48 }
 0x58e   :  { %v2146_v55 = vsub.f32 0.0, %v2145_v51  ;;  %v6794_v58 = vpop.f32.mrf.mxu1 }
 0x590   :  { %v2147_v59 = vmul.f32 1.442695, %v2146_v55  ;;  %v5397_v60 = vpop.f32.mrf.mxu1 }
 0x591   :  { %v2218_v61 = vpop.f32.mrf.mxu0 }
 0x592   :  { %5785 = vpow2.f32 %v2147_v59  ;;  %v2219_v5 = vadd.f32 %v6617_v8, %v2218_v61 }
 0x593   :  { %v5364_v62 = vpop.f32.mrf.mxu0  ;;  %5787 = vpow2.f32 %v1995_v54 }
 0x596   :  { %v6796_v49 = vpop.f32.mrf.mxu1 }
 0x598   :  { %v5419_v63 = vpop.f32.mrf.mxu1 }
 0x59f   :  { %v5786_v1 = vpop.eup %5785 }
 0x5a0   :  { %v2149_v2 = vadd.f32 1.0, %v5786_v1  ;;  %v5788_v46 = vpop.eup %5787 }
 0x5a1   :  { %v1997_v3 = vadd.f32 1.0, %v5788_v46 }
 0x5a2   :  { %5789 = vrcp.f32 %v2149_v2  ;;  %v2454_v2 = vpop.permute.xlu1 %2453 }
 0x5a3   :  { %5791 = vrcp.f32 %v1997_v3 }
 0x5af   :  { %v5790_v6 = vpop.eup %5789 }
 0x5b0   :  { %v2292_v21 = vmul.f32 %v5790_v6, %v2289_v4  ;;  %v5792_v11 = vpop.eup %5791 }
 0x5b1   :  { %v2004_v13 = vmul.f32 %v5792_v11, %v2002_v12  ;;  %v6902_v11 = vld [vmem:[#allocation8 + $0x10] sm:$0xff]  ;;  %v6948_v12 = vld [vmem:[#allocation10 + $0x18] sm:$0xff] }
 0x5b2   :  { %v2293_v10 = vadd.f32 %v2292_v21, %v2219_v5 }
 0x5b3   :  { %v2295_v28 = vsub.f32 1.0, %v2004_v13 }
 0x5b4   :  { %5793 = vtanh.f32 %v2293_v10  ;;  %v6896_v10 = vld [vmem:[#allocation8 + $0x18] sm:$0xff] }
 0x5b5   :  { %v2296_v16 = vmul.f32 %v2295_v28, %v6716_v14 }
 0x5c1   :  { %v5794_v52 = vpop.eup %5793 }
 0x5c2   :  { %v2297_v44 = vmul.f32 %v5794_v52, %v2004_v13 }
 0x5c4   :  { %v6801_v45 = vadd.f32 %v2297_v44, %v2296_v16 }
 0x5c6   :  { %5385 = vmatmul.mubr.msk.f32.vlgmr.msra.gmra.mxu0 %vm219_vm1, %v6801_v45  ;;  %5440 = vmatmul.mubr.msk.f32.vlgmr.msra.gmra.mxu1 %vm219_vm1, %v6801_v45 }
 0x5c7   :  { %5399 = vmatpush3.msra.mxu0 %v6474_v25  ;;  %5406 = vmatprep.mubr.msk.f32.mxu0 %vm6146_vm0, %v6145_v0 }
 0x5c8   :  { %5400 = vmatprep.subr.mxu0 %v6145_v0  ;;  %5454 = vmatpush3.msra.mxu1 %v6446_v17 }
 0x5c9   :  { %5401 = vmatpush3.msra.mxu0 %v6483_v27  ;;  %5455 = vmatprep.subr.mxu1 %v6145_v0 }
 0x5ca   :  { %5402 = vmatprep.subr.mxu0 %v6145_v0  ;;  %5456 = vmatpush3.msra.mxu1 %v6452_v19 }
 0x5cb   :  { %5403 = vmatpush3.msra.mxu0 %v6491_v30  ;;  %5457 = vmatprep.subr.mxu1 %v6145_v0 }
 0x5cc   :  { %5404 = vmatprep.subr.mxu0 %v6145_v0  ;;  %5458 = vmatpush3.msra.mxu1 %v6458_v22 }
 0x5cd   :  { %5405 = vmatpush3.msra.mxu0 %v6499_v32  ;;  %5459 = vmatprep.subr.mxu1 %v6145_v0 }
 0x5ce   :  { %5407 = vmatmul.mubr.msk.f32.vlgmr.msra.gmra.mxu0 %vm219_vm1, %v6801_v45  ;;  %5420 = vmatprep.subr.mxu0 %v6145_v0 }
 0x5cf   :  { %5421 = vmatpush3.msra.mxu0 %v6515_v36  ;;  %5428 = vmatprep.mubr.msk.f32.mxu0 %vm6146_vm0, %v6145_v0 }
 0x5d0   :  { %5422 = vmatprep.subr.mxu0 %v6145_v0  ;;  %5460 = vmatpush3.msra.mxu1 %v6466_v24 }
 0x5d1   :  { %5423 = vmatpush3.msra.mxu0 %v6524_v38  ;;  %5461 = vmatprep.mubr.msk.f32.mxu1 %vm6146_vm0, %v6145_v0 }
 0x5d2   :  { %5424 = vmatprep.subr.mxu0 %v6145_v0  ;;  %5475 = vmatprep.subr.mxu1 %v6145_v0 }
 0x5d3   :  { %5425 = vmatpush3.msra.mxu0 %v6532_v41  ;;  %5462 = vmatmul.mubr.msk.f32.vlgmr.msra.gmra.mxu1 %vm219_vm1, %v6433_v40 }
 0x5d4   :  { %5426 = vmatprep.subr.mxu0 %v6145_v0  ;;  %5476 = vmatpush3.msra.mxu1 %v6476_v26 }
 0x5d5   :  { %5427 = vmatpush3.msra.mxu0 %v6542_v43  ;;  %5477 = vmatprep.subr.mxu1 %v6145_v0 }
 0x5d6   :  { %5429 = vmatmul.mubr.msk.f32.vlgmr.msra.gmra.mxu0 %vm219_vm1, %v6427_v33  ;;  %5478 = vmatpush3.msra.mxu1 %v6485_v29 }
 0x5d7   :  { %5479 = vmatprep.subr.mxu1 %v6145_v0  ;;  %5442 = vmatprep.subr.mxu0 %v6145_v0 }
 0x5d8   :  { %5480 = vmatpush3.msra.mxu1 %v6493_v31  ;;  %5443 = vmatpush3.msra.mxu0 %v6444_v15 }
 0x5d9   :  { %5481 = vmatprep.subr.mxu1 %v6145_v0  ;;  %5483 = vmatprep.mubr.msk.f32.mxu1 %vm6146_vm0, %v6145_v0 }
 0x5da   :  { %5482 = vmatpush3.msra.mxu1 %v6503_v34  ;;  %5444 = vmatprep.subr.mxu0 %v6145_v0 }
 0x5db   :  { %5497 = vmatprep.subr.mxu1 %v6145_v0  ;;  %5484 = vmatmul.mubr.msk.f32.vlgmr.msra.gmra.mxu1 %vm219_vm1, %v6433_v40 }
 0x5dc   :  { %5498 = vmatpush3.msra.mxu1 %v6513_v35  ;;  %5445 = vmatpush3.msra.mxu0 %v6448_v18 }
 0x5dd   :  { %5499 = vmatprep.subr.mxu1 %v6145_v0  ;;  %5446 = vmatprep.subr.mxu0 %v6145_v0 }
 0x5de   :  { %5500 = vmatpush3.msra.mxu1 %v6522_v37  ;;  %5447 = vmatpush3.msra.mxu0 %v6456_v20 }
 0x5df   :  { %5501 = vmatprep.subr.mxu1 %v6145_v0  ;;  %5448 = vmatprep.subr.mxu0 %v6145_v0 }
 0x5e0   :  { %5502 = vmatpush3.msra.mxu1 %v6530_v39  ;;  %5449 = vmatpush3.msra.mxu0 %v6464_v23 }
 0x5e1   :  { %5503 = vmatprep.subr.mxu1 %v6145_v0  ;;  %5450 = vmatprep.mubr.msk.f32.mxu0 %vm6146_vm0, %v6145_v0 }
 0x5e2   :  { %5464 = vmatprep.subr.mxu0 %v6145_v0  ;;  %5504 = vmatpush3.msra.mxu1 %v6538_v42 }
 0x5e3   :  { %5505 = vmatprep.mubr.msk.f32.mxu1 %vm6146_vm0, %v6145_v0  ;;  %5519 = vmatprep.subr.mxu1 %v6145_v0 }
 0x686   :  { %v2368_v33 = vpop.f32.mrf.mxu0  ;;  %v2740_v40 = vpop.f32.mrf.mxu1 }
 0x687   :  { %v2442_v18 = vadd.f32 %v6794_v58, %v2368_v33  ;;  %v2741_v61 = vadd.f32 %v6612_v7, %v2740_v40 }
 0x688   :  { %v5386_v15 = vpop.f32.mrf.mxu0  ;;  %v5441_v17 = vpop.f32.mrf.mxu1 }
 0x689   :  { %v2445_v20 = vadd.f32 %v6628_v57, %v2442_v18 }
 0x68b   :  { %v2446_v26 = vsub.f32 0.0, %v2445_v20 }
 0x68d   :  { %v2447_v48 = vmul.f32 1.442695, %v2446_v26 }
 0x68e   :  { %v2523_v19 = vpop.f32.mrf.mxu0 }
 0x68f   :  { %v2594_v22 = vadd.f32 %v6796_v49, %v2523_v19 }
 0x690   :  { %v5408_v23 = vpop.f32.mrf.mxu0 }
 0x691   :  { %v2597_v24 = vadd.f32 %v6606_v56, %v2594_v22 }
 0x693   :  { %v2598_v29 = vsub.f32 0.0, %v2597_v24  ;;  %v6879_v31 = vpop.f32.mrf.mxu1 }
 0x695   :  { %v2599_v14 = vmul.f32 1.442695, %v2598_v29  ;;  %v5463_v9 = vpop.f32.mrf.mxu1 }
 0x696   :  { %v2670_v47 = vpop.f32.mrf.mxu0 }
 0x697   :  { %5795 = vpow2.f32 %v2599_v14  ;;  %v2671_v54 = vadd.f32 %v6617_v8, %v2670_v47 }
 0x698   :  { %v5430_v50 = vpop.f32.mrf.mxu0  ;;  %5797 = vpow2.f32 %v2447_v48 }
 0x69b   :  { %v6881_v51 = vpop.f32.mrf.mxu1 }
 0x69d   :  { %v5485_v53 = vpop.f32.mrf.mxu1 }
 0x6a4   :  { %v5796_v55 = vpop.eup %5795 }
 0x6a5   :  { %v2601_v58 = vadd.f32 1.0, %v5796_v55  ;;  %v5798_v59 = vpop.eup %5797  ;;  %v2906_v55 = vpop.permute.xlu1 %2905 }
 0x6a6   :  { %v2449_v60 = vadd.f32 1.0, %v5798_v59 }
 0x6a7   :  { %5799 = vrcp.f32 %v2601_v58 }
 0x6a8   :  { %5801 = vrcp.f32 %v2449_v60 }
 0x6b4   :  { %v5800_v62 = vpop.eup %5799 }
 0x6b5   :  { %v2744_v49 = vmul.f32 %v5800_v62, %v2741_v61  ;;  %v5802_v1 = vpop.eup %5801 }
 0x6b6   :  { %v2456_v46 = vmul.f32 %v5802_v1, %v2454_v2  ;;  %v7026_v1 = vld [vmem:[#allocation14 + $0x18] sm:$0xff]  ;;  %v7033_v2 = vld [vmem:[#allocation14 + $0x10] sm:$0xff] }
 0x6b7   :  { %v2745_v63 = vadd.f32 %v2744_v49, %v2671_v54  ;;  %v7013_v49 = vld [vmem:[#allocation13 + $0x8] sm:$0xff] }
 0x6b8   :  { %v2747_v3 = vsub.f32 1.0, %v2456_v46 }
 0x6b9   :  { %5803 = vtanh.f32 %v2745_v63  ;;  %v7019_v63 = vld [vmem:[#allocation13] sm:$0xff] }
 0x6ba   :  { %v2748_v5 = vmul.f32 %v2747_v3, %v6801_v45  ;;  %v7043_v3 = vld [vmem:[#allocation5 + $0x30] sm:$0xff] }
 0x6c6   :  { %v5804_v4 = vpop.eup %5803 }
 0x6c7   :  { %v2749_v6 = vmul.f32 %v5804_v4, %v2456_v46  ;;  %v7040_v46 = vld [vmem:[#allocation14 + $0x8] sm:$0xff]  ;;  %v7049_v4 = vld [vmem:[#allocation14] sm:$0xff] }
 0x6c9   :  { %v6886_v21 = vadd.f32 %v2749_v6, %v2748_v5  ;;  %v7063_v5 = vld [vmem:[#allocation11] sm:$0xff]  ;;  %v7070_v6 = vld [vmem:[#allocation16 + $0x18] sm:$0xff] }
 0x6cb   :  { %5451 = vmatmul.mubr.msk.f32.vlgmr.msra.gmra.mxu0 %vm219_vm1, %v6886_v21  ;;  %5506 = vmatmul.mubr.msk.f32.vlgmr.msra.gmra.mxu1 %vm219_vm1, %v6886_v21 }
 0x6cc   :  { %5465 = vmatpush3.msra.mxu0 %v6474_v25  ;;  %5472 = vmatprep.mubr.msk.f32.mxu0 %vm6146_vm0, %v6145_v0  ;;  %v6908_v25 = vld [vmem:[#allocation8 + $0x8] sm:$0xff] }
 0x6cd   :  { %5466 = vmatprep.subr.mxu0 %v6145_v0  ;;  %5520 = vmatpush3.msra.mxu1 %v6896_v10 }
 0x6ce   :  { %5467 = vmatpush3.msra.mxu0 %v6483_v27  ;;  %5521 = vmatprep.subr.mxu1 %v6145_v0  ;;  %v6920_v27 = vld [vmem:[#allocation8] sm:$0xff] }
 0x6cf   :  { %5468 = vmatprep.subr.mxu0 %v6145_v0  ;;  %5522 = vmatpush3.msra.mxu1 %v6902_v11 }
 0x6d0   :  { %5469 = vmatpush3.msra.mxu0 %v6491_v30  ;;  %5523 = vmatprep.subr.mxu1 %v6145_v0  ;;  %v6929_v30 = vld [vmem:[#allocation5 + $0x28] sm:$0xff] }
 0x6d1   :  { %5470 = vmatprep.subr.mxu0 %v6145_v0  ;;  %5524 = vmatpush3.msra.mxu1 %v6908_v25 }
 0x6d2   :  { %5471 = vmatpush3.msra.mxu0 %v6499_v32  ;;  %5525 = vmatprep.subr.mxu1 %v6145_v0  ;;  %v6934_v32 = vld [vmem:[#allocation11 + $0x18] sm:$0xff] }
 0x6d3   :  { %5473 = vmatmul.mubr.msk.f32.vlgmr.msra.gmra.mxu0 %vm219_vm1, %v6886_v21  ;;  %5486 = vmatprep.subr.mxu0 %v6145_v0 }
 0x6d4   :  { %5487 = vmatpush3.msra.mxu0 %v6515_v36  ;;  %5494 = vmatprep.mubr.msk.f32.mxu0 %vm6146_vm0, %v6145_v0  ;;  %v5851_v36 = vld [vmem:[#allocation5 + $0x20] sm:$0xff] }
 0x6d5   :  { %5488 = vmatprep.subr.mxu0 %v6145_v0  ;;  %5526 = vmatpush3.msra.mxu1 %v6920_v27 }
 0x6d6   :  { %5489 = vmatpush3.msra.mxu0 %v6524_v38  ;;  %5527 = vmatprep.mubr.msk.f32.mxu1 %vm6146_vm0, %v6145_v0  ;;  %v6940_v38 = vld [vmem:[#allocation11 + $0x10] sm:$0xff] }
 0x6d7   :  { %5490 = vmatprep.subr.mxu0 %v6145_v0  ;;  %5541 = vmatprep.subr.mxu1 %v6145_v0 }
 0x6d8   :  { %5491 = vmatpush3.msra.mxu0 %v6532_v41  ;;  %5528 = vmatmul.mubr.msk.f32.vlgmr.msra.gmra.mxu1 %vm219_vm1, %v6929_v30  ;;  %v6945_v41 = vld [vmem:[#allocation11 + $0x8] sm:$0xff] }
 0x6d9   :  { %5492 = vmatprep.subr.mxu0 %v6145_v0  ;;  %5542 = vmatpush3.msra.mxu1 %v6934_v32 }
 0x6da   :  { %5493 = vmatpush3.msra.mxu0 %v6542_v43  ;;  %5543 = vmatprep.subr.mxu1 %v6145_v0  ;;  %v6960_v43 = vld [vmem:[#allocation10 + $0x10] sm:$0xff] }
 0x6db   :  { %5495 = vmatmul.mubr.msk.f32.vlgmr.msra.gmra.mxu0 %vm219_vm1, %v5851_v36  ;;  %5544 = vmatpush3.msra.mxu1 %v6940_v38  ;;  %v7090_v36 = vld [vmem:[#allocation16] sm:$0xff] }
 0x6dc   :  { %5545 = vmatprep.subr.mxu1 %v6145_v0  ;;  %5508 = vmatprep.subr.mxu0 %v6145_v0 }
 0x6dd   :  { %5546 = vmatpush3.msra.mxu1 %v6945_v41  ;;  %5509 = vmatpush3.msra.mxu0 %v6948_v12 }
 0x6de   :  { %5547 = vmatprep.subr.mxu1 %v6145_v0  ;;  %5549 = vmatprep.mubr.msk.f32.mxu1 %vm6146_vm0, %v6145_v0 }
 0x6df   :  { %5548 = vmatpush3.msra.mxu1 %v6503_v34  ;;  %5510 = vmatprep.subr.mxu0 %v6145_v0  ;;  %v6966_v34 = vld [vmem:[#allocation10 + $0x8] sm:$0xff] }
 0x6e0   :  { %5563 = vmatprep.subr.mxu1 %v6145_v0  ;;  %5550 = vmatmul.mubr.msk.f32.vlgmr.msra.gmra.mxu1 %vm219_vm1, %v6929_v30 }
 0x6e1   :  { %5564 = vmatpush3.msra.mxu1 %v6513_v35  ;;  %5511 = vmatpush3.msra.mxu0 %v6960_v43  ;;  %v6972_v35 = vld [vmem:[#allocation10] sm:$0xff] }
 0x6e2   :  { %5565 = vmatprep.subr.mxu1 %v6145_v0  ;;  %5512 = vmatprep.subr.mxu0 %v6145_v0 }
 0x6e3   :  { %5566 = vmatpush3.msra.mxu1 %v6522_v37  ;;  %5513 = vmatpush3.msra.mxu0 %v6966_v34 }
 0x6e4   :  { %5567 = vmatprep.subr.mxu1 %v6145_v0  ;;  %5514 = vmatprep.subr.mxu0 %v6145_v0 }
 0x6e5   :  { %5568 = vmatpush3.msra.mxu1 %v6530_v39  ;;  %5515 = vmatpush3.msra.mxu0 %v6972_v35 }
 0x6e6   :  { %5569 = vmatprep.subr.mxu1 %v6145_v0  ;;  %5516 = vmatprep.mubr.msk.f32.mxu0 %vm6146_vm0, %v6145_v0 }
 0x6e7   :  { %5530 = vmatprep.subr.mxu0 %v6145_v0  ;;  %5570 = vmatpush3.msra.mxu1 %v6538_v42 }
 0x6e8   :  { %5571 = vmatprep.mubr.msk.f32.mxu1 %vm6146_vm0, %v6145_v0  ;;  %5585 = vmatprep.subr.mxu1 %v6145_v0 }
 0x78b   :  { %v2820_v37 = vpop.f32.mrf.mxu0  ;;  %v3192_v39 = vpop.f32.mrf.mxu1 }
 0x78c   :  { %v2894_v52 = vadd.f32 %v6879_v31, %v2820_v37 }
 0x78d   :  { %v5452_v13 = vpop.f32.mrf.mxu0  ;;  %v5507_v28 = vpop.f32.mrf.mxu1 }
 0x78e   :  { %v2897_v44 = vadd.f32 %v6628_v57, %v2894_v52 }
 0x790   :  { %v2898_v42 = vsub.f32 0.0, %v2897_v44 }
 0x792   :  { %v2899_v22 = vmul.f32 1.442695, %v2898_v42 }
 0x793   :  { %v2975_v16 = vpop.f32.mrf.mxu0 }
 0x794   :  { %v3046_v45 = vadd.f32 %v6881_v51, %v2975_v16 }
 0x795   :  { %v5474_v33 = vpop.f32.mrf.mxu0 }
 0x796   :  { %v3049_v40 = vadd.f32 %v6606_v56, %v3046_v45  ;;  %v3193_v56 = vadd.f32 %v6612_v7, %v3192_v39  ;;  %v7000_v7 = vld [vmem:[#allocation13 + $0x18] sm:$0xff] }
 0x798   :  { %v3050_v15 = vsub.f32 0.0, %v3049_v40  ;;  %v6987_v17 = vpop.f32.mrf.mxu1  ;;  %v7102_v40 = vld [vmem:[%s7279_s9] ss:$0 sm:$0xff] }
 0x79a   :  { %v3051_v18 = vmul.f32 1.442695, %v3050_v15  ;;  %v5529_v19 = vpop.f32.mrf.mxu1 }
 0x79b   :  { %v3122_v20 = vpop.f32.mrf.mxu0 }
 0x79c   :  { %5805 = vpow2.f32 %v3051_v18  ;;  %v3123_v47 = vadd.f32 %v6617_v8, %v3122_v20  ;;  %v7007_v8 = vld [vmem:[#allocation13 + $0x10] sm:$0xff] }
 0x79d   :  { %v5496_v23 = vpop.f32.mrf.mxu0  ;;  %5807 = vpow2.f32 %v2899_v22 }
 0x7a0   :  { %v6989_v24 = vpop.f32.mrf.mxu1 }
 0x7a2   :  { %v5551_v26 = vpop.f32.mrf.mxu1 }
 0x7a9   :  { %v5806_v29 = vpop.eup %5805 }
 0x7aa   :  { %v3053_v31 = vadd.f32 1.0, %v5806_v29  ;;  %v5808_v14 = vpop.eup %5807 }
 0x7ab   :  { %v2901_v9 = vadd.f32 1.0, %v5808_v14 }
 0x7ac   :  { %5809 = vrcp.f32 %v3053_v31 }
 0x7ad   :  { %5811 = vrcp.f32 %v2901_v9 }
 0x7b9   :  { %v5810_v48 = vpop.eup %5809 }
 0x7ba   :  { %v3196_v50 = vmul.f32 %v5810_v48, %v3193_v56  ;;  %v5812_v53 = vpop.eup %5811  ;;  %v7112_v56 = vld [vmem:[%s7283_s13] ss:$0 sm:$0xff] }
 0x7bb   :  { %v2908_v58 = vmul.f32 %v5812_v53, %v2906_v55  ;;  %v7118_v48 = vld [vmem:[%s7281_s11] ss:$0 sm:$0xff] }
 0x7bc   :  { %v3197_v51 = vadd.f32 %v3196_v50, %v3123_v47 }
 0x7bd   :  { %v3199_v59 = vsub.f32 1.0, %v2908_v58 }
 0x7be   :  { %5813 = vtanh.f32 %v3197_v51 }
 0x7bf   :  { %v3200_v61 = vmul.f32 %v3199_v59, %v6886_v21  ;;  %v7076_v21 = vld [vmem:[#allocation16 + $0x10] sm:$0xff]  ;;  %v3358_v59 = vpop.permute.xlu1 %3357 }
 0x7cb   :  { %v5814_v60 = vpop.eup %5813 }
 0x7cc   :  { %v3201_v54 = vmul.f32 %v5814_v60, %v2908_v58 }
 0x7ce   :  { %v6994_v62 = vadd.f32 %v3201_v54, %v3200_v61 }
 0x7d0   :  { %5517 = vmatmul.mubr.msk.f32.vlgmr.msra.gmra.mxu0 %vm219_vm1, %v6994_v62  ;;  %5572 = vmatmul.mubr.msk.f32.vlgmr.msra.gmra.mxu1 %vm219_vm1, %v6994_v62 }
 0x7d1   :  { %5531 = vmatpush3.msra.mxu0 %v7000_v7  ;;  %5538 = vmatprep.mubr.msk.f32.mxu0 %vm6146_vm0, %v6145_v0 }
 0x7d2   :  { %5532 = vmatprep.subr.mxu0 %v6145_v0  ;;  %5586 = vmatpush3.msra.mxu1 %v6896_v10 }
 0x7d3   :  { %5533 = vmatpush3.msra.mxu0 %v7007_v8  ;;  %5587 = vmatprep.subr.mxu1 %v6145_v0 }
 0x7d4   :  { %5534 = vmatprep.subr.mxu0 %v6145_v0  ;;  %5588 = vmatpush3.msra.mxu1 %v6902_v11 }
 0x7d5   :  { %5535 = vmatpush3.msra.mxu0 %v7013_v49  ;;  %5589 = vmatprep.subr.mxu1 %v6145_v0 }
 0x7d6   :  { %5536 = vmatprep.subr.mxu0 %v6145_v0  ;;  %5590 = vmatpush3.msra.mxu1 %v6908_v25 }
 0x7d7   :  { %5537 = vmatpush3.msra.mxu0 %v7019_v63  ;;  %5591 = vmatprep.subr.mxu1 %v6145_v0 }
 0x7d8   :  { %5539 = vmatmul.mubr.msk.f32.vlgmr.msra.gmra.mxu0 %vm219_vm1, %v6994_v62  ;;  %5552 = vmatprep.subr.mxu0 %v6145_v0 }
 0x7d9   :  { %5553 = vmatpush3.msra.mxu0 %v7026_v1  ;;  %5560 = vmatprep.mubr.msk.f32.mxu0 %vm6146_vm0, %v6145_v0 }
 0x7da   :  { %5554 = vmatprep.subr.mxu0 %v6145_v0  ;;  %5592 = vmatpush3.msra.mxu1 %v6920_v27 }
 0x7db   :  { %5555 = vmatpush3.msra.mxu0 %v7033_v2  ;;  %5593 = vmatprep.mubr.msk.f32.mxu1 %vm6146_vm0, %v6145_v0 }
 0x7dc   :  { %5556 = vmatprep.subr.mxu0 %v6145_v0  ;;  %5607 = vmatprep.subr.mxu1 %v6145_v0 }
 0x7dd   :  { %5557 = vmatpush3.msra.mxu0 %v7040_v46  ;;  %5594 = vmatmul.mubr.msk.f32.vlgmr.msra.gmra.mxu1 %vm219_vm1, %v7043_v3 }
 0x7de   :  { %5558 = vmatprep.subr.mxu0 %v6145_v0  ;;  %5608 = vmatpush3.msra.mxu1 %v6934_v32 }
 0x7df   :  { %5559 = vmatpush3.msra.mxu0 %v7049_v4  ;;  %5609 = vmatprep.subr.mxu1 %v6145_v0 }
 0x7e0   :  { %5561 = vmatmul.mubr.msk.f32.vlgmr.msra.gmra.mxu0 %vm219_vm1, %v6929_v30  ;;  %5610 = vmatpush3.msra.mxu1 %v6940_v38  ;;  %v7082_v30 = vld [vmem:[#allocation16 + $0x8] sm:$0xff] }
 0x7e1   :  { %5611 = vmatprep.subr.mxu1 %v6145_v0  ;;  %5574 = vmatprep.subr.mxu0 %v6145_v0 }
 0x7e2   :  { %5612 = vmatpush3.msra.mxu1 %v6945_v41  ;;  %5575 = vmatpush3.msra.mxu0 %v6948_v12 }
 0x7e3   :  { %5613 = vmatprep.subr.mxu1 %v6145_v0  ;;  %5615 = vmatprep.mubr.msk.f32.mxu1 %vm6146_vm0, %v6145_v0 }
 0x7e4   :  { %5614 = vmatpush3.msra.mxu1 %v7063_v5  ;;  %5576 = vmatprep.subr.mxu0 %v6145_v0 }
 0x7e5   :  { %5629 = vmatprep.subr.mxu1 %v6145_v0  ;;  %5616 = vmatmul.mubr.msk.f32.vlgmr.msra.gmra.mxu1 %vm219_vm1, %v7043_v3 }
 0x7e6   :  { %5630 = vmatpush3.msra.mxu1 %v7070_v6  ;;  %5577 = vmatpush3.msra.mxu0 %v6960_v43 }
 0x7e7   :  { %5631 = vmatprep.subr.mxu1 %v6145_v0  ;;  %5578 = vmatprep.subr.mxu0 %v6145_v0 }
 0x7e8   :  { %5632 = vmatpush3.msra.mxu1 %v7076_v21  ;;  %5579 = vmatpush3.msra.mxu0 %v6966_v34 }
 0x7e9   :  { %5633 = vmatprep.subr.mxu1 %v6145_v0  ;;  %5580 = vmatprep.subr.mxu0 %v6145_v0 }
 0x7ea   :  { %5634 = vmatpush3.msra.mxu1 %v7082_v30  ;;  %5581 = vmatpush3.msra.mxu0 %v6972_v35 }
 0x7eb   :  { %5635 = vmatprep.subr.mxu1 %v6145_v0  ;;  %5582 = vmatprep.mubr.msk.f32.mxu0 %vm6146_vm0, %v6145_v0 }
 0x7ec   :  { %5596 = vmatprep.subr.mxu0 %v6145_v0  ;;  %5636 = vmatpush3.msra.mxu1 %v7090_v36 }
 0x7ed   :  { %5637 = vmatprep.mubr.msk.f32.mxu1 %vm6146_vm0, %v6145_v0  ;;  %5651 = vmatprep.subr.mxu1 %v6145_v0 }
 0x890   :  { %v3272_v37 = vpop.f32.mrf.mxu0  ;;  %v3644_v39 = vpop.f32.mrf.mxu1 }
 0x891   :  { %v3346_v52 = vadd.f32 %v6987_v17, %v3272_v37  ;;  %v3645_v47 = vadd.f32 %v7112_v56, %v3644_v39 }
 0x892   :  { %v5518_v13 = vpop.f32.mrf.mxu0  ;;  %v5573_v28 = vpop.f32.mrf.mxu1 }
 0x893   :  { %v3349_v44 = vadd.f32 %v6628_v57, %v3346_v52 }
 0x895   :  { %v3350_v15 = vsub.f32 0.0, %v3349_v44 }
 0x897   :  { %v3351_v23 = vmul.f32 1.442695, %v3350_v15 }
 0x898   :  { %v3427_v16 = vpop.f32.mrf.mxu0 }
 0x899   :  { %v3498_v45 = vadd.f32 %v6989_v24, %v3427_v16 }
 0x89a   :  { %v5540_v33 = vpop.f32.mrf.mxu0 }
 0x89b   :  { %v3501_v42 = vadd.f32 %v7102_v40, %v3498_v45 }
 0x89d   :  { %v3502_v18 = vsub.f32 0.0, %v3501_v42  ;;  %v7105_v19 = vpop.f32.mrf.mxu1 }
 0x89f   :  { %v3503_v20 = vmul.f32 1.442695, %v3502_v18  ;;  %v5595_v22 = vpop.f32.mrf.mxu1 }
 0x8a0   :  { %v3574_v17 = vpop.f32.mrf.mxu0 }
 0x8a1   :  { %5815 = vpow2.f32 %v3503_v20  ;;  %v3575_v50 = vadd.f32 %v7118_v48, %v3574_v17 }
 0x8a2   :  { %v5562_v57 = vpop.f32.mrf.mxu0  ;;  %5817 = vpow2.f32 %v3351_v23 }
 0x8a3   :  { %v3810_v57 = vpop.permute.xlu1 %3809 }
 0x8a5   :  { %v7107_v24 = vpop.f32.mrf.mxu1 }
 0x8a7   :  { %v5617_v26 = vpop.f32.mrf.mxu1 }
 0x8ae   :  { %v5816_v29 = vpop.eup %5815 }
 0x8af   :  { %v3505_v31 = vadd.f32 1.0, %v5816_v29  ;;  %v5818_v14 = vpop.eup %5817 }
 0x8b0   :  { %v3353_v9 = vadd.f32 1.0, %v5818_v14 }
 0x8b1   :  { %5819 = vrcp.f32 %v3505_v31 }
 0x8b2   :  { %5821 = vrcp.f32 %v3353_v9 }
 0x8be   :  { %v5820_v51 = vpop.eup %5819 }
 0x8bf   :  { %v3648_v53 = vmul.f32 %v5820_v51, %v3645_v47  ;;  %v5822_v58 = vpop.eup %5821  ;;  %v5877_v47 = vld [vmem:[#allocation2] sm:$0xff] }
 0x8c0   :  { %v3360_v60 = vmul.f32 %v5822_v58, %v3358_v59 }
 0x8c1   :  { %v3649_v55 = vadd.f32 %v3648_v53, %v3575_v50 }
 0x8c2   :  { %v3651_v61 = vsub.f32 1.0, %v3360_v60 }
 0x8c3   :  { %5823 = vtanh.f32 %v3649_v55 }
 0x8c4   :  { %v3652_v37 = vmul.f32 %v3651_v61, %v6994_v62 }
 0x8d0   :  { %v5824_v54 = vpop.eup %5823 }
 0x8d1   :  { %v3653_v13 = vmul.f32 %v5824_v54, %v3360_v60 }
 0x8d3   :  { %v7122_v39 = vadd.f32 %v3653_v13, %v3652_v37 }
 0x8d5   :  { %5583 = vmatmul.mubr.msk.f32.vlgmr.msra.gmra.mxu0 %vm219_vm1, %v7122_v39  ;;  %5638 = vmatmul.mubr.msk.f32.vlgmr.msra.gmra.mxu1 %vm219_vm1, %v7122_v39 }
 0x8d6   :  { %5597 = vmatpush3.msra.mxu0 %v7000_v7  ;;  %5604 = vmatprep.mubr.msk.f32.mxu0 %vm6146_vm0, %v6145_v0 }
 0x8d7   :  { %5598 = vmatprep.subr.mxu0 %v6145_v0  ;;  %5652 = vmatpush3.msra.mxu1 %v6896_v10  ;;  %v7157_v10 = vld [vmem:[#allocation5 + $0x38] sm:$0xff] }
 0x8d8   :  { %5599 = vmatpush3.msra.mxu0 %v7007_v8  ;;  %5653 = vmatprep.subr.mxu1 %v6145_v0 }
 0x8d9   :  { %5600 = vmatprep.subr.mxu0 %v6145_v0  ;;  %5654 = vmatpush3.msra.mxu1 %v6902_v11 }
 0x8da   :  { %5601 = vmatpush3.msra.mxu0 %v7013_v49  ;;  %5655 = vmatprep.subr.mxu1 %v6145_v0 }
 0x8db   :  { %5602 = vmatprep.subr.mxu0 %v6145_v0  ;;  %5656 = vmatpush3.msra.mxu1 %v6908_v25 }
 0x8dc   :  { %5603 = vmatpush3.msra.mxu0 %v7019_v63  ;;  %5657 = vmatprep.subr.mxu1 %v6145_v0 }
 0x8dd   :  { %5605 = vmatmul.mubr.msk.f32.vlgmr.msra.gmra.mxu0 %vm219_vm1, %v7122_v39  ;;  %5618 = vmatprep.subr.mxu0 %v6145_v0 }
 0x8de   :  { %5619 = vmatpush3.msra.mxu0 %v7026_v1  ;;  %5626 = vmatprep.mubr.msk.f32.mxu0 %vm6146_vm0, %v6145_v0 }
 0x8df   :  { %5620 = vmatprep.subr.mxu0 %v6145_v0  ;;  %5658 = vmatpush3.msra.mxu1 %v6920_v27 }
 0x8e0   :  { %5621 = vmatpush3.msra.mxu0 %v7033_v2  ;;  %5659 = vmatprep.mubr.msk.f32.mxu1 %vm6146_vm0, %v6145_v0 }
 0x8e1   :  { %5622 = vmatprep.subr.mxu0 %v6145_v0  ;;  %5673 = vmatprep.subr.mxu1 %v6145_v0 }
 0x8e2   :  { %5623 = vmatpush3.msra.mxu0 %v7040_v46  ;;  %5660 = vmatmul.mubr.msk.f32.vlgmr.msra.gmra.mxu1 %vm219_vm1, %v7157_v10 }
 0x8e3   :  { %5624 = vmatprep.subr.mxu0 %v6145_v0  ;;  %5674 = vmatpush3.msra.mxu1 %v6934_v32 }
 0x8e4   :  { %5625 = vmatpush3.msra.mxu0 %v7049_v4  ;;  %5675 = vmatprep.subr.mxu1 %v6145_v0 }
 0x8e5   :  { %5627 = vmatmul.mubr.msk.f32.vlgmr.msra.gmra.mxu0 %vm219_vm1, %v7043_v3  ;;  %5676 = vmatpush3.msra.mxu1 %v6940_v38 }
 0x8e6   :  { %5677 = vmatprep.subr.mxu1 %v6145_v0  ;;  %5640 = vmatprep.subr.mxu0 %v6145_v0 }
 0x8e7   :  { %5678 = vmatpush3.msra.mxu1 %v6945_v41  ;;  %5641 = vmatpush3.msra.mxu0 %v6948_v12  ;;  %v7202_v12 = vld [vmem:[%s7276_s6] ss:$0 sm:$0xff] }
 0x8e8   :  { %5679 = vmatprep.subr.mxu1 %v6145_v0  ;;  %5681 = vmatprep.mubr.msk.f32.mxu1 %vm6146_vm0, %v6145_v0 }
 0x8e9   :  { %5680 = vmatpush3.msra.mxu1 %v7063_v5  ;;  %5642 = vmatprep.subr.mxu0 %v6145_v0 }
 0x8ea   :  { %5695 = vmatprep.subr.mxu1 %v6145_v0  ;;  %5682 = vmatmul.mubr.msk.f32.vlgmr.msra.gmra.mxu1 %vm219_vm1, %v7157_v10 }
 0x8eb   :  { %5696 = vmatpush3.msra.mxu1 %v7070_v6  ;;  %5643 = vmatpush3.msra.mxu0 %v6960_v43 }
 0x8ec   :  { %5697 = vmatprep.subr.mxu1 %v6145_v0  ;;  %5644 = vmatprep.subr.mxu0 %v6145_v0 }
 0x8ed   :  { %5698 = vmatpush3.msra.mxu1 %v7076_v21  ;;  %5645 = vmatpush3.msra.mxu0 %v6966_v34 }
 0x8ee   :  { %5699 = vmatprep.subr.mxu1 %v6145_v0  ;;  %5646 = vmatprep.subr.mxu0 %v6145_v0 }
 0x8ef   :  { %5700 = vmatpush3.msra.mxu1 %v7082_v30  ;;  %5647 = vmatpush3.msra.mxu0 %v6972_v35 }
 0x8f0   :  { %5701 = vmatprep.subr.mxu1 %v6145_v0  ;;  %5648 = vmatprep.mubr.msk.f32.mxu0 %vm6146_vm0, %v6145_v0 }
 0x8f1   :  { %5662 = vmatprep.subr.mxu0 %v6145_v0  ;;  %5702 = vmatpush3.msra.mxu1 %v7090_v36 }
 0x8f2   :  { %5703 = vmatprep.mubr.msk.f32.mxu1 %vm6146_vm0, %v6145_v0  ;;  %5717 = vmatprep.subr.mxu1 %v6145_v0 }
 0x995   :  { %v3724_v11 = vpop.f32.mrf.mxu0  ;;  %v4096_v25 = vpop.f32.mrf.mxu1 }
 0x996   :  { %v3798_v38 = vadd.f32 %v7105_v19, %v3724_v11  ;;  %v4097_v18 = vadd.f32 %v7112_v56, %v4096_v25 }
 0x997   :  { %v5584_v27 = vpop.f32.mrf.mxu0  ;;  %v5639_v32 = vpop.f32.mrf.mxu1 }
 0x998   :  { %v3801_v43 = vadd.f32 %v7202_v12, %v3798_v38 }
 0x99a   :  { %v3802_v3 = vsub.f32 0.0, %v3801_v43 }
 0x99c   :  { %v3803_v28 = vmul.f32 1.442695, %v3802_v3  ;;  %v4262_v3 = vpop.permute.xlu1 %4261 }
 0x99d   :  { %v3879_v41 = vpop.f32.mrf.mxu0 }
 0x99e   :  { %v3950_v34 = vadd.f32 %v7107_v24, %v3879_v41 }
 0x99f   :  { %v5606_v35 = vpop.f32.mrf.mxu0 }
 0x9a0   :  { %v3953_v62 = vadd.f32 %v7102_v40, %v3950_v34 }
 0x9a2   :  { %v3954_v5 = vsub.f32 0.0, %v3953_v62  ;;  %v7207_v6 = vpop.f32.mrf.mxu1 }
 0x9a4   :  { %v3955_v21 = vmul.f32 1.442695, %v3954_v5  ;;  %v5661_v30 = vpop.f32.mrf.mxu1 }
 0x9a5   :  { %v4026_v36 = vpop.f32.mrf.mxu0 }
 0x9a6   :  { %5825 = vpow2.f32 %v3955_v21  ;;  %v4027_v19 = vadd.f32 %v7118_v48, %v4026_v36 }
 0x9a7   :  { %v5628_v52 = vpop.f32.mrf.mxu0  ;;  %5827 = vpow2.f32 %v3803_v28 }
 0x9aa   :  { %v7209_v16 = vpop.f32.mrf.mxu1 }
 0x9ac   :  { %v5683_v44 = vpop.f32.mrf.mxu1 }
 0x9b3   :  { %v5826_v45 = vpop.eup %5825 }
 0x9b4   :  { %v3957_v33 = vadd.f32 1.0, %v5826_v45  ;;  %v5828_v42 = vpop.eup %5827 }
 0x9b5   :  { %v3805_v15 = vadd.f32 1.0, %v5828_v42 }
 0x9b6   :  { %5829 = vrcp.f32 %v3957_v33 }
 0x9b7   :  { %5831 = vrcp.f32 %v3805_v15 }
 0x9c3   :  { %v5830_v20 = vpop.eup %5829 }
 0x9c4   :  { %v4100_v22 = vmul.f32 %v5830_v20, %v4097_v18  ;;  %v5832_v23 = vpop.eup %5831 }
 0x9c5   :  { %v3812_v24 = vmul.f32 %v5832_v23, %v3810_v57 }
 0x9c6   :  { %v4101_v17 = vadd.f32 %v4100_v22, %v4027_v19 }
 0x9c7   :  { %v4103_v26 = vsub.f32 1.0, %v3812_v24 }
 0x9c8   :  { %5833 = vtanh.f32 %v4101_v17 }
 0x9c9   :  { %v4104_v31 = vmul.f32 %v4103_v26, %v7122_v39 }
 0x9d5   :  { %v5834_v29 = vpop.eup %5833 }
 0x9d6   :  { %v4105_v14 = vmul.f32 %v5834_v29, %v3812_v24 }
 0x9d8   :  { %v7214_v9 = vadd.f32 %v4105_v14, %v4104_v31 }
 0x9da   :  { %5649 = vmatmul.mubr.msk.f32.vlgmr.msra.gmra.mxu0 %vm219_vm1, %v7214_v9  ;;  %5704 = vmatmul.mubr.msk.f32.vlgmr.msra.gmra.mxu1 %vm219_vm1, %v7214_v9 }
 0x9db   :  { %5663 = vmatpush3.msra.mxu0 %v7000_v7  ;;  %5670 = vmatprep.mubr.msk.f32.mxu0 %vm6146_vm0, %v6145_v0  ;;  %v4566_v7 = vld [vmem:[#allocation19 + $0x18] sm:$0xff] }
 0x9dc   :  { %5664 = vmatprep.subr.mxu0 %v6145_v0  ;;  %5725 = vmatprep.mubr.msk.f32.mxu1 %vm6146_vm0, %v6145_v0 }
 0x9dd   :  { %5665 = vmatpush3.msra.mxu0 %v7007_v8  ;;  %v4565_v8 = vld [vmem:[#allocation19 + $0x10] sm:$0xff] }
 0x9de   :  { %5666 = vmatprep.subr.mxu0 %v6145_v0 }
 0x9df   :  { %5667 = vmatpush3.msra.mxu0 %v7013_v49  ;;  %v4562_v49 = vld [vmem:[#allocation17 + $0x18] sm:$0xff] }
 0x9e0   :  { %5668 = vmatprep.subr.mxu0 %v6145_v0  ;;  %5718 = vmatpush3.msra.mxu1 %v4562_v49 }
 0x9e1   :  { %5669 = vmatpush3.msra.mxu0 %v7019_v63  ;;  %v4561_v63 = vld [vmem:[#allocation17 + $0x10] sm:$0xff]  ;;  %5719 = vmatprep.subr.mxu1 %v6145_v0 }
 0x9e2   :  { %5671 = vmatmul.mubr.msk.f32.vlgmr.msra.gmra.mxu0 %vm219_vm1, %v7214_v9  ;;  %5684 = vmatprep.subr.mxu0 %v6145_v0 }
 0x9e3   :  { %5685 = vmatpush3.msra.mxu0 %v7026_v1  ;;  %5692 = vmatprep.mubr.msk.f32.mxu0 %vm6146_vm0, %v6145_v0  ;;  %v4564_v1 = vld [vmem:[#allocation19 + $0x8] sm:$0xff] }
 0x9e4   :  { %5686 = vmatprep.subr.mxu0 %v6145_v0  ;;  %5720 = vmatpush3.msra.mxu1 %v4561_v63 }
 0x9e5   :  { %5687 = vmatpush3.msra.mxu0 %v7033_v2  ;;  %v4560_v2 = vld [vmem:[#allocation17 + $0x8] sm:$0xff]  ;;  %5721 = vmatprep.subr.mxu1 %v6145_v0 }
 0x9e6   :  { %5688 = vmatprep.subr.mxu0 %v6145_v0  ;;  %5722 = vmatpush3.msra.mxu1 %v4560_v2 }
 0x9e7   :  { %5689 = vmatpush3.msra.mxu0 %v7040_v46  ;;  %v4563_v46 = vld [vmem:[#allocation19] sm:$0xff]  ;;  %5723 = vmatprep.subr.mxu1 %v6145_v0 }
 0x9e8   :  { %5690 = vmatprep.subr.mxu0 %v6145_v0 }
 0x9e9   :  { %5691 = vmatpush3.msra.mxu0 %v7049_v4  ;;  %v4559_v4 = vld [vmem:[#allocation17] sm:$0xff] }
 0x9ea   :  { %5693 = vmatmul.mubr.msk.f32.vlgmr.msra.gmra.mxu0 %vm219_vm1, %v7157_v10  ;;  %5706 = vmatprep.subr.mxu0 %v6145_v0 }
 0x9eb   :  { %5714 = vmatprep.mubr.msk.f32.mxu0 %vm6146_vm0, %v6145_v0  ;;  %5707 = vmatpush3.msra.mxu0 %v4566_v7 }
 0x9ec   :  { %5708 = vmatprep.subr.mxu0 %v6145_v0  ;;  %5724 = vmatpush3.msra.mxu1 %v4559_v4 }
 0x9ed   :  { %5709 = vmatpush3.msra.mxu0 %v4565_v8 }
 0x9ee   :  { %5710 = vmatprep.subr.mxu0 %v6145_v0 }
 0x9ef   :  { %5711 = vmatpush3.msra.mxu0 %v4564_v1 }
 0x9f0   :  { %5712 = vmatprep.subr.mxu0 %v6145_v0 }
 0x9f1   :  { %5713 = vmatpush3.msra.mxu0 %v4563_v46 }
 0x9f2   :  { %5715 = vmatmul.mubr.msk.f32.vlgmr.msra.gmra.mxu0 %vm219_vm1, %v5877_v47 }
 0xa9a   :  { %v4176_v50 = vpop.f32.mrf.mxu0  ;;  %v4548_v51 = vpop.f32.mrf.mxu1 }
 0xa9b   :  { %v4250_v58 = vadd.f32 %v7207_v6, %v4176_v50 }
 0xa9c   :  { %v5650_v53 = vpop.f32.mrf.mxu0  ;;  %v5705_v55 = vpop.f32.mrf.mxu1 }
 0xa9d   :  { %v4253_v60 = vadd.f32 %v7202_v12, %v4250_v58  ;;  %v4549_v12 = vadd.f32 %v7112_v56, %v4548_v51 }
 0xa9f   :  { %v4254_v0 = vsub.f32 0.0, %v4253_v60 }
 0xaa1   :  { %v4255_v11 = vmul.f32 1.442695, %v4254_v0 }
 0xaa2   :  { %v4331_v59 = vpop.f32.mrf.mxu0 }
 0xaa3   :  { %v4402_v61 = vadd.f32 %v7209_v16, %v4331_v59 }
 0xaa4   :  { %v5672_v54 = vpop.f32.mrf.mxu0 }
 0xaa5   :  { %v4405_v37 = vadd.f32 %v7102_v40, %v4402_v61 }
 0xaa7   :  { %v4406_v13 = vsub.f32 0.0, %v4405_v37 }
 0xaa9   :  { %v4407_v39 = vmul.f32 1.442695, %v4406_v13 }
 0xaaa   :  { %v4478_v10 = vpop.f32.mrf.mxu0 }
 0xaab   :  { %5835 = vpow2.f32 %v4407_v39  ;;  %v4479_v43 = vadd.f32 %v7118_v48, %v4478_v10  ;;  %v4799_v48 = vld [vmem:[%s7286_s16] ss:$0 sm:$0xff] }
 0xaac   :  { %v5694_v25 = vpop.f32.mrf.mxu0  ;;  %5837 = vpow2.f32 %v4255_v11 }
 0xab2   :  { %v4633_v52 = vpop.f32.mrf.mxu0 }
 0xab4   :  { %v5716_v16 = vpop.f32.mrf.mxu0 }
 0xab8   :  { %v5836_v27 = vpop.eup %5835 }
 0xab9   :  { %v4409_v32 = vadd.f32 1.0, %v5836_v27  ;;  %v5838_v38 = vpop.eup %5837 }
 0xaba   :  { %v4257_v41 = vadd.f32 1.0, %v5838_v38 }
 0xabb   :  { %5839 = vrcp.f32 %v4409_v32 }
 0xabc   :  { %5841 = vrcp.f32 %v4257_v41 }
 0xac8   :  { %v5840_v34 = vpop.eup %5839 }
 0xac9   :  { %v4552_v40 = vmul.f32 %v5840_v34, %v4549_v12  ;;  %v5842_v62 = vpop.eup %5841 }
 0xaca   :  { %v4264_v5 = vmul.f32 %v5842_v62, %v4262_v3 }
 0xacb   :  { %v4553_v35 = vadd.f32 %v4552_v40, %v4479_v43 }
 0xacc   :  { %v4555_v6 = vsub.f32 1.0, %v4264_v5 }
 0xacd   :  { %5843 = vtanh.f32 %v4553_v35 }
 0xace   :  { %v4556_v30 = vmul.f32 %v4555_v6, %v7214_v9 }
 0xada   :  { %v5844_v21 = vpop.eup %5843 }
 0xadb   :  { %v4557_v36 = vmul.f32 %v5844_v21, %v4264_v5 }
 0xadd   :  { %v4558_v28 = vadd.f32 %v4557_v36, %v4556_v30 }
 0xadf   :  { %5726 = vmatmul.mubr.msk.f32.vlgmr.msra.gmra.mxu1 %vm219_vm1, %v4558_v28 }
 0xb9f   :  { %v4706_v56 = vpop.f32.mrf.mxu1 }
 0xba0   :  { %v4707_v44 = vadd.f32 %v4706_v56, %v4633_v52 }
 0xba1   :  { %v5727_v45 = vpop.f32.mrf.mxu1 }
 0xba2   :  { %v4717_v33 = vadd.f32 %v4799_v48, %v4707_v44 }
 0xba4   :  { %4718 = vst.msk [vmem:[#allocation20] sm:$0xff] %vm219_vm1, %v4717_v33 }
 0xba5   :  { %6109 = shalt.err (!%p6106_p3)
}
 0xba6   :  { %4728 = dma.vmem_to_hbm [thread:$0]  %s4726_s5, 128, %s7287_s17, [#allocation4]  }
 0xba7   :  { %6130 = dma.done.wait [#allocation4], 128  }
 0xba8   :  { %6131 = vsyncadd [#allocation4], 4294967168 }
 0xba9   :  { %4732 = vsyncpa [#allocation3], 1 }
 0xbaa   :  { %4733 = vsyncpa [#allocation6], 1 }
 0xbab   :  { %4734 = vsyncpa [#allocation9], 1 }
 0xbac   :  { %4735 = vsyncpa [#allocation12], 1 }
 0xbad   :  { %4736 = vsyncpa [#allocation15], 1 }
 0xbae   :  { %4737 = vsyncpa [#allocation18], 1 }
 0xbaf   :  { %4738 = vsyncpa [#allocation4], 1 }

</bundles_post_ra>
